<compile_context>
chip_gen: v6e
topology: v6e:2x2x1
jax: 0.10.0
libtpu: 0.0.40
codegen_flags: <defaults>
</compile_context>

<pallas_src>
import functools

import jax
import jax.numpy as jnp
from jax.experimental import pallas as pl
from jax.experimental.pallas import tpu as pltpu


# ----------------------------------------------------------------------------
# Kernel A: Conv_Body  (conv3x3+ReLU -> conv3x3+ReLU -> 2x2 max-pool), fused
# ----------------------------------------------------------------------------
def _backbone_kernel(x_ref, w1_ref, b1_ref, w2_ref, b2_ref, o_ref, c1p_ref,
                     *, H, W, Cin, C1):
    """x_ref : (1, H+2, W+2, Cin)  zero-padded image tile
       w1_ref: (9*Cin, C1)  b1_ref: (1, C1)
       w2_ref: (9*C1,  C1)  b2_ref: (1, C1)
       o_ref : (1, H//2, W//2, C1)
       c1p_ref: VMEM scratch (H+2, W+2, C1), padded conv1 output."""
    # Scratch persists across grid steps; its zero border never changes and
    # the interior is fully overwritten each step -> zero it only once.
    @pl.when(pl.program_id(0) == 0)
    def _():
        c1p_ref[...] = jnp.zeros((H + 2, W + 2, C1), jnp.float32)

    # ---- conv1 via im2col: one MXU matmul with K = 9*Cin -------------------
    x = x_ref[0]                                                  # (H+2,W+2,Cin)
    taps1 = [x[dy:dy + H, dx:dx + W, :]
             for dy in range(3) for dx in range(3)]
    patch1 = jnp.concatenate(taps1, axis=-1).reshape(H * W, 9 * Cin)
    c1 = jnp.dot(patch1, w1_ref[...], preferred_element_type=jnp.float32)
    c1 = jnp.maximum(c1 + b1_ref[...], 0.0)                      # (H*W, C1)

    # ---- stage conv1 output in the zero-padded VMEM scratch (never to HBM) -
    c1p_ref[1:H + 1, 1:W + 1, :] = c1.reshape(H, W, C1)
    c1p = c1p_ref[...]

    # ---- conv2 via im2col: one MXU matmul with K = 9*C1 --------------------
    taps2 = [c1p[dy:dy + H, dx:dx + W, :]
             for dy in range(3) for dx in range(3)]
    patch2 = jnp.concatenate(taps2, axis=-1).reshape(H * W, 9 * C1)
    c2 = jnp.dot(patch2, w2_ref[...], preferred_element_type=jnp.float32)
    c2 = jnp.maximum(c2 + b2_ref[...], 0.0)                      # (H*W, C1)

    # ---- fused 2x2 max-pool (spatial_scale = 0.5) --------------------------
    y = c2.reshape(H // 2, 2, W, C1)
    r = jnp.maximum(y[:, 0, :, :], y[:, 1, :, :])                # (H/2, W, C1)
    r = r.reshape(H // 2, W // 2, 2, C1)
    o_ref[0, :, :, :] = jnp.maximum(r[:, :, 0, :], r[:, :, 1, :])


def conv_body(x_nhwc, w1r, b1, w2r, b2):
    """Fused backbone: two 3x3 same-convs + ReLU + 2x2 max-pool, one grid step
    per image; batch axis is 'parallel' so v7x can shard it over its 2 TCs."""
    N, H, W, Cin = x_nhwc.shape
    C1 = w1r.shape[1]
    xp = jnp.pad(x_nhwc, ((0, 0), (1, 1), (1, 1), (0, 0)))
    kern = functools.partial(_backbone_kernel, H=H, W=W, Cin=Cin, C1=C1)
    return pl.pallas_call(
        kern,
        out_shape=jax.ShapeDtypeStruct((N, H // 2, W // 2, C1), jnp.float32),
        grid=(N,),
        in_specs=[
            pl.BlockSpec((1, H + 2, W + 2, Cin), lambda n: (n, 0, 0, 0)),
            pl.BlockSpec((9 * Cin, C1), lambda n: (0, 0)),
            pl.BlockSpec((1, C1), lambda n: (0, 0)),
            pl.BlockSpec((9 * C1, C1), lambda n: (0, 0)),
            pl.BlockSpec((1, C1), lambda n: (0, 0)),
        ],
        out_specs=pl.BlockSpec((1, H // 2, W // 2, C1), lambda n: (n, 0, 0, 0)),
        scratch_shapes=[pltpu.VMEM((H + 2, W + 2, C1), jnp.float32)],
        compiler_params=pltpu.CompilerParams(
            dimension_semantics=("parallel",)),
    )(xp, w1r, b1, w2r, b2)


# ----------------------------------------------------------------------------
# Kernel B: HOI head  (RoIAlign-as-matmul -> fc1 -> fc2 -> heads -> losses)
# ----------------------------------------------------------------------------
def _hoi_head_kernel(m_ref, feat_ref, wfc1_ref, bfc1_ref, wfc2_ref, bfc2_ref,
                     wh_ref, bh_ref, alab_ref, flab_ref,
                     act_loss_ref, act_acc_ref, aff_loss_ref, aff_acc_ref,
                     *, R, res, C1, num_actions):
    # RoIAlign (bin-center bilinear) as a single MXU matmul:
    #   (R*res*res, N*Hc*Wc) @ (N*Hc*Wc, C1) -> (R*res*res, C1)
    pooled = jnp.dot(m_ref[...], feat_ref[...],
                     preferred_element_type=jnp.float32)
    # Per-RoI flatten is a plain reshape (bin-major then channel); wfc1 rows
    # were pre-permuted in the wrapper so this equals torch's NCHW .view(R,-1).
    pooled_flat = pooled.reshape(R, res * res * C1)

    h1 = jnp.dot(pooled_flat, wfc1_ref[...],
                 preferred_element_type=jnp.float32) + bfc1_ref[...]
    h1 = jnp.maximum(h1, 0.0)
    h2 = jnp.dot(h1, wfc2_ref[...],
                 preferred_element_type=jnp.float32) + bfc2_ref[...]
    h2 = jnp.maximum(h2, 0.0)
    # fused action + affinity heads: one (hidden, num_actions+1) matmul
    logits = jnp.dot(h2, wh_ref[...],
                     preferred_element_type=jnp.float32) + bh_ref[...]
    act_logits = logits[:, :num_actions]
    aff_logits = logits[:, num_actions:num_actions + 1]

    def bce_stats(x, y):
        # numerically stable BCE-with-logits (== F.binary_cross_entropy_with_logits)
        per = jnp.maximum(x, 0.0) - x * y + jnp.log1p(jnp.exp(-jnp.abs(x)))
        loss = jnp.mean(per)
        pred = (x > 0.0).astype(jnp.float32)
        acc = jnp.mean((pred == y).astype(jnp.float32))
        return loss, acc

    al, aa = bce_stats(act_logits, alab_ref[...])
    fl, fa = bce_stats(aff_logits, flab_ref[...])
    act_loss_ref[0, 0] = al
    act_acc_ref[0, 0] = aa
    aff_loss_ref[0, 0] = fl
    aff_acc_ref[0, 0] = fa


def hoi_head(feat_flat, roi_mat, wfc1p, bfc1, wfc2, bfc2, wheads, bheads,
             action_labels, affinity_labels, *, resolution, num_actions):
    NHW, C1 = feat_flat.shape
    RB = roi_mat.shape[0]
    R = action_labels.shape[0]
    kern = functools.partial(_hoi_head_kernel, R=R, res=resolution, C1=C1,
                             num_actions=num_actions)
    outs = pl.pallas_call(
        kern,
        out_shape=tuple(jax.ShapeDtypeStruct((1, 1), jnp.float32)
                        for _ in range(4)),
        grid=(1,),
        in_specs=[
            pl.BlockSpec((RB, NHW), lambda i: (0, 0)),
            pl.BlockSpec((NHW, C1), lambda i: (0, 0)),
            pl.BlockSpec(wfc1p.shape, lambda i: (0, 0)),
            pl.BlockSpec(bfc1.shape, lambda i: (0, 0)),
            pl.BlockSpec(wfc2.shape, lambda i: (0, 0)),
            pl.BlockSpec(bfc2.shape, lambda i: (0, 0)),
            pl.BlockSpec(wheads.shape, lambda i: (0, 0)),
            pl.BlockSpec(bheads.shape, lambda i: (0, 0)),
            pl.BlockSpec(action_labels.shape, lambda i: (0, 0)),
            pl.BlockSpec(affinity_labels.shape, lambda i: (0, 0)),
        ],
        out_specs=tuple(pl.BlockSpec((1, 1), lambda i: (0, 0))
                        for _ in range(4)),
        compiler_params=pltpu.CompilerParams(
            dimension_semantics=("arbitrary",)),
    )(roi_mat, feat_flat, wfc1p, bfc1, wfc2, bfc2, wheads, bheads,
      action_labels, affinity_labels)
    act_loss, act_acc, aff_loss, aff_acc = outs
    return act_loss[0, 0], act_acc[0, 0], aff_loss[0, 0], aff_acc[0, 0]


# ----------------------------------------------------------------------------
# JAX glue: RoIAlign bilinear coefficients folded into a dense matmul operand
# ----------------------------------------------------------------------------
def build_roi_interp_matrix(rois, spatial_scale, resolution, N, Hc, Wc):
    """Dense (R*res*res, N*Hc*Wc) matrix M so that M @ feat_flat reproduces
    bin-center bilinear RoIAlign (one sample per bin).
    TODO(synk): single sample per bin approximates torchvision/Detectron
    RoIAlign's adaptive sampling_ratio averaging."""
    R = rois.shape[0]
    batch_idx = rois[:, 0].astype(jnp.int32)
    x1 = rois[:, 1] * spatial_scale
    y1 = rois[:, 2] * spatial_scale
    x2 = rois[:, 3] * spatial_scale
    y2 = rois[:, 4] * spatial_scale
    rw = jnp.maximum(x2 - x1, 1.0)
    rh = jnp.maximum(y2 - y1, 1.0)
    bw = rw / resolution
    bh = rh / resolution
    centers = jnp.arange(resolution, dtype=jnp.float32) + 0.5
    sy = jnp.clip(y1[:, None] + centers[None, :] * bh[:, None], 0.0, Hc - 1.0)
    sx = jnp.clip(x1[:, None] + centers[None, :] * bw[:, None], 0.0, Wc - 1.0)
    y0 = jnp.floor(sy)
    x0 = jnp.floor(sx)
    yp = jnp.minimum(y0 + 1.0, Hc - 1.0)
    xp = jnp.minimum(x0 + 1.0, Wc - 1.0)
    wy1 = sy - y0
    wy0 = 1.0 - wy1
    wx1 = sx - x0
    wx0 = 1.0 - wx1
    ry = (wy0[..., None] * jax.nn.one_hot(y0.astype(jnp.int32), Hc)
          + wy1[..., None] * jax.nn.one_hot(yp.astype(jnp.int32), Hc))  # (R,res,Hc)
    rx = (wx0[..., None] * jax.nn.one_hot(x0.astype(jnp.int32), Wc)
          + wx1[..., None] * jax.nn.one_hot(xp.astype(jnp.int32), Wc))  # (R,res,Wc)
    bo = jax.nn.one_hot(batch_idx, N)                                    # (R,N)
    M = jnp.einsum('rn,riy,rjx->rijnyx', bo, ry, rx)
    return M.reshape(R * resolution * resolution, N * Hc * Wc)


# ----------------------------------------------------------------------------
# Generalized_RCNN (synthetic, deterministic params)
# ----------------------------------------------------------------------------
class GeneralizedRCNNPallas:
    def __init__(self, key, in_ch=3, dim=32, resolution=7, hidden=64,
                 num_actions=24):
        self.resolution = resolution
        self.dim = dim
        self.num_actions = num_actions
        self.spatial_scale = 0.5  # Conv_Body does one 2x2 max-pool
        ks = jax.random.split(key, 8)
        s = 0.05
        # Conv_Body: two 3x3 conv + ReLU; weights pre-reshaped for im2col.
        w1 = s * jax.random.normal(ks[0], (3, 3, in_ch, dim), jnp.float32)
        self.w1r = w1.reshape(9 * in_ch, dim)
        self.b1 = jnp.zeros((1, dim), jnp.float32)
        w2 = s * jax.random.normal(ks[1], (3, 3, dim, dim), jnp.float32)
        self.w2r = w2.reshape(9 * dim, dim)
        self.b2 = jnp.zeros((1, dim), jnp.float32)
        # HOI head: two FC + fused output heads (action multi-label + affinity)
        flat = dim * resolution * resolution
        wfc1 = s * jax.random.normal(ks[2], (flat, hidden), jnp.float32)
        # Permute rows from torch NCHW flatten order (c, i, j) to the kernel's
        # bin-major order (i*res+j, c) so the in-kernel reshape-flatten is exact.
        self.wfc1p = wfc1.reshape(dim, resolution * resolution, hidden) \
                         .transpose(1, 0, 2).reshape(flat, hidden)
        self.bfc1 = jnp.zeros((1, hidden), jnp.float32)
        self.wfc2 = s * jax.random.normal(ks[3], (hidden, hidden), jnp.float32)
        self.bfc2 = jnp.zeros((1, hidden), jnp.float32)
        wact = s * jax.random.normal(ks[4], (hidden, num_actions), jnp.float32)
        waff = s * jax.random.normal(ks[5], (hidden, 1), jnp.float32)
        self.wheads = jnp.concatenate([wact, waff], axis=1)   # (hidden, A+1)
        self.bheads = jnp.zeros((1, num_actions + 1), jnp.float32)

    def forward(self, data_nchw, im_info, rois, action_labels, affinity_labels):
        del im_info  # only used for proposal bookkeeping in the original code
        # Conv_Body (fused conv1 + conv2 + 2x2 max-pool)
        x = jnp.transpose(data_nchw, (0, 2, 3, 1)).astype(jnp.float32)  # ->NHWC
        blob_conv = conv_body(x, self.w1r, self.b1, self.w2r, self.b2)
        N, Hc, Wc, C = blob_conv.shape
        feat_flat = blob_conv.reshape(N * Hc * Wc, C)   # free reshape in XLA

        # roi_feature_transform coefficients (data-dependent -> JAX glue)
        roi_mat = build_roi_interp_matrix(rois, self.spatial_scale,
                                          self.resolution, N, Hc, Wc)

        # HOI_Head + HOI_Head.loss, all fused in one Pallas kernel
        act_loss, act_acc, aff_loss, aff_acc = hoi_head(
            feat_flat, roi_mat, self.wfc1p, self.bfc1, self.wfc2, self.bfc2,
            self.wheads, self.bheads, action_labels, affinity_labels,
            resolution=self.resolution, num_actions=self.num_actions)

        return {
            'losses': {
                'loss_hoi_interaction_action': act_loss.reshape(1),
                'loss_hoi_interaction_affinity': aff_loss.reshape(1),
            },
            'metrics': {
                'accuracy_interaction_cls': act_acc.reshape(1),
                'accuracy_interaction_affinity': aff_acc.reshape(1),
            },
        }


# ----------------------------------------------------------------------------
if __name__ == "__main__":
    key = jax.random.PRNGKey(0)
    k_data, k_roi, k_act, k_aff, k_param = jax.random.split(key, 5)

    N, C, H, W = 2, 3, 16, 16
    R = 8                      # number of HOI proposals (person/object pairs)
    NUM_ACTIONS = 24

    data = jax.random.normal(k_data, (N, C, H, W), jnp.float32)      # NCHW
    im_info = jnp.array([[H, W, 1.0], [H, W, 1.0]], jnp.float32)

    # rois: (batch_idx, x1, y1, x2, y2) in image coordinates
    bidx = (jnp.arange(R) % N).astype(jnp.float32)[:, None]
    xy1 = jax.random.uniform(k_roi, (R, 2), minval=0.0, maxval=6.0)
    wh = jax.random.uniform(jax.random.fold_in(k_roi, 1), (R, 2),
                            minval=6.0, maxval=9.0)
    rois = jnp.concatenate([bidx, xy1, jnp.minimum(xy1 + wh, 15.0)], axis=1)

    action_labels = jax.random.bernoulli(k_act, 0.3, (R, NUM_ACTIONS)).astype(
        jnp.float32)
    affinity_labels = jax.random.bernoulli(k_aff, 0.5, (R, 1)).astype(
        jnp.float32)

    model = GeneralizedRCNNPallas(k_param, in_ch=C, dim=32, resolution=7,
                                  hidden=64, num_actions=NUM_ACTIONS)
    out = model.forward(data, im_info, rois, action_labels, affinity_labels)
    out = jax.block_until_ready(out)

    assert out['losses']['loss_hoi_interaction_action'].shape == (1,)
    assert out['losses']['loss_hoi_interaction_affinity'].shape == (1,)
    assert out['metrics']['accuracy_interaction_cls'].shape == (1,)
    assert out['metrics']['accuracy_interaction_affinity'].shape == (1,)
    print("KERNEL_OK")
</pallas_src>

<mosaic_0001>
module attributes {stable_mosaic.version = 11 : i64} {
  func.func @_backbone_kernel(%arg0: i32, %arg1: memref<1x18x18x3xf32, #tpu.memory_space<vmem>>, %arg2: memref<27x32xf32, #tpu.memory_space<vmem>>, %arg3: memref<1x32xf32, #tpu.memory_space<vmem>>, %arg4: memref<288x32xf32, #tpu.memory_space<vmem>>, %arg5: memref<1x32xf32, #tpu.memory_space<vmem>>, %arg6: memref<1x8x8x32xf32, #tpu.memory_space<vmem>>, %arg7: memref<18x18x32xf32, #tpu.memory_space<vmem>>) attributes {dimension_semantics = [#tpu.dimension_semantics<parallel>], iteration_bounds = array<i64: 2>, scalar_prefetch = 0 : i64, scratch_operands = 1 : i64, tpu.core_type = #tpu.core_type<tc>, window_params = [{transform_indices = @transform_0, window_bounds = array<i64: 1, 18, 18, 3>}, {pipeline_mode = #tpu.pipeline_mode<synchronous>, transform_indices = @transform_1, window_bounds = array<i64: 27, 32>}, {pipeline_mode = #tpu.pipeline_mode<synchronous>, transform_indices = @transform_2, window_bounds = array<i64: 1, 32>}, {pipeline_mode = #tpu.pipeline_mode<synchronous>, transform_indices = @transform_3, window_bounds = array<i64: 288, 32>}, {pipeline_mode = #tpu.pipeline_mode<synchronous>, transform_indices = @transform_4, window_bounds = array<i64: 1, 32>}, {transform_indices = @transform_5, window_bounds = array<i64: 1, 8, 8, 32>}]} {
    %c0_i32 = arith.constant 0 : i32
    %0 = arith.cmpi eq, %arg0, %c0_i32 : i32
    %1 = arith.extui %0 : i1 to i32
    %c0_i32_0 = arith.constant 0 : i32
    %2 = arith.cmpi ne, %1, %c0_i32_0 : i32
    scf.if %2 {
      %cst_24 = arith.constant 0.000000e+00 : f32
      %59 = vector.broadcast %cst_24 : f32 to vector<18x18x32xf32>
      %c0_25 = arith.constant 0 : index
      %c0_26 = arith.constant 0 : index
      %c0_27 = arith.constant 0 : index
      %60 = vector.load %arg7[%c0_25, %c0_26, %c0_27] : memref<18x18x32xf32, #tpu.memory_space<vmem>>, vector<18x18x32xf32>
      tpu.vector_store %arg7[%c0_25, %c0_26, %c0_27], %59 {strides = array<i32>} : memref<18x18x32xf32, #tpu.memory_space<vmem>>, vector<18x18x32xf32>,
    } else {
    }
    %c0 = arith.constant 0 : index
    %c0_1 = arith.constant 0 : index
    %c0_2 = arith.constant 0 : index
    %c0_3 = arith.constant 0 : index
    %3 = vector.load %arg1[%c0, %c0_1, %c0_2, %c0_3] : memref<1x18x18x3xf32, #tpu.memory_space<vmem>>, vector<1x18x18x3xf32>
    %4 = vector.shape_cast %3 : vector<1x18x18x3xf32> to vector<18x18x3xf32>
    %5 = vector.extract_strided_slice %4 {offsets = [0, 0, 0], sizes = [16, 16, 3], strides = [1, 1, 1]} : vector<18x18x3xf32> to vector<16x16x3xf32>
    %6 = vector.extract_strided_slice %4 {offsets = [0, 1, 0], sizes = [16, 16, 3], strides = [1, 1, 1]} : vector<18x18x3xf32> to vector<16x16x3xf32>
    %7 = vector.extract_strided_slice %4 {offsets = [0, 2, 0], sizes = [16, 16, 3], strides = [1, 1, 1]} : vector<18x18x3xf32> to vector<16x16x3xf32>
    %8 = vector.extract_strided_slice %4 {offsets = [1, 0, 0], sizes = [16, 16, 3], strides = [1, 1, 1]} : vector<18x18x3xf32> to vector<16x16x3xf32>
    %9 = vector.extract_strided_slice %4 {offsets = [1, 1, 0], sizes = [16, 16, 3], strides = [1, 1, 1]} : vector<18x18x3xf32> to vector<16x16x3xf32>
    %10 = vector.extract_strided_slice %4 {offsets = [1, 2, 0], sizes = [16, 16, 3], strides = [1, 1, 1]} : vector<18x18x3xf32> to vector<16x16x3xf32>
    %11 = vector.extract_strided_slice %4 {offsets = [2, 0, 0], sizes = [16, 16, 3], strides = [1, 1, 1]} : vector<18x18x3xf32> to vector<16x16x3xf32>
    %12 = vector.extract_strided_slice %4 {offsets = [2, 1, 0], sizes = [16, 16, 3], strides = [1, 1, 1]} : vector<18x18x3xf32> to vector<16x16x3xf32>
    %13 = vector.extract_strided_slice %4 {offsets = [2, 2, 0], sizes = [16, 16, 3], strides = [1, 1, 1]} : vector<18x18x3xf32> to vector<16x16x3xf32>
    %14 = tpu.concatenate %5, %6, %7, %8, %9, %10, %11, %12, %13 in 2 : vector<16x16x3xf32>, vector<16x16x3xf32>, vector<16x16x3xf32>, vector<16x16x3xf32>, vector<16x16x3xf32>, vector<16x16x3xf32>, vector<16x16x3xf32>, vector<16x16x3xf32>, vector<16x16x3xf32> -> vector<16x16x27xf32>
    %15 = vector.shape_cast %14 : vector<16x16x27xf32> to vector<256x27xf32>
    %c0_4 = arith.constant 0 : index
    %c0_5 = arith.constant 0 : index
    %16 = vector.load %arg2[%c0_4, %c0_5] : memref<27x32xf32, #tpu.memory_space<vmem>>, vector<27x32xf32>
    %cst = arith.constant dense<0.000000e+00> : vector<256x32xf32>
    %17 = tpu.matmul %15, %16, %cst {dimension_numbers = #tpu.dot_dimension_numbers<[1], [0], [0], [1], [0, 0, 1, 1], [], []>} : vector<256x27xf32>, vector<27x32xf32>, vector<256x32xf32> -> vector<256x32xf32>
    %c0_6 = arith.constant 0 : index
    %c0_7 = arith.constant 0 : index
    %18 = vector.load %arg3[%c0_6, %c0_7] : memref<1x32xf32, #tpu.memory_space<vmem>>, vector<1x32xf32>
    %19 = vector.broadcast %18 : vector<1x32xf32> to vector<256x32xf32>
    %20 = arith.addf %17, %19 : vector<256x32xf32>
    %cst_8 = arith.constant 0.000000e+00 : f32
    %21 = vector.broadcast %cst_8 : f32 to vector<256x32xf32>
    %22 = arith.maximumf %20, %21 : vector<256x32xf32>
    %23 = vector.shape_cast %22 : vector<256x32xf32> to vector<16x16x32xf32>
    %c1 = arith.constant 1 : index
    %c1_9 = arith.constant 1 : index
    %c0_10 = arith.constant 0 : index
    %24 = vector.load %arg7[%c1, %c1_9, %c0_10] : memref<18x18x32xf32, #tpu.memory_space<vmem>>, vector<16x16x32xf32>
    tpu.vector_store %arg7[%c1, %c1_9, %c0_10], %23 {strides = array<i32>} : memref<18x18x32xf32, #tpu.memory_space<vmem>>, vector<16x16x32xf32>,
    %c0_11 = arith.constant 0 : index
    %c0_12 = arith.constant 0 : index
    %c0_13 = arith.constant 0 : index
    %25 = vector.load %arg7[%c0_11, %c0_12, %c0_13] : memref<18x18x32xf32, #tpu.memory_space<vmem>>, vector<18x18x32xf32>
    %26 = vector.extract_strided_slice %25 {offsets = [0, 0, 0], sizes = [16, 16, 32], strides = [1, 1, 1]} : vector<18x18x32xf32> to vector<16x16x32xf32>
    %27 = vector.extract_strided_slice %25 {offsets = [0, 1, 0], sizes = [16, 16, 32], strides = [1, 1, 1]} : vector<18x18x32xf32> to vector<16x16x32xf32>
    %28 = vector.extract_strided_slice %25 {offsets = [0, 2, 0], sizes = [16, 16, 32], strides = [1, 1, 1]} : vector<18x18x32xf32> to vector<16x16x32xf32>
    %29 = vector.extract_strided_slice %25 {offsets = [1, 0, 0], sizes = [16, 16, 32], strides = [1, 1, 1]} : vector<18x18x32xf32> to vector<16x16x32xf32>
    %30 = vector.extract_strided_slice %25 {offsets = [1, 1, 0], sizes = [16, 16, 32], strides = [1, 1, 1]} : vector<18x18x32xf32> to vector<16x16x32xf32>
    %31 = vector.extract_strided_slice %25 {offsets = [1, 2, 0], sizes = [16, 16, 32], strides = [1, 1, 1]} : vector<18x18x32xf32> to vector<16x16x32xf32>
    %32 = vector.extract_strided_slice %25 {offsets = [2, 0, 0], sizes = [16, 16, 32], strides = [1, 1, 1]} : vector<18x18x32xf32> to vector<16x16x32xf32>
    %33 = vector.extract_strided_slice %25 {offsets = [2, 1, 0], sizes = [16, 16, 32], strides = [1, 1, 1]} : vector<18x18x32xf32> to vector<16x16x32xf32>
    %34 = vector.extract_strided_slice %25 {offsets = [2, 2, 0], sizes = [16, 16, 32], strides = [1, 1, 1]} : vector<18x18x32xf32> to vector<16x16x32xf32>
    %35 = tpu.concatenate %26, %27, %28, %29, %30, %31, %32, %33, %34 in 2 : vector<16x16x32xf32>, vector<16x16x32xf32>, vector<16x16x32xf32>, vector<16x16x32xf32>, vector<16x16x32xf32>, vector<16x16x32xf32>, vector<16x16x32xf32>, vector<16x16x32xf32>, vector<16x16x32xf32> -> vector<16x16x288xf32>
    %36 = vector.shape_cast %35 : vector<16x16x288xf32> to vector<256x288xf32>
    %c0_14 = arith.constant 0 : index
    %c0_15 = arith.constant 0 : index
    %37 = vector.load %arg4[%c0_14, %c0_15] : memref<288x32xf32, #tpu.memory_space<vmem>>, vector<288x32xf32>
    %cst_16 = arith.constant dense<0.000000e+00> : vector<256x32xf32>
    %38 = tpu.matmul %36, %37, %cst_16 {dimension_numbers = #tpu.dot_dimension_numbers<[1], [0], [0], [1], [0, 0, 1, 1], [], []>} : vector<256x288xf32>, vector<288x32xf32>, vector<256x32xf32> -> vector<256x32xf32>
    %c0_17 = arith.constant 0 : index
    %c0_18 = arith.constant 0 : index
    %39 = vector.load %arg5[%c0_17, %c0_18] : memref<1x32xf32, #tpu.memory_space<vmem>>, vector<1x32xf32>
    %40 = vector.broadcast %39 : vector<1x32xf32> to vector<256x32xf32>
    %41 = arith.addf %38, %40 : vector<256x32xf32>
    %cst_19 = arith.constant 0.000000e+00 : f32
    %42 = vector.broadcast %cst_19 : f32 to vector<256x32xf32>
    %43 = arith.maximumf %41, %42 : vector<256x32xf32>
    %44 = vector.shape_cast %43 : vector<256x32xf32> to vector<8x2x16x32xf32>
    %45 = vector.extract_strided_slice %44 {offsets = [0, 0, 0, 0], sizes = [8, 1, 16, 32], strides = [1, 1, 1, 1]} : vector<8x2x16x32xf32> to vector<8x1x16x32xf32>
    %46 = vector.shape_cast %45 : vector<8x1x16x32xf32> to vector<8x16x32xf32>
    %47 = vector.extract_strided_slice %44 {offsets = [0, 1, 0, 0], sizes = [8, 1, 16, 32], strides = [1, 1, 1, 1]} : vector<8x2x16x32xf32> to vector<8x1x16x32xf32>
    %48 = vector.shape_cast %47 : vector<8x1x16x32xf32> to vector<8x16x32xf32>
    %49 = arith.maximumf %46, %48 : vector<8x16x32xf32>
    %50 = vector.shape_cast %49 : vector<8x16x32xf32> to vector<8x8x2x32xf32>
    %51 = vector.extract_strided_slice %50 {offsets = [0, 0, 0, 0], sizes = [8, 8, 1, 32], strides = [1, 1, 1, 1]} : vector<8x8x2x32xf32> to vector<8x8x1x32xf32>
    %52 = vector.shape_cast %51 : vector<8x8x1x32xf32> to vector<8x8x32xf32>
    %53 = vector.extract_strided_slice %50 {offsets = [0, 0, 1, 0], sizes = [8, 8, 1, 32], strides = [1, 1, 1, 1]} : vector<8x8x2x32xf32> to vector<8x8x1x32xf32>
    %54 = vector.shape_cast %53 : vector<8x8x1x32xf32> to vector<8x8x32xf32>
    %55 = arith.maximumf %52, %54 : vector<8x8x32xf32>
    %c0_20 = arith.constant 0 : index
    %c0_21 = arith.constant 0 : index
    %c0_22 = arith.constant 0 : index
    %c0_23 = arith.constant 0 : index
    %56 = vector.load %arg6[%c0_20, %c0_21, %c0_22, %c0_23] : memref<1x8x8x32xf32, #tpu.memory_space<vmem>>, vector<1x8x8x32xf32>
    %57 = vector.shape_cast %56 : vector<1x8x8x32xf32> to vector<8x8x32xf32>
    %58 = vector.shape_cast %55 : vector<8x8x32xf32> to vector<1x8x8x32xf32>
    tpu.vector_store %arg6[%c0_20, %c0_21, %c0_22, %c0_23], %58 {strides = array<i32>} : memref<1x8x8x32xf32, #tpu.memory_space<vmem>>, vector<1x8x8x32xf32>,
    return
  }
  func.func @transform_0(%arg0: i32) -> (i32, i32, i32, i32) {
    %c0_i32 = arith.constant 0 : i32
    %c0_i32_0 = arith.constant 0 : i32
    %c0_i32_1 = arith.constant 0 : i32
    %c0_i32_2 = arith.constant 0 : i32
    return %arg0, %c0_i32, %c0_i32_0, %c0_i32_1 : i32, i32, i32, i32
  }
  func.func @transform_1(%arg0: i32) -> (i32, i32) {
    %c0_i32 = arith.constant 0 : i32
    %c0_i32_0 = arith.constant 0 : i32
    %c0_i32_1 = arith.constant 0 : i32
    return %c0_i32, %c0_i32_0 : i32, i32
  }
  func.func @transform_2(%arg0: i32) -> (i32, i32) {
    %c0_i32 = arith.constant 0 : i32
    %c0_i32_0 = arith.constant 0 : i32
    %c0_i32_1 = arith.constant 0 : i32
    return %c0_i32, %c0_i32_0 : i32, i32
  }
  func.func @transform_3(%arg0: i32) -> (i32, i32) {
    %c0_i32 = arith.constant 0 : i32
    %c0_i32_0 = arith.constant 0 : i32
    %c0_i32_1 = arith.constant 0 : i32
    return %c0_i32, %c0_i32_0 : i32, i32
  }
  func.func @transform_4(%arg0: i32) -> (i32, i32) {
    %c0_i32 = arith.constant 0 : i32
    %c0_i32_0 = arith.constant 0 : i32
    %c0_i32_1 = arith.constant 0 : i32
    return %c0_i32, %c0_i32_0 : i32, i32
  }
  func.func @transform_5(%arg0: i32) -> (i32, i32, i32, i32) {
    %c0_i32 = arith.constant 0 : i32
    %c0_i32_0 = arith.constant 0 : i32
    %c0_i32_1 = arith.constant 0 : i32
    %c0_i32_2 = arith.constant 0 : i32
    return %arg0, %c0_i32, %c0_i32_0, %c0_i32_1 : i32, i32, i32, i32
  }
}

</mosaic_0001>

<bundles_post_ra>
// kernel: tpu_custom_call.1
= control target key start
LH: loop header
LB: loop body
LE: loop exit
PB: predicated region body
PF: predicated region fallthrough
CT: control target
= control target key end

     0   :  { %10 = vsyncpa [#allocation4], 0  ;;  %s9239_s0 = inlined_call_operand.vmem [shape: f32[2,18,18,3], index: 0, kind: input, shape index: {}]   ;;  %s9240_s1 = inlined_call_operand.vmem [shape: f32[27,32], index: 1, kind: input, shape index: {}]   ;;  %s9241_s2 = inlined_call_operand.vmem [shape: f32[1,32], index: 2, kind: input, shape index: {}]   ;;  %s9242_s3 = inlined_call_operand.vmem [shape: f32[288,32], index: 3, kind: input, shape index: {}]   ;;  %s9243_s4 = inlined_call_operand.vmem [shape: f32[1,32], index: 4, kind: input, shape index: {}]   ;;  %s9244_s5 = inlined_call_operand.hbm [shape: f32[2,8,8,32], index: 5, kind: output, shape index: {}]  }
   0x1   :  { %12 = vsyncpa [#allocation4 + $0x1], 0  ;;  %s5876_s18 = smov 0   ;;  %s5878_s19 = smov 0  }
   0x2   :  { %s5880_s20 = smov 0   ;;  %s5882_s21 = smov 0  }
   0x3 LB: > { %s5897_s22 = sadd.s32 4294967295, %s5827_s21   ;;  %s4786_s23 = sadd.s32 4294967294, %s5827_s21   ;;  %s5827_s21 = sphi %s5882_s21, %s9587_s21   ;;  %s5823_s20 = sphi %s5880_s20, %s9586_s20   ;;  %s5819_s19 = sphi %s5878_s19, %s9585_s19   ;;  %s5815_s18 = sphi %s5876_s18, %s9584_s18  }
   0x4   : > { %s5901_s24 = sadd.s32 1, %s5827_s21   ;;  %s135_s25 = sadd.s32 1, %s5823_s20 }
   0x5   : > { %s132_s26 = ssub.s32 %s5827_s21, %s5901_s24  ;;  %p145_p0 = scmp.ne.s32.totalorder %s5823_s20, %s5819_s19 }
   0x6   : > { %p133_p1 = scmp.eq.s32.totalorder %s132_s26, 0  ;;  %p146_p2 = scmp.eq.s32.totalorder %s5897_s22, 1 }
   0x7   : > { %p151_p3 = scmp.ne.s32.totalorder %s5819_s19, %s5815_s18  ;;  %p152_p4 = scmp.eq.s32.totalorder %s4786_s23, 1 }
   0x8   : > { %s5912_s27 = scalar_select %p133_p1, %s5823_s20, %s135_s25  }
   0x9   : > { %p5914_p5 = por %p146_p2, %p145_p0  ;;  %p5918_p6 = por %p152_p4, %p151_p3 }
   0xa   : > { %p4789_p7 = scmp.ge.s32.totalorder %s5827_s21, 1  ;;  %p190_p8 = scmp.lt.s32.totalorder %s5827_s21, 3 }
   0xc   : > { %p191_p9 = pnand %p4789_p7, %p190_p8 }
   0xe   : > { %194 = sbr.rel (%p191_p9) target bundleno = 1261 (0x4ed), region = 40 }
  0x13   : > { %s215_s30 = sand.u32 1, %s5819_s19   ;;  %p218_p10 = scmp.lt.s32.totalorder %s5897_s22, 1 }
  0x14   : > { %s4790_s6 = sshll.u32 %s215_s30, 6  ;;  %p4792_p11 = scmp.ne.s32.totalorder %s5897_s22, 0 }
  0x15   : > { %s219_s7 = scalar_select %p218_p10, %s5897_s22, 1 }
  0x16   : > { %s5934_s12 = scalar_lea.vmem [#allocation3], %s4790_s6  ;;  %226 = sbr.rel (%p4792_p11) target bundleno = 55 (0x37), region = 44 }
  0x17   : > { %s5178_s8 = smul.u32 432, %s219_s7 }
  0x19   : > { %s5932_s11 = scalar_lea.vmem %s9239_s0, %s5178_s8 }
  0x1b   : > { %vm227_vm0 = vcmask 261120   ;;  %vm230_vm1 = vcmask 254976   ;;  %v5829_v0 = vmov 0.0  }
  0x1c   : > { %228 = vst.msk [vmem:[#allocation2] sm:$0xff] %vm227_vm0, %v5829_v0  ;;  %229 = vst.msk [vmem:[#allocation2 + $0x8] sm:$0xff] %vm227_vm0, %v5829_v0 }
  0x1d   : > { %232 = vst.msk [vmem:[#allocation2 + $0x18] sm:$0xff] %vm227_vm0, %v5829_v0  ;;  %233 = vst.msk [vmem:[#allocation2 + $0x20] sm:$0xff] %vm227_vm0, %v5829_v0 }
  0x1e   : > { %235 = vst.msk [vmem:[#allocation2 + $0x30] sm:$0xff] %vm227_vm0, %v5829_v0  ;;  %236 = vst.msk [vmem:[#allocation2 + $0x38] sm:$0xff] %vm227_vm0, %v5829_v0 }
  0x1f   : > { %238 = vst.msk [vmem:[#allocation2 + $0x48] sm:$0xff] %vm227_vm0, %v5829_v0  ;;  %239 = vst.msk [vmem:[#allocation2 + $0x50] sm:$0xff] %vm227_vm0, %v5829_v0 }
  0x20   : > { %241 = vst.msk [vmem:[#allocation2 + $0x60] sm:$0xff] %vm227_vm0, %v5829_v0  ;;  %242 = vst.msk [vmem:[#allocation2 + $0x68] sm:$0xff] %vm227_vm0, %v5829_v0 }
  0x21   : > { %244 = vst.msk [vmem:[#allocation2 + $0x78] sm:$0xff] %vm227_vm0, %v5829_v0  ;;  %245 = vst.msk [vmem:[#allocation2 + $0x80] sm:$0xff] %vm227_vm0, %v5829_v0 }
  0x22   : > { %247 = vst.msk [vmem:[#allocation2 + $0x90] sm:$0xff] %vm227_vm0, %v5829_v0  ;;  %248 = vst.msk [vmem:[#allocation2 + $0x98] sm:$0xff] %vm227_vm0, %v5829_v0 }
  0x23   : > { %250 = vst.msk [vmem:[#allocation2 + $0xa8] sm:$0xff] %vm227_vm0, %v5829_v0  ;;  %251 = vst.msk [vmem:[#allocation2 + $0xb0] sm:$0xff] %vm227_vm0, %v5829_v0 }
  0x24   : > { %253 = vst.msk [vmem:[#allocation2 + $0xc0] sm:$0xff] %vm227_vm0, %v5829_v0  ;;  %254 = vst.msk [vmem:[#allocation2 + $0xc8] sm:$0xff] %vm227_vm0, %v5829_v0 }
  0x25   : > { %256 = vst.msk [vmem:[#allocation2 + $0xd8] sm:$0xff] %vm227_vm0, %v5829_v0  ;;  %257 = vst.msk [vmem:[#allocation2 + $0xe0] sm:$0xff] %vm227_vm0, %v5829_v0 }
  0x26   : > { %259 = vst.msk [vmem:[#allocation2 + $0xf0] sm:$0xff] %vm227_vm0, %v5829_v0  ;;  %260 = vst.msk [vmem:[#allocation2 + $0xf8] sm:$0xff] %vm227_vm0, %v5829_v0 }
  0x27   : > { %262 = vst.msk [vmem:[#allocation2 + $0x108] sm:$0xff] %vm227_vm0, %v5829_v0  ;;  %263 = vst.msk [vmem:[#allocation2 + $0x110] sm:$0xff] %vm227_vm0, %v5829_v0 }
  0x28   : > { %265 = vst.msk [vmem:[#allocation2 + $0x120] sm:$0xff] %vm227_vm0, %v5829_v0  ;;  %266 = vst.msk [vmem:[#allocation2 + $0x128] sm:$0xff] %vm227_vm0, %v5829_v0 }
  0x29   : > { %268 = vst.msk [vmem:[#allocation2 + $0x138] sm:$0xff] %vm227_vm0, %v5829_v0  ;;  %269 = vst.msk [vmem:[#allocation2 + $0x140] sm:$0xff] %vm227_vm0, %v5829_v0 }
  0x2a   : > { %271 = vst.msk [vmem:[#allocation2 + $0x150] sm:$0xff] %vm227_vm0, %v5829_v0  ;;  %272 = vst.msk [vmem:[#allocation2 + $0x158] sm:$0xff] %vm227_vm0, %v5829_v0 }
  0x2b   : > { %274 = vst.msk [vmem:[#allocation2 + $0x168] sm:$0xff] %vm227_vm0, %v5829_v0  ;;  %275 = vst.msk [vmem:[#allocation2 + $0x170] sm:$0xff] %vm227_vm0, %v5829_v0 }
  0x2c   : > { %277 = vst.msk [vmem:[#allocation2 + $0x180] sm:$0xff] %vm227_vm0, %v5829_v0  ;;  %278 = vst.msk [vmem:[#allocation2 + $0x188] sm:$0xff] %vm227_vm0, %v5829_v0 }
  0x2d   : > { %280 = vst.msk [vmem:[#allocation2 + $0x198] sm:$0xff] %vm227_vm0, %v5829_v0  ;;  %281 = vst.msk [vmem:[#allocation2 + $0x1a0] sm:$0xff] %vm227_vm0, %v5829_v0 }
  0x2e   : > { %231 = vst.msk [vmem:[#allocation2 + $0x10] sm:$0x3] %vm230_vm1, %v5829_v0  ;;  %234 = vst.msk [vmem:[#allocation2 + $0x28] sm:$0x3] %vm230_vm1, %v5829_v0 }
  0x2f   : > { %237 = vst.msk [vmem:[#allocation2 + $0x40] sm:$0x3] %vm230_vm1, %v5829_v0  ;;  %240 = vst.msk [vmem:[#allocation2 + $0x58] sm:$0x3] %vm230_vm1, %v5829_v0 }
  0x30   : > { %243 = vst.msk [vmem:[#allocation2 + $0x70] sm:$0x3] %vm230_vm1, %v5829_v0  ;;  %246 = vst.msk [vmem:[#allocation2 + $0x88] sm:$0x3] %vm230_vm1, %v5829_v0 }
  0x31   : > { %249 = vst.msk [vmem:[#allocation2 + $0xa0] sm:$0x3] %vm230_vm1, %v5829_v0  ;;  %252 = vst.msk [vmem:[#allocation2 + $0xb8] sm:$0x3] %vm230_vm1, %v5829_v0 }
  0x32   : > { %255 = vst.msk [vmem:[#allocation2 + $0xd0] sm:$0x3] %vm230_vm1, %v5829_v0  ;;  %258 = vst.msk [vmem:[#allocation2 + $0xe8] sm:$0x3] %vm230_vm1, %v5829_v0 }
  0x33   : > { %261 = vst.msk [vmem:[#allocation2 + $0x100] sm:$0x3] %vm230_vm1, %v5829_v0  ;;  %264 = vst.msk [vmem:[#allocation2 + $0x118] sm:$0x3] %vm230_vm1, %v5829_v0 }
  0x34   : > { %267 = vst.msk [vmem:[#allocation2 + $0x130] sm:$0x3] %vm230_vm1, %v5829_v0  ;;  %270 = vst.msk [vmem:[#allocation2 + $0x148] sm:$0x3] %vm230_vm1, %v5829_v0 }
  0x35   : > { %273 = vst.msk [vmem:[#allocation2 + $0x160] sm:$0x3] %vm230_vm1, %v5829_v0  ;;  %276 = vst.msk [vmem:[#allocation2 + $0x178] sm:$0x3] %vm230_vm1, %v5829_v0 }
  0x36   : > { %279 = vst.msk [vmem:[#allocation2 + $0x190] sm:$0x3] %vm230_vm1, %v5829_v0  ;;  %282 = vst.msk [vmem:[#allocation2 + $0x1a8] sm:$0x3] %vm230_vm1, %v5829_v0 }
  0x37 PF: > { %v5992_v1 = vld [vmem:[%s5932_s11 + $0x18] sm:$0xff]  ;;  %v5995_v2 = vld [vmem:[%s5932_s11 + $0x20] sm:$0xff]  ;;  %vm385_vm2 = vcmask 1046528   ;;  %v6003_v6 = vld [vmem:[%s5932_s11 + $0x8] sm:$0xff]  ;;  %s5830_s13 = smov 3   ;;  %vm562_vm3 = vcmask 1045504  }
  0x38   : > { %v5998_v3 = vld [vmem:[%s5932_s11] sm:$0xff]  ;;  %v391_v4 = vrot.slane %v5992_v1, 1  ;;  %v392_v5 = vrot.slane %v5995_v2, 1  ;;  %v6007_v8 = vld [vmem:[%s5932_s11 + $0x28] sm:$0x3]  ;;  %v387_v9 = vrot.slane %v6003_v6, 1 }
  0x39   : > { %v386_v7 = vrot.slane %v5998_v3, 1  ;;  %v394_v10 = vrot.slane %v6007_v8, 1  ;;  %v6012_v11 = vld [vmem:[%s5932_s11 + $0x10] sm:$0x3]  ;;  %v6015_v12 = vld [vmem:[%s5932_s11 + $0x38] sm:$0xff]  ;;  %v6045_v25 = vld [vmem:[%s5932_s11 + $0x48] sm:$0xff] }
  0x3a   : > { %v6018_v13 = vsel %vm385_vm2, %v391_v4, %v392_v5  ;;  %v389_v14 = vrot.slane %v6012_v11, 1  ;;  %v6022_v15 = vld [vmem:[%s5932_s11 + $0x40] sm:$0x3]  ;;  %v6025_v16 = vld [vmem:[%s5932_s11 + $0x30] sm:$0xff]  ;;  %v397_v19 = vrot.slane %v6015_v12, 1  ;;  %9378 = vst [vmem:[#allocation7_spill] sm:$0xff] %v6045_v25 }
  0x3b   : > { %470 = vrot.lane.b32.xlu1 %v6018_v13, %s5830_s13  ;;  %v388_v17 = vsel %vm385_vm2, %v386_v7, %v387_v9  ;;  %v6032_v18 = vsel %vm385_vm2, %v392_v5, %v394_v10  ;;  %v399_v20 = vrot.slane %v6022_v15, 1  ;;  %v396_v22 = vrot.slane %v6025_v16, 1  ;;  %v6039_v23 = vld [vmem:[%s5932_s11 + $0x50] sm:$0xff]  ;;  %v6042_v24 = vld [vmem:[%s5932_s11 + $0x58] sm:$0x3]  ;;  %v6060_v31 = vld [vmem:[%s5932_s11 + $0x68] sm:$0xff] }
  0x3c   : > { %466 = vrot.lane.b32.xlu0 %v388_v17, %s5830_s13  ;;  %v390_v21 = vsel %vm385_vm2, %v387_v9, %v389_v14  ;;  %9377 = vst [vmem:[#allocation6_spill] sm:$0xff] %v6039_v23  ;;  %v402_v27 = vrot.slane %v6039_v23, 1  ;;  %v404_v28 = vrot.slane %v6042_v24, 1  ;;  %v401_v30 = vrot.slane %v6045_v25, 1  ;;  %v6063_v32 = vld [vmem:[%s5932_s11 + $0x70] sm:$0x3] }
  0x3d   : > { %v6051_v26 = vsel %vm385_vm2, %v397_v19, %v399_v20  ;;  %v6056_v29 = vsel %vm385_vm2, %v396_v22, %v397_v19  ;;  %v6066_v33 = vld [vmem:[%s5932_s11 + $0x60] sm:$0xff]  ;;  %v407_v35 = vrot.slane %v6060_v31, 1  ;;  %v409_v36 = vrot.slane %v6063_v32, 1  ;;  %v6085_v40 = vld [vmem:[%s5932_s11 + $0x88] sm:$0x3]  ;;  %v6088_v41 = vld [vmem:[%s5932_s11 + $0x78] sm:$0xff] }
  0x3e   : > { %v6073_v34 = vsel %vm385_vm2, %v402_v27, %v404_v28  ;;  %v6078_v37 = vsel %vm385_vm2, %v401_v30, %v402_v27  ;;  %v406_v38 = vrot.slane %v6066_v33, 1  ;;  %v6082_v39 = vld [vmem:[%s5932_s11 + $0x80] sm:$0xff]  ;;  %9380 = vst [vmem:[#allocation9_spill] sm:$0xff] %v6088_v41  ;;  %v414_v44 = vrot.slane %v6085_v40, 1  ;;  %v6104_v47 = vld [vmem:[%s5932_s11 + $0x98] sm:$0xff]  ;;  %v6110_v49 = vld [vmem:[%s5932_s11 + $0x90] sm:$0xff] }
  0x3f   : > { %472 = vrot.lane.b32.xlu1 %v6032_v18, %s5830_s13  ;;  %9379 = vst [vmem:[#allocation8_spill] sm:$0xff] %v6078_v37  ;;  %v6095_v42 = vsel %vm385_vm2, %v407_v35, %v409_v36  ;;  %v412_v43 = vrot.slane %v6082_v39, 1  ;;  %v411_v46 = vrot.slane %v6088_v41, 1  ;;  %9383 = vst [vmem:[#allocation12_spill] sm:$0xff] %v6104_v47  ;;  %v6107_v48 = vld [vmem:[%s5932_s11 + $0xa0] sm:$0x3] }
  0x40   : > { %468 = vrot.lane.b32.xlu0 %v390_v21, %s5830_s13  ;;  %9381 = vst [vmem:[#allocation10_spill] sm:$0xff] %v6095_v42  ;;  %v6100_v45 = vsel %vm385_vm2, %v406_v38, %v407_v35  ;;  %9384 = vst [vmem:[#allocation13_spill] sm:$0xff] %v6110_v49  ;;  %v417_v51 = vrot.slane %v6104_v47, 1  ;;  %v419_v52 = vrot.slane %v6107_v48, 1  ;;  %v416_v54 = vrot.slane %v6110_v49, 1  ;;  %v6126_v55 = vld [vmem:[%s5932_s11 + $0xb0] sm:$0xff] }
  0x41   : > { %9382 = vst [vmem:[#allocation11_spill] sm:$0xff] %v6100_v45  ;;  %v6117_v50 = vsel %vm385_vm2, %v412_v43, %v414_v44  ;;  %v6122_v53 = vsel %vm385_vm2, %v411_v46, %v412_v43  ;;  %9387 = vst [vmem:[#allocation16_spill] sm:$0xff] %v6126_v55  ;;  %v6129_v56 = vld [vmem:[%s5932_s11 + $0xb8] sm:$0x3]  ;;  %v6132_v57 = vld [vmem:[%s5932_s11 + $0xa8] sm:$0xff]  ;;  %v422_v59 = vrot.slane %v6126_v55, 1 }
  0x42   : > { %9385 = vst [vmem:[#allocation14_spill] sm:$0xff] %v6117_v50  ;;  %9386 = vst [vmem:[#allocation15_spill] sm:$0xff] %v6122_v53  ;;  %v6139_v58 = vsel %vm385_vm2, %v417_v51, %v419_v52  ;;  %v424_v60 = vrot.slane %v6129_v56, 1  ;;  %v6144_v61 = vsel %vm385_vm2, %v416_v54, %v417_v51  ;;  %v421_v62 = vrot.slane %v6132_v57, 1  ;;  %v6148_v63 = vld [vmem:[%s5932_s11 + $0xc8] sm:$0xff]  ;;  %v6154_v4 = vld [vmem:[%s5932_s11 + $0xc0] sm:$0xff] }
  0x43   : > { %476 = vrot.lane.b32.xlu1 %v6051_v26, %s5830_s13  ;;  %9388 = vst [vmem:[#allocation17_spill] sm:$0xff] %v6132_v57  ;;  %9389 = vst [vmem:[#allocation18_spill] sm:$0xff] %v6139_v58  ;;  %v6151_v0 = vld [vmem:[%s5932_s11 + $0xd0] sm:$0x3]  ;;  %v427_v7 = vrot.slane %v6148_v63, 1  ;;  %v426_v14 = vrot.slane %v6154_v4, 1 }
  0x44   : > { %474 = vrot.lane.b32.xlu0 %v6056_v29, %s5830_s13  ;;  %9390 = vst [vmem:[#allocation19_spill] sm:$0xff] %v6144_v61  ;;  %9391 = vst [vmem:[#allocation20_spill] sm:$0xff] %v6154_v4  ;;  %v6161_v5 = vsel %vm385_vm2, %v422_v59, %v424_v60  ;;  %v429_v9 = vrot.slane %v6151_v0, 1  ;;  %v6166_v10 = vsel %vm385_vm2, %v421_v62, %v422_v59  ;;  %v6170_v17 = vld [vmem:[%s5932_s11 + $0xe0] sm:$0xff]  ;;  %v6173_v19 = vld [vmem:[%s5932_s11 + $0xe8] sm:$0x3] }
  0x45   : > { %9392 = vst [vmem:[#allocation21_spill] sm:$0xff] %v6161_v5  ;;  %9393 = vst [vmem:[#allocation22_spill] sm:$0xff] %v6166_v10  ;;  %v6176_v20 = vld [vmem:[%s5932_s11 + $0xd8] sm:$0xff]  ;;  %v432_v22 = vrot.slane %v6170_v17, 1  ;;  %v434_v27 = vrot.slane %v6173_v19, 1  ;;  %v6188_v28 = vsel %vm385_vm2, %v426_v14, %v427_v7  ;;  %v6198_v38 = vld [vmem:[%s5932_s11 + $0xf0] sm:$0xff] }
  0x46   : > { %v6183_v21 = vsel %vm385_vm2, %v427_v7, %v429_v9  ;;  %9395 = vst [vmem:[#allocation24_spill] sm:$0xff] %v6188_v28  ;;  %v431_v30 = vrot.slane %v6176_v20, 1  ;;  %v6192_v35 = vld [vmem:[%s5932_s11 + $0xf8] sm:$0xff]  ;;  %v6195_v36 = vld [vmem:[%s5932_s11 + $0x100] sm:$0x3]  ;;  %v436_v52 = vrot.slane %v6198_v38, 1 }
  0x47   : > { %480 = vrot.lane.b32.xlu1 %v6073_v34, %s5830_s13  ;;  %9394 = vst [vmem:[#allocation23_spill] sm:$0xff] %v6183_v21  ;;  %v6205_v43 = vsel %vm385_vm2, %v432_v22, %v434_v27  ;;  %v437_v44 = vrot.slane %v6192_v35, 1  ;;  %v439_v46 = vrot.slane %v6195_v36, 1  ;;  %v6214_v54 = vld [vmem:[%s5932_s11 + $0x110] sm:$0xff]  ;;  %v6217_v59 = vld [vmem:[%s5932_s11 + $0x118] sm:$0x3] }
  0x48   : > { %478 = vrot.lane.b32.xlu0 %v6078_v37, %s5830_s13  ;;  %9396 = vst [vmem:[#allocation25_spill] sm:$0xff] %v6205_v43  ;;  %v6210_v51 = vsel %vm385_vm2, %v431_v30, %v432_v22  ;;  %v6220_v60 = vld [vmem:[%s5932_s11 + $0x108] sm:$0xff]  ;;  %v442_v7 = vrot.slane %v6214_v54, 1  ;;  %v444_v9 = vrot.slane %v6217_v59, 1  ;;  %v6239_v30 = vld [vmem:[%s5932_s11 + $0x130] sm:$0x3] }
  0x49   : > { %9397 = vst [vmem:[#allocation26_spill] sm:$0xff] %v6210_v51  ;;  %v6227_v62 = vsel %vm385_vm2, %v437_v44, %v439_v46  ;;  %v6232_v14 = vsel %vm385_vm2, %v436_v52, %v437_v44  ;;  %v441_v22 = vrot.slane %v6220_v60, 1  ;;  %v6236_v27 = vld [vmem:[%s5932_s11 + $0x128] sm:$0xff]  ;;  %v449_v52 = vrot.slane %v6239_v30, 1  ;;  %s5831_s14 = smov 6   ;;  %s5832_s15 = smov 9  }
  0x4a   : > { %9398 = vst [vmem:[#allocation27_spill] sm:$0xff] %v6227_v62  ;;  %9399 = vst [vmem:[#allocation28_spill] sm:$0xff] %v6232_v14  ;;  %v6249_v46 = vsel %vm385_vm2, %v442_v7, %v444_v9  ;;  %v447_v44 = vrot.slane %v6236_v27, 1  ;;  %s5833_s16 = smov 12   ;;  %vm1341_vm4 = vcmask 23552   ;;  %vm1374_vm5 = vcmask 48128  }
  0x4b   : > { %484 = vrot.lane.b32.xlu1 %v6095_v42, %s5830_s13  ;;  %9400 = vst [vmem:[#allocation29_spill] sm:$0xff] %v6249_v46  ;;  %vm1713_vm6 = vcmask 1042432   ;;  %s5834_s8 = smov 15   ;;  %vm1407_vm7 = vcmask 72704   ;;  %vm1440_vm8 = vcmask 97280   ;;  %vm1473_vm9 = vcmask 121856  }
  0x4c   : > { %482 = vrot.lane.b32.xlu0 %v6100_v45, %s5830_s13  ;;  %v6271_v9 = vsel %vm385_vm2, %v447_v44, %v449_v52  ;;  %v6305_v45 = vld [vmem:[%s5932_s11 + $0x178] sm:$0x3]  ;;  %vm1506_vm10 = vcmask 146432   ;;  %vm1539_vm11 = vcmask 171008   ;;  %vm1572_vm12 = vcmask 195584   ;;  %s5840_s17 = smov 64  }
  0x4d   : > { %9402 = vst [vmem:[#allocation31_spill] sm:$0xff] %v6271_v9  ;;  %vm1616_vm13 = vcmask 220160   ;;  %vm1975_vm14 = vcmask 261120   ;;  %s5841_s23 = smov 96   ;;  %vm2936_vm15 = vcmask 523264   ;;  %vm2969_vm0 = vcmask 785408  }
  0x4e   : > { %vm4631_vm1 = vcmask 1041409  }
  0x4f   : > { %488 = vrot.lane.b32.xlu1 %v6117_v50, %s5830_s13  ;;  %v6302_v50 = vld [vmem:[%s5932_s11 + $0x170] sm:$0xff] }
  0x50   : > { %486 = vrot.lane.b32.xlu0 %v6122_v53, %s5830_s13 }
  0x53   : > { %492 = vrot.lane.b32.xlu1 %v6139_v58, %s5830_s13 }
  0x54   : > { %490 = vrot.lane.b32.xlu0 %v6144_v61, %s5830_s13  ;;  %v6280_v61 = vld [vmem:[%s5932_s11 + $0x158] sm:$0xff] }
  0x57   : > { %496 = vrot.lane.b32.xlu1 %v6161_v5, %s5830_s13 }
  0x58   : > { %494 = vrot.lane.b32.xlu0 %v6166_v10, %s5830_s13 }
  0x5b   : > { %500 = vrot.lane.b32.xlu1 %v6183_v21, %s5830_s13  ;;  %v6258_v21 = vld [vmem:[%s5932_s11 + $0x140] sm:$0xff] }
  0x5c   : > { %498 = vrot.lane.b32.xlu0 %v6188_v28, %s5830_s13 }
  0x5f   : > { %504 = vrot.lane.b32.xlu1 %v6205_v43, %s5830_s13  ;;  %v6254_v43 = vsel %vm385_vm2, %v441_v22, %v442_v7  ;;  %v452_v7 = vrot.slane %v6258_v21, 1 }
  0x60   : > { %502 = vrot.lane.b32.xlu0 %v6210_v51, %s5830_s13  ;;  %v6242_v51 = vld [vmem:[%s5932_s11 + $0x120] sm:$0xff]  ;;  %9401 = vst [vmem:[#allocation30_spill] sm:$0xff] %v6254_v43 }
  0x61   : > { %v446_v28 = vrot.slane %v6242_v51, 1 }
  0x63   : > { %508 = vrot.lane.b32.xlu1 %v6227_v62, %s5830_s13  ;;  %v6261_v62 = vld [vmem:[%s5932_s11 + $0x148] sm:$0x3]  ;;  %v6276_v10 = vsel %vm385_vm2, %v446_v28, %v447_v44  ;;  %v457_v28 = vrot.slane %v6280_v61, 1 }
  0x64   : > { %506 = vrot.lane.b32.xlu0 %v6232_v14, %s5830_s13  ;;  %v6264_v14 = vld [vmem:[%s5932_s11 + $0x138] sm:$0xff]  ;;  %v454_v22 = vrot.slane %v6261_v62, 1  ;;  %9403 = vst [vmem:[#allocation32_spill] sm:$0xff] %v6276_v10 }
  0x65   : > { %v451_v5 = vrot.slane %v6264_v14, 1 }
  0x66   : > { %v6293_v52 = vsel %vm385_vm2, %v452_v7, %v454_v22 }
  0x67   : > { %512 = vrot.lane.b32.xlu1 %v6249_v46, %s5830_s13  ;;  %v6283_v46 = vld [vmem:[%s5932_s11 + $0x160] sm:$0x3]  ;;  %9404 = vst [vmem:[#allocation33_spill] sm:$0xff] %v6293_v52  ;;  %v6298_v58 = vsel %vm385_vm2, %v451_v5, %v452_v7  ;;  %v462_v5 = vrot.slane %v6302_v50, 1  ;;  %v464_v7 = vrot.slane %v6305_v45, 1 }
  0x68   : > { %510 = vrot.lane.b32.xlu0 %v6254_v43, %s5830_s13  ;;  %v6286_v43 = vld [vmem:[%s5932_s11 + $0x150] sm:$0xff]  ;;  %v459_v44 = vrot.slane %v6283_v46, 1  ;;  %9405 = vst [vmem:[#allocation34_spill] sm:$0xff] %v6298_v58 }
  0x69   : > { %v456_v53 = vrot.slane %v6286_v43, 1 }
  0x6a   : > { %v6315_v22 = vsel %vm385_vm2, %v457_v28, %v459_v44  ;;  %v564_v44 = vrot.slane %v6003_v6, 2  ;;  %v571_v6 = vrot.slane %v6007_v8, 2  ;;  %v573_v8 = vrot.slane %v6025_v16, 2 }
  0x6b   : > { %516 = vrot.lane.b32.xlu1 %v6271_v9, %s5830_s13  ;;  %v6308_v9 = vld [vmem:[%s5932_s11 + $0x168] sm:$0xff]  ;;  %9406 = vst [vmem:[#allocation35_spill] sm:$0xff] %v6315_v22 }
  0x6c   : > { %514 = vrot.lane.b32.xlu0 %v6276_v10, %s5830_s13  ;;  %v6320_v10 = vsel %vm385_vm2, %v456_v53, %v457_v28  ;;  %v461_v42 = vrot.slane %v6308_v9, 1  ;;  %v563_v53 = vrot.slane %v5998_v3, 2 }
  0x6d   : > { %9407 = vst [vmem:[#allocation36_spill] sm:$0xff] %v6320_v10 }
  0x6e   : > { %v6333_v37 = vsel %vm385_vm2, %v461_v42, %v462_v5  ;;  %v568_v42 = vrot.slane %v5992_v1, 2 }
  0x6f   : > { %520 = vrot.lane.b32.xlu1 %v6293_v52, %s5830_s13  ;;  %v566_v52 = vrot.slane %v6012_v11, 2  ;;  %9409 = vst [vmem:[#allocation38_spill] sm:$0xff] %v6333_v37  ;;  %v565_v11 = vsel %vm562_vm3, %v563_v53, %v564_v44  ;;  %v579_v53 = vrot.slane %v6039_v23, 2 }
  0x70   : > { %518 = vrot.lane.b32.xlu0 %v6298_v58, %s5830_s13  ;;  %v6328_v58 = vsel %vm385_vm2, %v462_v5, %v464_v7  ;;  %v569_v7 = vrot.slane %v5995_v2, 2  ;;  %v574_v5 = vrot.slane %v6015_v12, 2 }
  0x71   : > { %9408 = vst [vmem:[#allocation37_spill] sm:$0xff] %v6328_v58  ;;  %v567_v28 = vsel %vm562_vm3, %v564_v44, %v566_v52  ;;  %v576_v52 = vrot.slane %v6022_v15, 2 }
  0x72   : > { %v6348_v3 = vsel %vm562_vm3, %v569_v7, %v571_v6  ;;  %v6366_v15 = vsel %vm562_vm3, %v573_v8, %v574_v5  ;;  %v589_v8 = vrot.slane %v6082_v39, 2 }
  0x73   : > { %524 = vrot.lane.b32.xlu1 %v6315_v22, %s5830_s13  ;;  %v6361_v44 = vsel %vm562_vm3, %v574_v5, %v576_v52  ;;  %v583_v5 = vrot.slane %v6066_v33, 2  ;;  %v606_v22 = vrot.slane %v6151_v0, 2 }
  0x74   : > { %522 = vrot.lane.b32.xlu0 %v6320_v10, %s5830_s13  ;;  %9410 = vst [vmem:[#allocation39_spill] sm:$0xff] %v6361_v44  ;;  %v601_v10 = vrot.slane %v6129_v56, 2 }
  0x77   : > { %528 = vrot.lane.b32.xlu1 %v6328_v58, %s5830_s13  ;;  %v596_v58 = vrot.slane %v6107_v48, 2 }
  0x78   : > { %526 = vrot.lane.b32.xlu0 %v6333_v37, %s5830_s13  ;;  %v6353_v37 = vsel %vm562_vm3, %v568_v42, %v569_v7  ;;  %v578_v7 = vrot.slane %v6045_v25, 2  ;;  %v586_v42 = vrot.slane %v6063_v32, 2  ;;  %s5835_s13 = smov 18  }
  0x7b   : > { %645 = vrot.lane.b32.xlu1 %v567_v28, %s5831_s14  ;;  %v581_v28 = vrot.slane %v6042_v24, 2  ;;  %v6379_v24 = vsel %vm562_vm3, %v578_v7, %v579_v53 }
  0x7c   : > { %643 = vrot.lane.b32.xlu0 %v565_v11, %s5831_s14  ;;  %v584_v11 = vrot.slane %v6060_v31, 2  ;;  %9412 = vst [vmem:[#allocation41_spill] sm:$0xff] %v6379_v24 }
  0x7d   : > { %v6374_v6 = vsel %vm562_vm3, %v579_v53, %v581_v28  ;;  %v591_v28 = vrot.slane %v6085_v40, 2  ;;  %v588_v53 = vrot.slane %v6088_v41, 2 }
  0x7e   : > { %9411 = vst [vmem:[#allocation40_spill] sm:$0xff] %v6374_v6  ;;  %v6387_v52 = vsel %vm562_vm3, %v584_v11, %v586_v42  ;;  %v6392_v32 = vsel %vm562_vm3, %v583_v5, %v584_v11  ;;  %v594_v42 = vrot.slane %v6104_v47, 2  ;;  %v593_v11 = vrot.slane %v6110_v49, 2 }
  0x7f   : > { %649 = vrot.lane.b32.xlu1 %v6348_v3, %s5831_s14  ;;  %9413 = vst [vmem:[#allocation42_spill] sm:$0xff] %v6387_v52  ;;  %9414 = vst [vmem:[#allocation43_spill] sm:$0xff] %v6392_v32  ;;  %v6400_v7 = vsel %vm562_vm3, %v589_v8, %v591_v28  ;;  %v6405_v40 = vsel %vm562_vm3, %v588_v53, %v589_v8  ;;  %v599_v28 = vrot.slane %v6126_v55, 2  ;;  %v598_v8 = vrot.slane %v6132_v57, 2 }
  0x80   : > { %647 = vrot.lane.b32.xlu0 %v6353_v37, %s5831_s14  ;;  %9415 = vst [vmem:[#allocation44_spill] sm:$0xff] %v6400_v7  ;;  %9416 = vst [vmem:[#allocation45_spill] sm:$0xff] %v6405_v40  ;;  %v6413_v5 = vsel %vm562_vm3, %v594_v42, %v596_v58  ;;  %v6418_v48 = vsel %vm562_vm3, %v593_v11, %v594_v42  ;;  %v604_v58 = vrot.slane %v6148_v63, 2  ;;  %v603_v42 = vrot.slane %v6154_v4, 2 }
  0x81   : > { %9417 = vst [vmem:[#allocation46_spill] sm:$0xff] %v6413_v5  ;;  %9418 = vst [vmem:[#allocation47_spill] sm:$0xff] %v6418_v48  ;;  %v6426_v53 = vsel %vm562_vm3, %v599_v28, %v601_v10  ;;  %v6431_v56 = vsel %vm562_vm3, %v598_v8, %v599_v28  ;;  %v609_v10 = vrot.slane %v6170_v17, 2  ;;  %v608_v28 = vrot.slane %v6176_v20, 2 }
  0x82   : > { %9419 = vst [vmem:[#allocation48_spill] sm:$0xff] %v6426_v53  ;;  %9420 = vst [vmem:[#allocation49_spill] sm:$0xff] %v6431_v56  ;;  %v6439_v11 = vsel %vm562_vm3, %v604_v58, %v606_v22  ;;  %v6444_v0 = vsel %vm562_vm3, %v603_v42, %v604_v58  ;;  %v614_v22 = vrot.slane %v6192_v35, 2  ;;  %v613_v58 = vrot.slane %v6198_v38, 2 }
  0x83   : > { %653 = vrot.lane.b32.xlu1 %v6361_v44, %s5831_s14  ;;  %9421 = vst [vmem:[#allocation50_spill] sm:$0xff] %v6439_v11  ;;  %9422 = vst [vmem:[#allocation51_spill] sm:$0xff] %v6444_v0 }
  0x84   : > { %651 = vrot.lane.b32.xlu0 %v6366_v15, %s5831_s14 }
  0x87   : > { %657 = vrot.lane.b32.xlu1 %v6374_v6, %s5831_s14 }
  0x88   : > { %655 = vrot.lane.b32.xlu0 %v6379_v24, %s5831_s14 }
  0x8b   : > { %661 = vrot.lane.b32.xlu1 %v6387_v52, %s5831_s14 }
  0x8c   : > { %659 = vrot.lane.b32.xlu0 %v6392_v32, %s5831_s14 }
  0x8f   : > { %665 = vrot.lane.b32.xlu1 %v6400_v7, %s5831_s14 }
  0x90   : > { %663 = vrot.lane.b32.xlu0 %v6405_v40, %s5831_s14 }
  0x93   : > { %669 = vrot.lane.b32.xlu1 %v6413_v5, %s5831_s14  ;;  %v611_v5 = vrot.slane %v6173_v19, 2  ;;  %v6457_v19 = vsel %vm562_vm3, %v608_v28, %v609_v10 }
  0x94   : > { %667 = vrot.lane.b32.xlu0 %v6418_v48, %s5831_s14  ;;  %9424 = vst [vmem:[#allocation53_spill] sm:$0xff] %v6457_v19 }
  0x95   : > { %v6452_v8 = vsel %vm562_vm3, %v609_v10, %v611_v5  ;;  %v619_v5 = vrot.slane %v6214_v54, 2  ;;  %v618_v10 = vrot.slane %v6220_v60, 2 }
  0x96   : > { %9423 = vst [vmem:[#allocation52_spill] sm:$0xff] %v6452_v8 }
  0x97   : > { %673 = vrot.lane.b32.xlu1 %v6426_v53, %s5831_s14 }
  0x98   : > { %671 = vrot.lane.b32.xlu0 %v6431_v56, %s5831_s14  ;;  %v616_v56 = vrot.slane %v6195_v36, 2  ;;  %v6470_v36 = vsel %vm562_vm3, %v613_v58, %v614_v22 }
  0x99   : > { %9426 = vst [vmem:[#allocation55_spill] sm:$0xff] %v6470_v36 }
  0x9a   : > { %v6465_v42 = vsel %vm562_vm3, %v614_v22, %v616_v56  ;;  %v624_v56 = vrot.slane %v6236_v27, 2  ;;  %v623_v22 = vrot.slane %v6242_v51, 2 }
  0x9b   : > { %677 = vrot.lane.b32.xlu1 %v6439_v11, %s5831_s14  ;;  %9425 = vst [vmem:[#allocation54_spill] sm:$0xff] %v6465_v42 }
  0x9c   : > { %675 = vrot.lane.b32.xlu0 %v6444_v0, %s5831_s14  ;;  %v621_v0 = vrot.slane %v6217_v59, 2  ;;  %v6483_v59 = vsel %vm562_vm3, %v618_v10, %v619_v5 }
  0x9d   : > { %9428 = vst [vmem:[#allocation57_spill] sm:$0xff] %v6483_v59 }
  0x9e   : > { %v6478_v28 = vsel %vm562_vm3, %v619_v5, %v621_v0  ;;  %v629_v0 = vrot.slane %v6258_v21, 2  ;;  %v628_v5 = vrot.slane %v6264_v14, 2 }
  0x9f   : > { %681 = vrot.lane.b32.xlu1 %v6452_v8, %s5831_s14  ;;  %9427 = vst [vmem:[#allocation56_spill] sm:$0xff] %v6478_v28 }
  0xa0   : > { %679 = vrot.lane.b32.xlu0 %v6457_v19, %s5831_s14  ;;  %v626_v19 = vrot.slane %v6239_v30, 2  ;;  %v6496_v30 = vsel %vm562_vm3, %v623_v22, %v624_v56 }
  0xa1   : > { %9430 = vst [vmem:[#allocation59_spill] sm:$0xff] %v6496_v30 }
  0xa2   : > { %v6491_v58 = vsel %vm562_vm3, %v624_v56, %v626_v19  ;;  %v634_v19 = vrot.slane %v6280_v61, 2  ;;  %v633_v56 = vrot.slane %v6286_v43, 2 }
  0xa3   : > { %685 = vrot.lane.b32.xlu1 %v6465_v42, %s5831_s14  ;;  %9429 = vst [vmem:[#allocation58_spill] sm:$0xff] %v6491_v58 }
  0xa4   : > { %683 = vrot.lane.b32.xlu0 %v6470_v36, %s5831_s14  ;;  %v631_v36 = vrot.slane %v6261_v62, 2  ;;  %v6511_v62 = vsel %vm562_vm3, %v628_v5, %v629_v0  ;;  %v638_v5 = vrot.slane %v6308_v9, 2 }
  0xa5   : > { %9433 = vst [vmem:[#allocation62_spill] sm:$0xff] %v6511_v62 }
  0xa6   : > { %v6504_v10 = vsel %vm562_vm3, %v629_v0, %v631_v36  ;;  %v6528_v0 = vsel %vm562_vm3, %v633_v56, %v634_v19 }
  0xa7   : > { %689 = vrot.lane.b32.xlu1 %v6478_v28, %s5831_s14  ;;  %9431 = vst [vmem:[#allocation60_spill] sm:$0xff] %v6504_v10  ;;  %9437 = vst [vmem:[#allocation66_spill] sm:$0xff] %v6528_v0 }
  0xa8   : > { %687 = vrot.lane.b32.xlu0 %v6483_v59, %s5831_s14  ;;  %v636_v59 = vrot.slane %v6283_v46, 2  ;;  %v639_v46 = vrot.slane %v6302_v50, 2 }
  0xaa   : > { %v6521_v36 = vsel %vm562_vm3, %v634_v19, %v636_v59 }
  0xab   : > { %693 = vrot.lane.b32.xlu1 %v6491_v58, %s5831_s14  ;;  %9435 = vst [vmem:[#allocation64_spill] sm:$0xff] %v6521_v36 }
  0xac   : > { %691 = vrot.lane.b32.xlu0 %v6496_v30, %s5831_s14  ;;  %v641_v30 = vrot.slane %v6305_v45, 2  ;;  %v6543_v45 = vsel %vm562_vm3, %v638_v5, %v639_v46 }
  0xad   : > { %v6508_v28 = vpop.permute.xlu1 %470  ;;  %9441 = vst [vmem:[#allocation70_spill] sm:$0xff] %v6543_v45 }
  0xae   : > { %9432 = vst [vmem:[#allocation61_spill] sm:$0xff] %v6508_v28  ;;  %v6514_v22 = vpop.permute.xlu0 %466  ;;  %v6538_v59 = vsel %vm562_vm3, %v639_v46, %v641_v30 }
  0xaf   : > { %9434 = vst [vmem:[#allocation63_spill] sm:$0xff] %v6514_v22  ;;  %697 = vrot.lane.b32.xlu1 %v6504_v10, %s5831_s14  ;;  %9439 = vst [vmem:[#allocation68_spill] sm:$0xff] %v6538_v59 }
  0xb0   : > { %695 = vrot.lane.b32.xlu0 %v6511_v62, %s5831_s14 }
  0xb1   : > { %v6525_v58 = vpop.permute.xlu1 %472 }
  0xb2   : > { %9436 = vst [vmem:[#allocation65_spill] sm:$0xff] %v6525_v58  ;;  %v6531_v42 = vpop.permute.xlu0 %468 }
  0xb3   : > { %9438 = vst [vmem:[#allocation67_spill] sm:$0xff] %v6531_v42  ;;  %701 = vrot.lane.b32.xlu1 %v6521_v36, %s5831_s14 }
  0xb4   : > { %699 = vrot.lane.b32.xlu0 %v6528_v0, %s5831_s14 }
  0xb5   : > { %v6540_v62 = vpop.permute.xlu1 %476 }
  0xb6   : > { %9440 = vst [vmem:[#allocation69_spill] sm:$0xff] %v6540_v62  ;;  %v6545_v19 = vpop.permute.xlu0 %474 }
  0xb7   : > { %9442 = vst [vmem:[#allocation71_spill] sm:$0xff] %v6545_v19  ;;  %705 = vrot.lane.b32.xlu1 %v6538_v59, %s5831_s14 }
  0xb8   : > { %703 = vrot.lane.b32.xlu0 %v6543_v45, %s5831_s14  ;;  %s5836_s14 = smov 21  }
  0xb9   : > { %v6551_v56 = vpop.permute.xlu1 %480 }
  0xba   : > { %9443 = vst [vmem:[#allocation72_spill] sm:$0xff] %v6551_v56  ;;  %v6553_v36 = vpop.permute.xlu0 %478 }
  0xbb   : > { %9444 = vst [vmem:[#allocation73_spill] sm:$0xff] %v6553_v36  ;;  %743 = vrot.lane.b32.xlu1 %v5995_v2, %s5832_s15 }
  0xbc   : > { %741 = vrot.lane.b32.xlu0 %v5992_v1, %s5832_s15 }
  0xbd   : > { %v6559_v30 = vpop.permute.xlu1 %484 }
  0xbe   : > { %v6561_v46 = vpop.permute.xlu0 %482 }
  0xbf   : > { %747 = vrot.lane.b32.xlu1 %v6015_v12, %s5832_s15 }
  0xc0   : > { %745 = vrot.lane.b32.xlu0 %v6025_v16, %s5832_s15 }
  0xc1   : > { %v6567_v5 = vpop.permute.xlu1 %488 }
  0xc2   : > { %v6569_v45 = vpop.permute.xlu0 %486 }
  0xc3   : > { %751 = vrot.lane.b32.xlu1 %v6039_v23, %s5832_s15  ;;  %v6672_v23 = vld [vmem:[%s5932_s11 + $0x188] sm:$0xff] }
  0xc4   : > { %749 = vrot.lane.b32.xlu0 %v6045_v25, %s5832_s15  ;;  %9449 = vst [vmem:[#allocation78_spill] sm:$0xff] %v6672_v23 }
  0xc5   : > { %v6575_v1 = vpop.permute.xlu1 %492 }
  0xc6   : > { %v6577_v2 = vpop.permute.xlu0 %490 }
  0xc7   : > { %755 = vrot.lane.b32.xlu1 %v6060_v31, %s5832_s15 }
  0xc8   : > { %753 = vrot.lane.b32.xlu0 %v6066_v33, %s5832_s15 }
  0xc9   : > { %v6583_v59 = vpop.permute.xlu1 %496 }
  0xca   : > { %v6585_v0 = vpop.permute.xlu0 %494 }
  0xcb   : > { %759 = vrot.lane.b32.xlu1 %v6082_v39, %s5832_s15 }
  0xcc   : > { %757 = vrot.lane.b32.xlu0 %v6088_v41, %s5832_s15 }
  0xcd   : > { %v6591_v10 = vpop.permute.xlu1 %500 }
  0xce   : > { %v6593_v56 = vpop.permute.xlu0 %498 }
  0xcf   : > { %763 = vrot.lane.b32.xlu1 %v6104_v47, %s5832_s15 }
  0xd0   : > { %761 = vrot.lane.b32.xlu0 %v6110_v49, %s5832_s15 }
  0xd1   : > { %v6599_v36 = vpop.permute.xlu1 %504 }
  0xd2   : > { %v6601_v62 = vpop.permute.xlu0 %502 }
  0xd3   : > { %767 = vrot.lane.b32.xlu1 %v6126_v55, %s5832_s15 }
  0xd4   : > { %765 = vrot.lane.b32.xlu0 %v6132_v57, %s5832_s15 }
  0xd5   : > { %v6607_v19 = vpop.permute.xlu1 %508 }
  0xd6   : > { %v6609_v58 = vpop.permute.xlu0 %506 }
  0xd7   : > { %771 = vrot.lane.b32.xlu1 %v6148_v63, %s5832_s15 }
  0xd8   : > { %769 = vrot.lane.b32.xlu0 %v6154_v4, %s5832_s15 }
  0xd9   : > { %v6615_v28 = vpop.permute.xlu1 %512 }
  0xda   : > { %v6617_v42 = vpop.permute.xlu0 %510 }
  0xdb   : > { %775 = vrot.lane.b32.xlu1 %v6170_v17, %s5832_s15 }
  0xdc   : > { %773 = vrot.lane.b32.xlu0 %v6176_v20, %s5832_s15 }
  0xdd   : > { %v6623_v8 = vpop.permute.xlu1 %516 }
  0xde   : > { %v6625_v22 = vpop.permute.xlu0 %514 }
  0xdf   : > { %779 = vrot.lane.b32.xlu1 %v6192_v35, %s5832_s15 }
  0xe0   : > { %777 = vrot.lane.b32.xlu0 %v6198_v38, %s5832_s15 }
  0xe1   : > { %v6631_v11 = vpop.permute.xlu1 %520 }
  0xe2   : > { %v6633_v53 = vpop.permute.xlu0 %518 }
  0xe3   : > { %783 = vrot.lane.b32.xlu1 %v6214_v54, %s5832_s15 }
  0xe4   : > { %781 = vrot.lane.b32.xlu0 %v6220_v60, %s5832_s15 }
  0xe5   : > { %v6639_v48 = vpop.permute.xlu1 %524 }
  0xe6   : > { %v6641_v7 = vpop.permute.xlu0 %522 }
  0xe7   : > { %787 = vrot.lane.b32.xlu1 %v6236_v27, %s5832_s15 }
  0xe8   : > { %785 = vrot.lane.b32.xlu0 %v6242_v51, %s5832_s15 }
  0xe9   : > { %v6647_v40 = vpop.permute.xlu1 %528 }
  0xea   : > { %v6649_v52 = vpop.permute.xlu0 %526 }
  0xeb   : > { %791 = vrot.lane.b32.xlu1 %v6258_v21, %s5832_s15 }
  0xec   : > { %789 = vrot.lane.b32.xlu0 %v6264_v14, %s5832_s15 }
  0xed   : > { %v6655_v32 = vpop.permute.xlu1 %645 }
  0xee   : > { %9445 = vst [vmem:[#allocation74_spill] sm:$0xff] %v6655_v32  ;;  %v6657_v6 = vpop.permute.xlu0 %643 }
  0xef   : > { %9446 = vst [vmem:[#allocation75_spill] sm:$0xff] %v6657_v6  ;;  %795 = vrot.lane.b32.xlu1 %v6280_v61, %s5832_s15  ;;  %v331_v6 = vld [vmem:[%s5932_s11 + $0x180] sm:$0xff] }
  0xf0   : > { %793 = vrot.lane.b32.xlu0 %v6286_v43, %s5832_s15 }
  0xf1   : > { %v6663_v24 = vpop.permute.xlu1 %649 }
  0xf2   : > { %9447 = vst [vmem:[#allocation76_spill] sm:$0xff] %v6663_v24  ;;  %v6665_v25 = vpop.permute.xlu0 %647 }
  0xf3   : > { %9448 = vst [vmem:[#allocation77_spill] sm:$0xff] %v6665_v25  ;;  %799 = vrot.lane.b32.xlu1 %v6302_v50, %s5832_s15 }
  0xf4   : > { %797 = vrot.lane.b32.xlu0 %v6308_v9, %s5832_s15 }
  0xf5   : > { %v6674_v32 = vpop.permute.xlu1 %653 }
  0xf6   : > { %9450 = vst [vmem:[#allocation79_spill] sm:$0xff] %v6674_v32  ;;  %v6677_v44 = vpop.permute.xlu0 %651  ;;  %v1351_v32 = vsel %vm1341_vm4, %v6060_v31, %v6559_v30 }
  0xf7   : > { %9451 = vst [vmem:[#allocation80_spill] sm:$0xff] %v6677_v44  ;;  %803 = vrot.lane.b32.xlu1 %v6672_v23, %s5832_s15 }
  0xf8   : > { %801 = vrot.lane.b32.xlu0 %v331_v6, %s5832_s15  ;;  %v1350_v6 = vsel %vm1341_vm4, %v6066_v33, %v6561_v46  ;;  %s5837_s15 = smov 24  }
  0xf9   : > { %v6682_v24 = vpop.permute.xlu1 %657 }
  0xfa   : > { %9452 = vst [vmem:[#allocation81_spill] sm:$0xff] %v6682_v24  ;;  %v6684_v25 = vpop.permute.xlu0 %655 }
  0xfb   : > { %9453 = vst [vmem:[#allocation82_spill] sm:$0xff] %v6684_v25  ;;  %845 = vrot.lane.b32.xlu1 %v6032_v18, %s5833_s16 }
  0xfc   : > { %843 = vrot.lane.b32.xlu0 %v6018_v13, %s5833_s16  ;;  %v1353_v13 = vsel %vm1341_vm4, %v6082_v39, %v6567_v5  ;;  %v1355_v5 = vsel %vm1341_vm4, %v6104_v47, %v6575_v1  ;;  %v1357_v1 = vsel %vm1341_vm4, %v6126_v55, %v6583_v59  ;;  %v1359_v59 = vsel %vm1341_vm4, %v6148_v63, %v6591_v10 }
  0xfd   : > { %v662_v23 = vpop.permute.xlu1 %661  ;;  %v1361_v63 = vsel %vm1341_vm4, %v6170_v17, %v6599_v36  ;;  %v1363_v17 = vsel %vm1341_vm4, %v6192_v35, %v6607_v19  ;;  %v1365_v35 = vsel %vm1341_vm4, %v6214_v54, %v6615_v28  ;;  %v1367_v54 = vsel %vm1341_vm4, %v6236_v27, %v6623_v8 }
  0xfe   : > { %v6697_v24 = vsel %vm1374_vm5, %v1351_v32, %v662_v23  ;;  %v660_v25 = vpop.permute.xlu0 %659  ;;  %v1352_v23 = vsel %vm1341_vm4, %v6088_v41, %v6569_v45  ;;  %v1354_v45 = vsel %vm1341_vm4, %v6110_v49, %v6577_v2  ;;  %v9456_v41 = vld [vmem:[#allocation11_spill] sm:$0xff]  ;;  %v1369_v27 = vsel %vm1341_vm4, %v6258_v21, %v6631_v11  ;;  %v9470_v21 = vld [vmem:[#allocation30_spill] sm:$0xff] }
  0xff   : > { %v6700_v18 = vsel %vm1374_vm5, %v1350_v6, %v660_v25  ;;  %849 = vrot.lane.b32.xlu1 %v6051_v26, %s5833_s16  ;;  %v9454_v6 = vld [vmem:[#allocation8_spill] sm:$0xff]  ;;  %v9458_v49 = vld [vmem:[#allocation15_spill] sm:$0xff] }
 0x100   : > { %847 = vrot.lane.b32.xlu0 %v6056_v29, %s5833_s16 }
 0x101   : > { %v666_v30 = vpop.permute.xlu1 %665 }
 0x102   : > { %v6713_v32 = vsel %vm1374_vm5, %v1353_v13, %v666_v30  ;;  %v664_v25 = vpop.permute.xlu0 %663 }
 0x103   : > { %v6716_v46 = vsel %vm1374_vm5, %v1352_v23, %v664_v25  ;;  %853 = vrot.lane.b32.xlu1 %v6073_v34, %s5833_s16  ;;  %v9455_v25 = vld [vmem:[#allocation10_spill] sm:$0xff] }
 0x104   : > { %851 = vrot.lane.b32.xlu0 %v9454_v6, %s5833_s16 }
 0x105   : > { %v670_v44 = vpop.permute.xlu1 %669 }
 0x106   : > { %v6729_v13 = vsel %vm1374_vm5, %v1355_v5, %v670_v44  ;;  %v668_v30 = vpop.permute.xlu0 %667  ;;  %v1356_v44 = vsel %vm1341_vm4, %v6132_v57, %v6585_v0  ;;  %v9460_v57 = vld [vmem:[#allocation19_spill] sm:$0xff] }
 0x107   : > { %v6732_v23 = vsel %vm1374_vm5, %v1354_v45, %v668_v30  ;;  %857 = vrot.lane.b32.xlu1 %v9455_v25, %s5833_s16  ;;  %v9457_v30 = vld [vmem:[#allocation14_spill] sm:$0xff] }
 0x108   : > { %855 = vrot.lane.b32.xlu0 %v9456_v41, %s5833_s16 }
 0x109   : > { %v674_v47 = vpop.permute.xlu1 %673 }
 0x10a   : > { %v6745_v2 = vsel %vm1374_vm5, %v1357_v1, %v674_v47  ;;  %v672_v5 = vpop.permute.xlu0 %671  ;;  %v1358_v47 = vsel %vm1341_vm4, %v6154_v4, %v6593_v56  ;;  %v9462_v4 = vld [vmem:[#allocation22_spill] sm:$0xff] }
 0x10b   : > { %v6748_v45 = vsel %vm1374_vm5, %v1356_v44, %v672_v5  ;;  %861 = vrot.lane.b32.xlu1 %v9457_v30, %s5833_s16  ;;  %v9459_v5 = vld [vmem:[#allocation18_spill] sm:$0xff] }
 0x10c   : > { %859 = vrot.lane.b32.xlu0 %v9458_v49, %s5833_s16 }
 0x10d   : > { %v678_v55 = vpop.permute.xlu1 %677 }
 0x10e   : > { %v6761_v0 = vsel %vm1374_vm5, %v1359_v59, %v678_v55  ;;  %v676_v1 = vpop.permute.xlu0 %675  ;;  %v1360_v55 = vsel %vm1341_vm4, %v6176_v20, %v6601_v62  ;;  %v1362_v20 = vsel %vm1341_vm4, %v6198_v38, %v6609_v58  ;;  %v1364_v38 = vsel %vm1341_vm4, %v6220_v60, %v6617_v42 }
 0x10f   : > { %v6764_v44 = vsel %vm1374_vm5, %v1358_v47, %v676_v1  ;;  %865 = vrot.lane.b32.xlu1 %v9459_v5, %s5833_s16  ;;  %v9461_v1 = vld [vmem:[#allocation21_spill] sm:$0xff]  ;;  %v1366_v60 = vsel %vm1341_vm4, %v6242_v51, %v6625_v22  ;;  %v1368_v51 = vsel %vm1341_vm4, %v6264_v14, %v6633_v53  ;;  %v1607_v14 = vld [vmem:[%s9240_s1 + $0x10] sm:$0xff]  ;;  %v1371_v53 = vsel %vm1341_vm4, %v6280_v61, %v6639_v48  ;;  %v1605_v61 = vld [vmem:[%s9240_s1] sm:$0xff] }
 0x110   : > { %863 = vrot.lane.b32.xlu0 %v9460_v57, %s5833_s16  ;;  %v1372_v48 = vsel %vm1341_vm4, %v6308_v9, %v6649_v52 }
 0x111   : > { %v682_v10 = vpop.permute.xlu1 %681 }
 0x112   : > { %v6777_v56 = vsel %vm1374_vm5, %v1361_v63, %v682_v10  ;;  %v680_v59 = vpop.permute.xlu0 %679 }
 0x113   : > { %v6780_v47 = vsel %vm1374_vm5, %v1360_v55, %v680_v59  ;;  %869 = vrot.lane.b32.xlu1 %v9461_v1, %s5833_s16  ;;  %v9463_v55 = vld [vmem:[#allocation23_spill] sm:$0xff]  ;;  %v9464_v59 = vld [vmem:[#allocation24_spill] sm:$0xff] }
 0x114   : > { %867 = vrot.lane.b32.xlu0 %v9462_v4, %s5833_s16 }
 0x115   : > { %v686_v36 = vpop.permute.xlu1 %685 }
 0x116   : > { %v6793_v62 = vsel %vm1374_vm5, %v1363_v17, %v686_v36  ;;  %v684_v63 = vpop.permute.xlu0 %683 }
 0x117   : > { %v6796_v10 = vsel %vm1374_vm5, %v1362_v20, %v684_v63  ;;  %873 = vrot.lane.b32.xlu1 %v9463_v55, %s5833_s16  ;;  %v9465_v20 = vld [vmem:[#allocation25_spill] sm:$0xff]  ;;  %v9466_v63 = vld [vmem:[#allocation26_spill] sm:$0xff] }
 0x118   : > { %871 = vrot.lane.b32.xlu0 %v9464_v59, %s5833_s16 }
 0x119   : > { %v690_v19 = vpop.permute.xlu1 %689 }
 0x11a   : > { %v6809_v58 = vsel %vm1374_vm5, %v1365_v35, %v690_v19  ;;  %v688_v17 = vpop.permute.xlu0 %687 }
 0x11b   : > { %v6812_v36 = vsel %vm1374_vm5, %v1364_v38, %v688_v17  ;;  %877 = vrot.lane.b32.xlu1 %v9465_v20, %s5833_s16  ;;  %v9467_v38 = vld [vmem:[#allocation27_spill] sm:$0xff]  ;;  %v9468_v17 = vld [vmem:[#allocation28_spill] sm:$0xff] }
 0x11c   : > { %875 = vrot.lane.b32.xlu0 %v9466_v63, %s5833_s16 }
 0x11d   : > { %v694_v28 = vpop.permute.xlu1 %693 }
 0x11e   : > { %v6825_v42 = vsel %vm1374_vm5, %v1367_v54, %v694_v28  ;;  %v692_v35 = vpop.permute.xlu0 %691 }
 0x11f   : > { %v6828_v19 = vsel %vm1374_vm5, %v1366_v60, %v692_v35  ;;  %881 = vrot.lane.b32.xlu1 %v9467_v38, %s5833_s16  ;;  %v9469_v60 = vld [vmem:[#allocation29_spill] sm:$0xff]  ;;  %v1608_v35 = vld [vmem:[%s9240_s1 + $0x18] sm:$0x7] }
 0x120   : > { %879 = vrot.lane.b32.xlu0 %v9468_v17, %s5833_s16  ;;  %5002 = vmatprep.subr.msk.mxu0 %vm1713_vm6, %v1608_v35 }
 0x121   : > { %v698_v8 = vpop.permute.xlu1 %697  ;;  %5003 = vmatpush3.msk.msra.mxu0 %vm1713_vm6, %v1608_v35  ;;  %vm4641_vm6 = vcmask 1046534  }
 0x122   : > { %v6841_v22 = vsel %vm1374_vm5, %v1369_v27, %v698_v8  ;;  %v696_v54 = vpop.permute.xlu0 %695  ;;  %v1370_v27 = vsel %vm1341_vm4, %v6286_v43, %v6641_v7  ;;  %5004 = vmatprep.subr.mxu0 %v1607_v14  ;;  %v1373_v43 = vsel %vm1341_vm4, %v6302_v50, %v6647_v40 }
 0x123   : > { %v6844_v28 = vsel %vm1374_vm5, %v1368_v51, %v696_v54  ;;  %885 = vrot.lane.b32.xlu1 %v9469_v60, %s5833_s16  ;;  %v1606_v54 = vld [vmem:[%s9240_s1 + $0x8] sm:$0xff]  ;;  %5005 = vmatpush3.msra.mxu0 %v1607_v14 }
 0x124   : > { %883 = vrot.lane.b32.xlu0 %v9470_v21, %s5833_s16  ;;  %5006 = vmatprep.subr.mxu0 %v1606_v54 }
 0x125   : > { %v702_v11 = vpop.permute.xlu1 %701  ;;  %5007 = vmatpush3.msra.mxu0 %v1606_v54 }
 0x126   : > { %v6863_v8 = vsel %vm1374_vm5, %v1371_v53, %v702_v11  ;;  %v700_v51 = vpop.permute.xlu0 %699  ;;  %5008 = vmatprep.subr.mxu0 %v1605_v61  ;;  %v9472_v53 = vld [vmem:[#allocation6_spill] sm:$0xff]  ;;  %v9473_v11 = vld [vmem:[#allocation7_spill] sm:$0xff] }
 0x127   : > { %v6869_v21 = vsel %vm1374_vm5, %v1370_v27, %v700_v51  ;;  %946 = vrot.lane.b32.xlu1 %v6348_v3, %s5834_s8  ;;  %5009 = vmatpush3.msra.mxu0 %v1605_v61 }
 0x128   : > { %944 = vrot.lane.b32.xlu0 %v6353_v37, %s5834_s8 }
 0x129   : > { %v706_v7 = vpop.permute.xlu1 %705 }
 0x12a   : > { %v6885_v3 = vsel %vm1374_vm5, %v1373_v43, %v706_v7  ;;  %v704_v35 = vpop.permute.xlu0 %703 }
 0x12b   : > { %v6888_v37 = vsel %vm1374_vm5, %v1372_v48, %v704_v35  ;;  %1044 = vrot.lane.b32.xlu1 %v6015_v12, %s5835_s13  ;;  %v9474_v48 = vld [vmem:[#allocation41_spill] sm:$0xff]  ;;  %v9475_v35 = vld [vmem:[#allocation40_spill] sm:$0xff] }
 0x12c   : > { %1042 = vrot.lane.b32.xlu0 %v6025_v16, %s5835_s13 }
 0x12d   : > { %v6894_v50 = vpop.permute.xlu1 %743 }
 0x12e   : > { %v6896_v40 = vpop.permute.xlu0 %741 }
 0x12f   : > { %1146 = vrot.lane.b32.xlu1 %v6051_v26, %s5836_s14  ;;  %v9471_v26 = vld [vmem:[#allocation39_spill] sm:$0xff] }
 0x130   : > { %1144 = vrot.lane.b32.xlu0 %v6056_v29, %s5836_s14 }
 0x131   : > { %v6902_v9 = vpop.permute.xlu1 %747 }
 0x132   : > { %v6904_v52 = vpop.permute.xlu0 %745 }
 0x133   : > { %948 = vrot.lane.b32.xlu1 %v6366_v15, %s5834_s8 }
 0x134   : > { %1245 = vrot.lane.b32.xlu0 %v6366_v15, %s5837_s15 }
 0x135   : > { %v6910_v12 = vpop.permute.xlu1 %751 }
 0x136   : > { %v6912_v16 = vpop.permute.xlu0 %749 }
 0x137   : > { %950 = vrot.lane.b32.xlu1 %v9471_v26, %s5834_s8 }
 0x138   : > { %1247 = vrot.lane.b32.xlu0 %v9471_v26, %s5837_s15 }
 0x139   : > { %v6918_v29 = vpop.permute.xlu1 %755 }
 0x13a   : > { %v6920_v14 = vpop.permute.xlu0 %753 }
 0x13b   : > { %1048 = vrot.lane.b32.xlu1 %v9472_v53, %s5835_s13 }
 0x13c   : > { %1046 = vrot.lane.b32.xlu0 %v9473_v11, %s5835_s13 }
 0x13d   : > { %v760_v15 = vpop.permute.xlu1 %759 }
 0x13e   : > { %v6928_v27 = vsel %vm1407_vm7, %v6697_v24, %v760_v15  ;;  %v758_v51 = vpop.permute.xlu0 %757 }
 0x13f   : > { %v6932_v54 = vsel %vm1407_vm7, %v6700_v18, %v758_v51  ;;  %1150 = vrot.lane.b32.xlu1 %v6073_v34, %s5836_s14  ;;  %v9476_v51 = vld [vmem:[#allocation43_spill] sm:$0xff] }
 0x140   : > { %1148 = vrot.lane.b32.xlu0 %v9454_v6, %s5836_s14 }
 0x141   : > { %v764_v61 = vpop.permute.xlu1 %763 }
 0x142   : > { %v6940_v43 = vsel %vm1407_vm7, %v6713_v32, %v764_v61  ;;  %v762_v7 = vpop.permute.xlu0 %761  ;;  %v9477_v61 = vld [vmem:[#allocation42_spill] sm:$0xff] }
 0x143   : > { %v6944_v24 = vsel %vm1407_vm7, %v6716_v46, %v762_v7  ;;  %952 = vrot.lane.b32.xlu1 %v9474_v48, %s5834_s8 }
 0x144   : > { %1249 = vrot.lane.b32.xlu0 %v9474_v48, %s5837_s15 }
 0x145   : > { %v768_v34 = vpop.permute.xlu1 %767 }
 0x146   : > { %v6952_v18 = vsel %vm1407_vm7, %v6729_v13, %v768_v34  ;;  %v766_v6 = vpop.permute.xlu0 %765 }
 0x147   : > { %v6956_v32 = vsel %vm1407_vm7, %v6732_v23, %v766_v6  ;;  %954 = vrot.lane.b32.xlu1 %v9475_v35, %s5834_s8 }
 0x148   : > { %1251 = vrot.lane.b32.xlu0 %v9475_v35, %s5837_s15 }
 0x149   : > { %v772_v46 = vpop.permute.xlu1 %771 }
 0x14a   : > { %v6964_v26 = vsel %vm1407_vm7, %v6745_v2, %v772_v46  ;;  %v770_v53 = vpop.permute.xlu0 %769 }
 0x14b   : > { %v6968_v13 = vsel %vm1407_vm7, %v6748_v45, %v770_v53  ;;  %1052 = vrot.lane.b32.xlu1 %v6060_v31, %s5835_s13  ;;  %v9484_v53 = vld [vmem:[#allocation45_spill] sm:$0xff] }
 0x14c   : > { %1050 = vrot.lane.b32.xlu0 %v6066_v33, %s5835_s13 }
 0x14d   : > { %v776_v23 = vpop.permute.xlu1 %775 }
 0x14e   : > { %v6976_v11 = vsel %vm1407_vm7, %v6761_v0, %v776_v23  ;;  %v774_v15 = vpop.permute.xlu0 %773  ;;  %v9487_v23 = vld [vmem:[#allocation44_spill] sm:$0xff] }
 0x14f   : > { %v6980_v2 = vsel %vm1407_vm7, %v6764_v44, %v774_v15  ;;  %1154 = vrot.lane.b32.xlu1 %v9455_v25, %s5836_s14 }
 0x150   : > { %1152 = vrot.lane.b32.xlu0 %v9456_v41, %s5836_s14 }
 0x151   : > { %v780_v31 = vpop.permute.xlu1 %779 }
 0x152   : > { %v6988_v33 = vsel %vm1407_vm7, %v6777_v56, %v780_v31  ;;  %v778_v45 = vpop.permute.xlu0 %777 }
 0x153   : > { %v6992_v0 = vsel %vm1407_vm7, %v6780_v47, %v778_v45  ;;  %956 = vrot.lane.b32.xlu1 %v9476_v51, %s5834_s8  ;;  %v9490_v45 = vld [vmem:[#allocation12_spill] sm:$0xff] }
 0x154   : > { %1253 = vrot.lane.b32.xlu0 %v9476_v51, %s5837_s15 }
 0x155   : > { %v784_v25 = vpop.permute.xlu1 %783 }
 0x156   : > { %v7000_v41 = vsel %vm1407_vm7, %v6793_v62, %v784_v25  ;;  %v782_v44 = vpop.permute.xlu0 %781 }
 0x157   : > { %v7004_v56 = vsel %vm1407_vm7, %v6796_v10, %v782_v44  ;;  %958 = vrot.lane.b32.xlu1 %v9477_v61, %s5834_s8  ;;  %v9479_v10 = vld [vmem:[#allocation9_spill] sm:$0xff]  ;;  %v9492_v44 = vld [vmem:[#allocation47_spill] sm:$0xff] }
 0x158   : > { %1255 = vrot.lane.b32.xlu0 %v9477_v61, %s5837_s15 }
 0x159   : > { %v788_v47 = vpop.permute.xlu1 %787 }
 0x15a   : > { %v7012_v7 = vsel %vm1407_vm7, %v6809_v58, %v788_v47  ;;  %v786_v48 = vpop.permute.xlu0 %785 }
 0x15b   : > { %v7016_v62 = vsel %vm1407_vm7, %v6812_v36, %v786_v48  ;;  %1056 = vrot.lane.b32.xlu1 %v6082_v39, %s5835_s13  ;;  %v9493_v48 = vld [vmem:[#allocation46_spill] sm:$0xff] }
 0x15c   : > { %9478 = vst [vmem:[#allocation8_spill] sm:$0xff] %v7016_v62  ;;  %1054 = vrot.lane.b32.xlu0 %v9479_v10, %s5835_s13  ;;  %v9494_v10 = vld [vmem:[#allocation16_spill] sm:$0xff] }
 0x15d   : > { %v792_v34 = vpop.permute.xlu1 %791 }
 0x15e   : > { %v7024_v6 = vsel %vm1407_vm7, %v6825_v42, %v792_v34  ;;  %v790_v35 = vpop.permute.xlu0 %789  ;;  %v9495_v34 = vld [vmem:[#allocation17_spill] sm:$0xff] }
 0x15f   : > { %9480 = vst [vmem:[#allocation10_spill] sm:$0xff] %v7024_v6  ;;  %v7028_v58 = vsel %vm1407_vm7, %v6828_v19, %v790_v35  ;;  %1158 = vrot.lane.b32.xlu1 %v9457_v30, %s5836_s14  ;;  %v9504_v6 = vld [vmem:[#allocation67_spill] sm:$0xff] }
 0x160   : > { %9481 = vst [vmem:[#allocation11_spill] sm:$0xff] %v7028_v58  ;;  %1156 = vrot.lane.b32.xlu0 %v9458_v49, %s5836_s14 }
 0x161   : > { %v796_v39 = vpop.permute.xlu1 %795 }
 0x162   : > { %v7036_v36 = vsel %vm1407_vm7, %v6841_v22, %v796_v39  ;;  %v794_v46 = vpop.permute.xlu0 %793 }
 0x163   : > { %9482 = vst [vmem:[#allocation14_spill] sm:$0xff] %v7036_v36  ;;  %v7040_v42 = vsel %vm1407_vm7, %v6844_v28, %v794_v46  ;;  %960 = vrot.lane.b32.xlu1 %v9484_v53, %s5834_s8 }
 0x164   : > { %9483 = vst [vmem:[#allocation15_spill] sm:$0xff] %v7040_v42  ;;  %1257 = vrot.lane.b32.xlu0 %v9484_v53, %s5837_s15  ;;  %v9501_v42 = vld [vmem:[#allocation63_spill] sm:$0xff] }
 0x165   : > { %v800_v30 = vpop.permute.xlu1 %799 }
 0x166   : > { %v7048_v49 = vsel %vm1407_vm7, %v6863_v8, %v800_v30  ;;  %v798_v19 = vpop.permute.xlu0 %797  ;;  %v9496_v30 = vld [vmem:[#allocation48_spill] sm:$0xff] }
 0x167   : > { %9485 = vst [vmem:[#allocation18_spill] sm:$0xff] %v7048_v49  ;;  %v7052_v22 = vsel %vm1407_vm7, %v6869_v21, %v798_v19  ;;  %962 = vrot.lane.b32.xlu1 %v9487_v23, %s5834_s8  ;;  %v9491_v21 = vld [vmem:[#allocation13_spill] sm:$0xff]  ;;  %v5717_v49 = vld [vmem:[%s5932_s11] sm:$0xff] }
 0x168   : > { %9486 = vst [vmem:[#allocation19_spill] sm:$0xff] %v7052_v22  ;;  %1259 = vrot.lane.b32.xlu0 %v9487_v23, %s5837_s15  ;;  %v9497_v19 = vld [vmem:[#allocation49_spill] sm:$0xff] }
 0x169   : > { %v804_v28 = vpop.permute.xlu1 %803 }
 0x16a   : > { %v7060_v15 = vsel %vm1407_vm7, %v6885_v3, %v804_v28  ;;  %v802_v31 = vpop.permute.xlu0 %801 }
 0x16b   : > { %9488 = vst [vmem:[#allocation21_spill] sm:$0xff] %v7060_v15  ;;  %v7064_v8 = vsel %vm1407_vm7, %v6888_v37, %v802_v31  ;;  %1060 = vrot.lane.b32.xlu1 %v9490_v45, %s5835_s13  ;;  %v5714_v31 = vld [vmem:[%s5932_s11 + $0xc8] sm:$0xff]  ;;  %v9498_v45 = vld [vmem:[#allocation20_spill] sm:$0xff] }
 0x16c   : > { %9489 = vst [vmem:[#allocation22_spill] sm:$0xff] %v7064_v8  ;;  %1058 = vrot.lane.b32.xlu0 %v9491_v21, %s5835_s13  ;;  %v5716_v8 = vld [vmem:[%s5932_s11 + $0xd8] sm:$0xff] }
 0x16d   : > { %v7070_v51 = vpop.permute.xlu1 %845 }
 0x16e   : > { %v7072_v25 = vpop.permute.xlu0 %843 }
 0x16f   : > { %1162 = vrot.lane.b32.xlu1 %v9459_v5, %s5836_s14 }
 0x170   : > { %1160 = vrot.lane.b32.xlu0 %v9460_v57, %s5836_s14 }
 0x171   : > { %v7078_v3 = vpop.permute.xlu1 %849 }
 0x172   : > { %v7080_v37 = vpop.permute.xlu0 %847 }
 0x173   : > { %964 = vrot.lane.b32.xlu1 %v9492_v44, %s5834_s8 }
 0x174   : > { %1261 = vrot.lane.b32.xlu0 %v9492_v44, %s5837_s15 }
 0x175   : > { %v7086_v61 = vpop.permute.xlu1 %853 }
 0x176   : > { %v7088_v47 = vpop.permute.xlu0 %851 }
 0x177   : > { %966 = vrot.lane.b32.xlu1 %v9493_v48, %s5834_s8 }
 0x178   : > { %1263 = vrot.lane.b32.xlu0 %v9493_v48, %s5837_s15 }
 0x179   : > { %v7094_v57 = vpop.permute.xlu1 %857 }
 0x17a   : > { %v7096_v5 = vpop.permute.xlu0 %855 }
 0x17b   : > { %1064 = vrot.lane.b32.xlu1 %v9494_v10, %s5835_s13 }
 0x17c   : > { %1062 = vrot.lane.b32.xlu0 %v9495_v34, %s5835_s13  ;;  %v9499_v34 = vld [vmem:[#allocation50_spill] sm:$0xff] }
 0x17d   : > { %v7102_v35 = vpop.permute.xlu1 %861 }
 0x17e   : > { %v7104_v39 = vpop.permute.xlu0 %859 }
 0x17f   : > { %1166 = vrot.lane.b32.xlu1 %v9461_v1, %s5836_s14 }
 0x180   : > { %1164 = vrot.lane.b32.xlu0 %v9462_v4, %s5836_s14 }
 0x181   : > { %v7110_v46 = vpop.permute.xlu1 %865 }
 0x182   : > { %v7112_v53 = vpop.permute.xlu0 %863 }
 0x183   : > { %1267 = vrot.lane.b32.xlu1 %v9496_v30, %s5837_s15 }
 0x184   : > { %1265 = vrot.lane.b32.xlu0 %v9497_v19, %s5837_s15 }
 0x185   : > { %v7118_v23 = vpop.permute.xlu1 %869 }
 0x186   : > { %v7120_v28 = vpop.permute.xlu0 %867 }
 0x187   : > { %970 = vrot.lane.b32.xlu1 %v9496_v30, %s5834_s8  ;;  %v9500_v30 = vld [vmem:[#allocation51_spill] sm:$0xff] }
 0x188   : > { %968 = vrot.lane.b32.xlu0 %v9497_v19, %s5834_s8 }
 0x189   : > { %v7126_v4 = vpop.permute.xlu1 %873 }
 0x18a   : > { %v7128_v1 = vpop.permute.xlu0 %871 }
 0x18b   : > { %1068 = vrot.lane.b32.xlu1 %v5714_v31, %s5835_s13 }
 0x18c   : > { %1066 = vrot.lane.b32.xlu0 %v9498_v45, %s5835_s13  ;;  %v5715_v45 = vld [vmem:[%s5932_s11 + $0xe0] sm:$0xff] }
 0x18d   : > { %v7134_v21 = vpop.permute.xlu1 %877 }
 0x18e   : > { %v7136_v44 = vpop.permute.xlu0 %875 }
 0x18f   : > { %1170 = vrot.lane.b32.xlu1 %v9463_v55, %s5836_s14 }
 0x190   : > { %1168 = vrot.lane.b32.xlu0 %v9464_v59, %s5836_s14 }
 0x191   : > { %v7142_v48 = vpop.permute.xlu1 %881 }
 0x192   : > { %v7144_v10 = vpop.permute.xlu0 %879 }
 0x193   : > { %1271 = vrot.lane.b32.xlu1 %v9499_v34, %s5837_s15 }
 0x194   : > { %1269 = vrot.lane.b32.xlu0 %v9500_v30, %s5837_s15 }
 0x195   : > { %v7150_v19 = vpop.permute.xlu1 %885 }
 0x196   : > { %v7152_v31 = vpop.permute.xlu0 %883 }
 0x197   : > { %974 = vrot.lane.b32.xlu1 %v9499_v34, %s5834_s8  ;;  %v1342_v34 = vsel %vm1341_vm4, %v5717_v49, %v9501_v42  ;;  %v9503_v42 = vld [vmem:[#allocation52_spill] sm:$0xff]  ;;  %v5718_v49 = vld [vmem:[%s5932_s11 + $0x8] sm:$0xff] }
 0x198   : > { %972 = vrot.lane.b32.xlu0 %v9500_v30, %s5834_s8  ;;  %v9502_v30 = vld [vmem:[#allocation75_spill] sm:$0xff] }
 0x199   : > { %v947_v55 = vpop.permute.xlu1 %946 }
 0x19a   : > { %v945_v59 = vpop.permute.xlu0 %944 }
 0x19b   : > { %1072 = vrot.lane.b32.xlu1 %v5715_v45, %s5835_s13  ;;  %v1375_v45 = vsel %vm1374_vm5, %v1342_v34, %v9502_v30  ;;  %v9505_v30 = vld [vmem:[#allocation53_spill] sm:$0xff] }
 0x19c   : > { %1070 = vrot.lane.b32.xlu0 %v5716_v8, %s5835_s13  ;;  %v1408_v8 = vsel %vm1407_vm7, %v1375_v45, %v6896_v40  ;;  %v9506_v40 = vld [vmem:[#allocation74_spill] sm:$0xff] }
 0x19d   : > { %v1045_v15 = vpop.permute.xlu1 %1044 }
 0x19e   : > { %v1043_v22 = vpop.permute.xlu0 %1042 }
 0x19f   : > { %1174 = vrot.lane.b32.xlu1 %v9465_v20, %s5836_s14  ;;  %v1441_v20 = vsel %vm1440_vm8, %v1408_v8, %v7072_v25 }
 0x1a0   : > { %1172 = vrot.lane.b32.xlu0 %v9466_v63, %s5836_s14  ;;  %v1343_v63 = vsel %vm1341_vm4, %v5718_v49, %v9504_v6  ;;  %v1474_v34 = vsel %vm1473_vm9, %v1441_v20, %v945_v59 }
 0x1a1   : > { %v1147_v36 = vpop.permute.xlu1 %1146  ;;  %v1376_v45 = vsel %vm1374_vm5, %v1343_v63, %v9506_v40  ;;  %v1507_v62 = vsel %vm1506_vm10, %v1474_v34, %v1043_v22  ;;  %v5719_v34 = vld [vmem:[%s5932_s11 + $0xf8] sm:$0xff]  ;;  %v9507_v40 = vld [vmem:[#allocation61_spill] sm:$0xff] }
 0x1a2   : > { %v1145_v58 = vpop.permute.xlu0 %1144  ;;  %v1409_v8 = vsel %vm1407_vm7, %v1376_v45, %v6894_v50  ;;  %v9508_v45 = vld [vmem:[#allocation77_spill] sm:$0xff] }
 0x1a3   : > { %1275 = vrot.lane.b32.xlu1 %v9503_v42, %s5837_s15  ;;  %v1540_v6 = vsel %vm1539_vm11, %v1507_v62, %v1145_v58  ;;  %v1442_v59 = vsel %vm1440_vm8, %v1409_v8, %v7070_v51 }
 0x1a4   : > { %1273 = vrot.lane.b32.xlu0 %v9505_v30, %s5837_s15  ;;  %v1475_v22 = vsel %vm1473_vm9, %v1442_v59, %v947_v55 }
 0x1a5   : > { %v949_v25 = vpop.permute.xlu1 %948  ;;  %v1508_v50 = vsel %vm1506_vm10, %v1475_v22, %v1045_v15  ;;  %v5721_v15 = vld [vmem:[%s5932_s11 + $0x18] sm:$0xff]  ;;  %v5722_v22 = vld [vmem:[%s5932_s11 + $0x20] sm:$0xff] }
 0x1a6   : > { %v1246_v49 = vpop.permute.xlu0 %1245  ;;  %v1541_v58 = vsel %vm1539_vm11, %v1508_v50, %v1147_v36  ;;  %v1344_v36 = vsel %vm1341_vm4, %v5721_v15, %v9507_v40  ;;  %v9510_v50 = vld [vmem:[#allocation65_spill] sm:$0xff] }
 0x1a7   : > { %978 = vrot.lane.b32.xlu1 %v9503_v42, %s5834_s8  ;;  %v1573_v20 = vsel %vm1572_vm12, %v1540_v6, %v1246_v49  ;;  %v5720_v42 = vld [vmem:[%s5932_s11 + $0xf0] sm:$0xff]  ;;  %v1377_v8 = vsel %vm1374_vm5, %v1344_v36, %v9508_v45 }
 0x1a8   : > { %976 = vrot.lane.b32.xlu0 %v9505_v30, %s5834_s8  ;;  %5010 = vmatprep.mubr.msk.f32.mxu0 %vm1616_vm13, %v1573_v20  ;;  %v1410_v49 = vsel %vm1407_vm7, %v1377_v8, %v6904_v52 }
 0x1a9   : > { %v951_v62 = vpop.permute.xlu1 %950  ;;  %v1443_v20 = vsel %vm1440_vm8, %v1410_v49, %v7080_v37 }
 0x1aa   : > { %v1248_v63 = vpop.permute.xlu0 %1247 }
 0x1ab   : > { %v1574_v51 = vsel %vm1572_vm12, %v1541_v58, %v1248_v63  ;;  %1076 = vrot.lane.b32.xlu1 %v5719_v34, %s5835_s13  ;;  %v1345_v58 = vsel %vm1341_vm4, %v5722_v22, %v9510_v50  ;;  %v9511_v63 = vld [vmem:[#allocation55_spill] sm:$0xff]  ;;  %v9514_v50 = vld [vmem:[#allocation30_spill] sm:$0xff] }
 0x1ac   : > { %1074 = vrot.lane.b32.xlu0 %v5720_v42, %s5835_s13  ;;  %5011 = vmatmul.mubr.msk.f32.vlgmr.msra.gmra.mxu0 %vm1616_vm13, %v1574_v51  ;;  %v9512_v51 = vld [vmem:[#allocation76_spill] sm:$0xff]  ;;  %v9513_v22 = vld [vmem:[#allocation71_spill] sm:$0xff] }
 0x1ad   : > { %v1049_v55 = vpop.permute.xlu1 %1048  ;;  %v1378_v34 = vsel %vm1374_vm5, %v1345_v58, %v9512_v51  ;;  %v9515_v58 = vld [vmem:[#allocation80_spill] sm:$0xff] }
 0x1ae   : > { %v1047_v30 = vpop.permute.xlu0 %1046  ;;  %v1411_v37 = vsel %vm1407_vm7, %v1378_v34, %v6902_v9 }
 0x1af   : > { %1178 = vrot.lane.b32.xlu1 %v9467_v38, %s5836_s14  ;;  %v9509_v38 = vld [vmem:[#allocation54_spill] sm:$0xff] }
 0x1b0   : > { %1176 = vrot.lane.b32.xlu0 %v9468_v17, %s5836_s14  ;;  %v1476_v17 = vsel %vm1473_vm9, %v1443_v20, %v949_v25  ;;  %v1444_v25 = vsel %vm1440_vm8, %v1411_v37, %v7078_v3  ;;  %v5724_v20 = vld [vmem:[%s5932_s11 + $0x108] sm:$0xff]  ;;  %v5726_v37 = vld [vmem:[%s5932_s11 + $0x38] sm:$0xff] }
 0x1b1   : > { %v1151_v6 = vpop.permute.xlu1 %1150  ;;  %v1509_v52 = vsel %vm1506_vm10, %v1476_v17, %v1047_v30  ;;  %v1477_v45 = vsel %vm1473_vm9, %v1444_v25, %v951_v62 }
 0x1b2   : > { %v1149_v59 = vpop.permute.xlu0 %1148  ;;  %v1510_v9 = vsel %vm1506_vm10, %v1477_v45, %v1049_v55  ;;  %v5725_v55 = vld [vmem:[%s5932_s11 + $0x30] sm:$0xff]  ;;  %v9519_v45 = vld [vmem:[#allocation79_spill] sm:$0xff] }
 0x1b3   : > { %1279 = vrot.lane.b32.xlu1 %v9509_v38, %s5837_s15  ;;  %v1542_v15 = vsel %vm1539_vm11, %v1509_v52, %v1149_v59  ;;  %v1543_v8 = vsel %vm1539_vm11, %v1510_v9, %v1151_v6  ;;  %v5723_v59 = vld [vmem:[%s5932_s11 + $0x110] sm:$0xff]  ;;  %v1346_v6 = vsel %vm1341_vm4, %v5725_v55, %v9513_v22 }
 0x1b4   : > { %1277 = vrot.lane.b32.xlu0 %v9511_v63, %s5837_s15  ;;  %v1379_v17 = vsel %vm1374_vm5, %v1346_v6, %v9515_v58  ;;  %v5727_v6 = vld [vmem:[%s5932_s11 + $0x128] sm:$0xff] }
 0x1b5   : > { %v953_v42 = vpop.permute.xlu1 %952  ;;  %v1412_v51 = vsel %vm1407_vm7, %v1379_v17, %v6912_v16  ;;  %v9520_v17 = vld [vmem:[#allocation31_spill] sm:$0xff] }
 0x1b6   : > { %v1250_v40 = vpop.permute.xlu0 %1249  ;;  %v1445_v52 = vsel %vm1440_vm8, %v1412_v51, %v7088_v47  ;;  %v9521_v51 = vld [vmem:[#allocation73_spill] sm:$0xff] }
 0x1b7   : > { %v1575_v36 = vsel %vm1572_vm12, %v1542_v15, %v1250_v40  ;;  %982 = vrot.lane.b32.xlu1 %v9509_v38, %s5834_s8  ;;  %v9517_v15 = vld [vmem:[#allocation69_spill] sm:$0xff]  ;;  %v1478_v25 = vsel %vm1473_vm9, %v1445_v52, %v953_v42  ;;  %v9523_v52 = vld [vmem:[#allocation82_spill] sm:$0xff] }
 0x1b8   : > { %980 = vrot.lane.b32.xlu0 %v9511_v63, %s5834_s8  ;;  %5013 = vmatprep.mubr.msk.f32.mxu0 %vm1616_vm13, %v1575_v36  ;;  %v1347_v40 = vsel %vm1341_vm4, %v5726_v37, %v9517_v15  ;;  %v9518_v36 = vld [vmem:[#allocation57_spill] sm:$0xff] }
 0x1b9   : > { %v955_v30 = vpop.permute.xlu1 %954  ;;  %v1380_v9 = vsel %vm1374_vm5, %v1347_v40, %v9519_v45  ;;  %v5730_v45 = vld [vmem:[%s5932_s11 + $0x50] sm:$0xff] }
 0x1ba   : > { %v1252_v49 = vpop.permute.xlu0 %1251  ;;  %v1413_v47 = vsel %vm1407_vm7, %v1380_v9, %v6910_v12  ;;  %v9525_v9 = vld [vmem:[#allocation72_spill] sm:$0xff] }
 0x1bb   : > { %v1576_v3 = vsel %vm1572_vm12, %v1543_v8, %v1252_v49  ;;  %1080 = vrot.lane.b32.xlu1 %v5723_v59, %s5835_s13  ;;  %v1446_v42 = vsel %vm1440_vm8, %v1413_v47, %v7086_v61 }
 0x1bc   : > { %1078 = vrot.lane.b32.xlu0 %v5724_v20, %s5835_s13  ;;  %5014 = vmatmul.mubr.msk.f32.gmra.mxu0 %vm1616_vm13, %v1576_v3  ;;  %v1479_v20 = vsel %vm1473_vm9, %v1446_v42, %v955_v30 }
 0x1bd   : > { %v1053_v62 = vpop.permute.xlu1 %1052 }
 0x1be   : > { %v1051_v38 = vpop.permute.xlu0 %1050  ;;  %v1512_v12 = vsel %vm1506_vm10, %v1479_v20, %v1053_v62  ;;  %v5729_v62 = vld [vmem:[%s5932_s11 + $0x48] sm:$0xff] }
 0x1bf   : > { %1182 = vrot.lane.b32.xlu1 %v9469_v60, %s5836_s14  ;;  %v9516_v60 = vld [vmem:[#allocation56_spill] sm:$0xff]  ;;  %v1511_v16 = vsel %vm1506_vm10, %v1478_v25, %v1051_v38 }
 0x1c0   : > { %1180 = vrot.lane.b32.xlu0 %v9514_v50, %s5836_s14  ;;  %v5728_v50 = vld [vmem:[%s5932_s11 + $0x120] sm:$0xff] }
 0x1c1   : > { %v1155_v63 = vpop.permute.xlu1 %1154 }
 0x1c2   : > { %v1153_v34 = vpop.permute.xlu0 %1152  ;;  %v1545_v55 = vsel %vm1539_vm11, %v1512_v12, %v1155_v63  ;;  %v1348_v63 = vsel %vm1341_vm4, %v5729_v62, %v9521_v51 }
 0x1c3   : > { %1283 = vrot.lane.b32.xlu1 %v9516_v60, %s5837_s15  ;;  %v1544_v49 = vsel %vm1539_vm11, %v1511_v16, %v1153_v34  ;;  %v9522_v34 = vld [vmem:[#allocation32_spill] sm:$0xff]  ;;  %v1349_v16 = vsel %vm1341_vm4, %v5730_v45, %v9525_v9  ;;  %v9531_v9 = vld [vmem:[#allocation62_spill] sm:$0xff]  ;;  %vm4637_vm4 = vcmask 1044484  }
 0x1c4   : > { %1281 = vrot.lane.b32.xlu0 %v9518_v36, %s5837_s15 }
 0x1c5   : > { %v957_v8 = vpop.permute.xlu1 %956 }
 0x1c6   : > { %v1254_v3 = vpop.permute.xlu0 %1253 }
 0x1c7   : > { %v1577_v59 = vsel %vm1572_vm12, %v1544_v49, %v1254_v3  ;;  %986 = vrot.lane.b32.xlu1 %v9516_v60, %s5834_s8  ;;  %v1381_v60 = vsel %vm1374_vm5, %v1348_v63, %v9523_v52  ;;  %v9526_v49 = vld [vmem:[#allocation59_spill] sm:$0xff]  ;;  %v9527_v3 = vld [vmem:[#allocation81_spill] sm:$0xff]  ;;  %v1449_v63 = vsel %vm1440_vm8, %v6932_v54, %v7104_v39  ;;  %v9530_v39 = vld [vmem:[#allocation60_spill] sm:$0xff] }
 0x1c8   : > { %984 = vrot.lane.b32.xlu0 %v9518_v36, %s5834_s8  ;;  %5016 = vmatprep.mubr.msk.f32.mxu0 %vm1616_vm13, %v1577_v59  ;;  %v1414_v15 = vsel %vm1407_vm7, %v1381_v60, %v6920_v14  ;;  %v9524_v36 = vld [vmem:[#allocation58_spill] sm:$0xff]  ;;  %v1382_v42 = vsel %vm1374_vm5, %v1349_v16, %v9527_v3  ;;  %vm4639_vm5 = vcmask 1045509  }
 0x1c9   : > { %v959_v38 = vpop.permute.xlu1 %958  ;;  %v1447_v25 = vsel %vm1440_vm8, %v1414_v15, %v7096_v5  ;;  %v1415_v5 = vsel %vm1407_vm7, %v1382_v42, %v6918_v29  ;;  %v9529_v60 = vld [vmem:[#allocation34_spill] sm:$0xff]  ;;  %vm4643_vm7 = vcmask 1047559  }
 0x1ca   : > { %v1256_v22 = vpop.permute.xlu0 %1255  ;;  %v1480_v47 = vsel %vm1473_vm9, %v1447_v25, %v957_v8 }
 0x1cb   : > { %v1578_v61 = vsel %vm1572_vm12, %v1545_v55, %v1256_v22  ;;  %1084 = vrot.lane.b32.xlu1 %v5727_v6, %s5835_s13  ;;  %v1448_v55 = vsel %vm1440_vm8, %v1415_v5, %v7094_v57 }
 0x1cc   : > { %1082 = vrot.lane.b32.xlu0 %v5728_v50, %s5835_s13  ;;  %5017 = vmatmul.mubr.msk.f32.gmra.mxu0 %vm1616_vm13, %v1578_v61  ;;  %v1481_v22 = vsel %vm1473_vm9, %v1448_v55, %v959_v38  ;;  %v5733_v55 = vld [vmem:[%s5932_s11 + $0x158] sm:$0xff] }
 0x1cd   : > { %v1057_v30 = vpop.permute.xlu1 %1056 }
 0x1ce   : > { %v1055_v58 = vpop.permute.xlu0 %1054  ;;  %v1514_v29 = vsel %vm1506_vm10, %v1481_v22, %v1057_v30  ;;  %v5732_v30 = vld [vmem:[%s5932_s11 + $0x138] sm:$0xff] }
 0x1cf   : > { %1186 = vrot.lane.b32.xlu1 %v9520_v17, %s5836_s14  ;;  %v1513_v14 = vsel %vm1506_vm10, %v1480_v47, %v1055_v58 }
 0x1d0   : > { %1184 = vrot.lane.b32.xlu0 %v9522_v34, %s5836_s14 }
 0x1d1   : > { %v1159_v37 = vpop.permute.xlu1 %1158 }
 0x1d2   : > { %v1157_v40 = vpop.permute.xlu0 %1156  ;;  %v1547_v6 = vsel %vm1539_vm11, %v1514_v29, %v1159_v37  ;;  %v5734_v29 = vld [vmem:[%s5932_s11 + $0x150] sm:$0xff] }
 0x1d3   : > { %1287 = vrot.lane.b32.xlu1 %v9524_v36, %s5837_s15  ;;  %v1546_v20 = vsel %vm1539_vm11, %v1513_v14, %v1157_v40 }
 0x1d4   : > { %1285 = vrot.lane.b32.xlu0 %v9526_v49, %s5837_s15 }
 0x1d5   : > { %v961_v59 = vpop.permute.xlu1 %960 }
 0x1d6   : > { %v1258_v12 = vpop.permute.xlu0 %1257  ;;  %v1482_v52 = vsel %vm1473_vm9, %v1449_v63, %v961_v59  ;;  %v1452_v59 = vsel %vm1440_vm8, %v6940_v43, %v7110_v46 }
 0x1d7   : > { %v1579_v8 = vsel %vm1572_vm12, %v1546_v20, %v1258_v12  ;;  %889 = vrot.lane.b32.xlu1 %v9520_v17, %s5833_s16  ;;  %v5731_v17 = vld [vmem:[%s5932_s11 + $0x140] sm:$0xff]  ;;  %v1451_v20 = vsel %vm1440_vm8, %v6944_v24, %v7112_v53 }
 0x1d8   : > { %887 = vrot.lane.b32.xlu0 %v9522_v34, %s5833_s16  ;;  %5019 = vmatprep.mubr.msk.f32.mxu0 %vm1616_vm13, %v1579_v8  ;;  %v9528_v34 = vld [vmem:[#allocation33_spill] sm:$0xff] }
 0x1d9   : > { %v963_v61 = vpop.permute.xlu1 %962 }
 0x1da   : > { %v1260_v57 = vpop.permute.xlu0 %1259 }
 0x1db   : > { %v1580_v50 = vsel %vm1572_vm12, %v1547_v6, %v1260_v57  ;;  %990 = vrot.lane.b32.xlu1 %v9524_v36, %s5834_s8  ;;  %v1450_v36 = vsel %vm1440_vm8, %v6928_v27, %v7102_v35 }
 0x1dc   : > { %988 = vrot.lane.b32.xlu0 %v9526_v49, %s5834_s8  ;;  %5020 = vmatmul.mubr.msk.f32.gmra.mxu0 %vm1616_vm13, %v1580_v50  ;;  %v1483_v45 = vsel %vm1473_vm9, %v1450_v36, %v963_v61  ;;  %v9532_v50 = vld [vmem:[#allocation35_spill] sm:$0xff] }
 0x1dd   : > { %v1061_v38 = vpop.permute.xlu1 %1060 }
 0x1de   : > { %v1059_v58 = vpop.permute.xlu0 %1058  ;;  %v1516_v16 = vsel %vm1506_vm10, %v1483_v45, %v1061_v38  ;;  %v9533_v38 = vld [vmem:[#allocation36_spill] sm:$0xff]  ;;  %v5735_v45 = vld [vmem:[%s5932_s11 + $0x170] sm:$0xff] }
 0x1df   : > { %1088 = vrot.lane.b32.xlu1 %v5731_v17, %s5835_s13  ;;  %v1515_v37 = vsel %vm1506_vm10, %v1482_v52, %v1059_v58  ;;  %v1454_v52 = vsel %vm1440_vm8, %v6952_v18, %v7118_v23 }
 0x1e0   : > { %1086 = vrot.lane.b32.xlu0 %v5732_v30, %s5835_s13  ;;  %v9534_v30 = vld [vmem:[#allocation64_spill] sm:$0xff] }
 0x1e1   : > { %v1163_v62 = vpop.permute.xlu1 %1162 }
 0x1e2   : > { %v1161_v51 = vpop.permute.xlu0 %1160  ;;  %v1549_v49 = vsel %vm1539_vm11, %v1516_v16, %v1163_v62  ;;  %v9535_v62 = vld [vmem:[#allocation66_spill] sm:$0xff] }
 0x1e3   : > { %1190 = vrot.lane.b32.xlu1 %v9528_v34, %s5836_s14  ;;  %v1548_v40 = vsel %vm1539_vm11, %v1515_v37, %v1161_v51  ;;  %v1453_v37 = vsel %vm1440_vm8, %v6956_v32, %v7120_v28 }
 0x1e4   : > { %1188 = vrot.lane.b32.xlu0 %v9529_v60, %s5836_s14 }
 0x1e5   : > { %v965_v15 = vpop.permute.xlu1 %964 }
 0x1e6   : > { %v1262_v25 = vpop.permute.xlu0 %1261  ;;  %v1484_v8 = vsel %vm1473_vm9, %v1451_v20, %v965_v15 }
 0x1e7   : > { %v1581_v54 = vsel %vm1572_vm12, %v1548_v40, %v1262_v25  ;;  %1291 = vrot.lane.b32.xlu1 %v9530_v39, %s5837_s15 }
 0x1e8   : > { %1289 = vrot.lane.b32.xlu0 %v9531_v9, %s5837_s15  ;;  %5022 = vmatprep.mubr.msk.f32.mxu0 %vm1616_vm13, %v1581_v54 }
 0x1e9   : > { %v967_v47 = vpop.permute.xlu1 %966 }
 0x1ea   : > { %v1264_v3 = vpop.permute.xlu0 %1263  ;;  %v1485_v12 = vsel %vm1473_vm9, %v1452_v59, %v967_v47 }
 0x1eb   : > { %v1582_v27 = vsel %vm1572_vm12, %v1549_v49, %v1264_v3  ;;  %893 = vrot.lane.b32.xlu1 %v9528_v34, %s5833_s16  ;;  %v9536_v49 = vld [vmem:[#allocation37_spill] sm:$0xff]  ;;  %v9537_v3 = vld [vmem:[#allocation38_spill] sm:$0xff] }
 0x1ec   : > { %891 = vrot.lane.b32.xlu0 %v9529_v60, %s5833_s16  ;;  %5023 = vmatmul.mubr.msk.f32.gmra.mxu0 %vm1616_vm13, %v1582_v27 }
 0x1ed   : > { %v1065_v35 = vpop.permute.xlu1 %1064 }
 0x1ee   : > { %v1063_v42 = vpop.permute.xlu0 %1062  ;;  %v1518_v22 = vsel %vm1506_vm10, %v1485_v12, %v1065_v35  ;;  %v1455_v12 = vsel %vm1440_vm8, %v6968_v13, %v7128_v1  ;;  %v333_v13 = vld [vmem:[%s5932_s11 + $0x190] sm:$0x3] }
 0x1ef   : > { %994 = vrot.lane.b32.xlu1 %v9530_v39, %s5834_s8  ;;  %v1517_v61 = vsel %vm1506_vm10, %v1484_v8, %v1063_v42  ;;  %v9538_v42 = vld [vmem:[#allocation68_spill] sm:$0xff] }
 0x1f0   : > { %992 = vrot.lane.b32.xlu0 %v9531_v9, %s5834_s8  ;;  %v5736_v9 = vld [vmem:[%s5932_s11 + $0x168] sm:$0xff] }
 0x1f1   : > { %v1167_v14 = vpop.permute.xlu1 %1166 }
 0x1f2   : > { %v1165_v5 = vpop.permute.xlu0 %1164  ;;  %v1551_v43 = vsel %vm1539_vm11, %v1518_v22, %v1167_v14  ;;  %v9539_v14 = vld [vmem:[#allocation70_spill] sm:$0xff] }
 0x1f3   : > { %1092 = vrot.lane.b32.xlu1 %v5733_v55, %s5835_s13  ;;  %v1550_v6 = vsel %vm1539_vm11, %v1517_v61, %v1165_v5  ;;  %v1456_v5 = vsel %vm1440_vm8, %v6964_v26, %v7126_v4 }
 0x1f4   : > { %1090 = vrot.lane.b32.xlu0 %v5734_v29, %s5835_s13 }
 0x1f5   : > { %v1268_v46 = vpop.permute.xlu1 %1267 }
 0x1f6   : > { %v1584_v24 = vsel %vm1572_vm12, %v1551_v43, %v1268_v46  ;;  %v1266_v53 = vpop.permute.xlu0 %1265 }
 0x1f7   : > { %v1583_v57 = vsel %vm1572_vm12, %v1550_v6, %v1266_v53  ;;  %1194 = vrot.lane.b32.xlu1 %v9532_v50, %s5836_s14  ;;  %v9540_v6 = vld [vmem:[#allocation78_spill] sm:$0xff]  ;;  %v841_v53 = vrot.slane %v333_v13, 1 }
 0x1f8   : > { %1192 = vrot.lane.b32.xlu0 %v9533_v38, %s5836_s14  ;;  %5025 = vmatprep.mubr.msk.f32.mxu0 %vm1616_vm13, %v1583_v57  ;;  %v5737_v57 = vld [vmem:[%s5932_s11 + $0x180] sm:$0xff] }
 0x1f9   : > { %5026 = vmatmul.mubr.msk.f32.gmra.mxu0 %vm1616_vm13, %v1584_v24  ;;  %v971_v58 = vpop.permute.xlu1 %970  ;;  %v839_v24 = vrot.slane %v9540_v6, 1  ;;  %v1459_v6 = vsel %vm1440_vm8, %v6992_v0, %v7144_v10 }
 0x1fa   : > { %v969_v17 = vpop.permute.xlu0 %968  ;;  %v1487_v15 = vsel %vm1473_vm9, %v1454_v52, %v971_v58 }
 0x1fb   : > { %1295 = vrot.lane.b32.xlu1 %v9534_v30, %s5837_s15  ;;  %v1486_v40 = vsel %vm1473_vm9, %v1453_v37, %v969_v17  ;;  %v5738_v17 = vld [vmem:[%s5932_s11 + $0x188] sm:$0xff] }
 0x1fc   : > { %1293 = vrot.lane.b32.xlu0 %v9535_v62, %s5837_s15 }
 0x1fd   : > { %v1069_v51 = vpop.permute.xlu1 %1068 }
 0x1fe   : > { %v1067_v63 = vpop.permute.xlu0 %1066  ;;  %v1520_v25 = vsel %vm1506_vm10, %v1487_v15, %v1069_v51  ;;  %v942_v51 = vrot.slane %v333_v13, 2 }
 0x1ff   : > { %897 = vrot.lane.b32.xlu1 %v9532_v50, %s5833_s16  ;;  %v1519_v18 = vsel %vm1506_vm10, %v1486_v40, %v1067_v63  ;;  %v838_v50 = vrot.slane %v5737_v57, 1  ;;  %v939_v63 = vrot.slane %v5737_v57, 2 }
 0x200   : > { %895 = vrot.lane.b32.xlu0 %v9533_v38, %s5833_s16 }
 0x201   : > { %v1171_v34 = vpop.permute.xlu1 %1170  ;;  %v840_v52 = vsel %vm385_vm2, %v838_v50, %v839_v24 }
 0x202   : > { %v1169_v60 = vpop.permute.xlu0 %1168  ;;  %v1553_v23 = vsel %vm1539_vm11, %v1520_v25, %v1171_v34  ;;  %v1458_v25 = vsel %vm1440_vm8, %v6976_v11, %v7134_v21 }
 0x203   : > { %998 = vrot.lane.b32.xlu1 %v9534_v30, %s5834_s8  ;;  %v1552_v54 = vsel %vm1539_vm11, %v1519_v18, %v1169_v60  ;;  %v940_v30 = vrot.slane %v5738_v17, 2 }
 0x204   : > { %996 = vrot.lane.b32.xlu0 %v9535_v62, %s5834_s8  ;;  %v842_v62 = vsel %vm385_vm2, %v839_v24, %v841_v53 }
 0x205   : > { %v1272_v36 = vpop.permute.xlu1 %1271  ;;  %v943_v37 = vsel %vm562_vm3, %v940_v30, %v942_v51  ;;  %v941_v40 = vsel %vm562_vm3, %v939_v63, %v940_v30 }
 0x206   : > { %v1586_v32 = vsel %vm1572_vm12, %v1553_v23, %v1272_v36  ;;  %v1270_v28 = vpop.permute.xlu0 %1269  ;;  %v1457_v23 = vsel %vm1440_vm8, %v6980_v2, %v7136_v44 }
 0x207   : > { %v1585_v39 = vsel %vm1572_vm12, %v1552_v54, %v1270_v28  ;;  %1096 = vrot.lane.b32.xlu1 %v5735_v45, %s5835_s13 }
 0x208   : > { %1094 = vrot.lane.b32.xlu0 %v5736_v9, %s5835_s13  ;;  %5028 = vmatprep.mubr.msk.f32.mxu0 %vm1616_vm13, %v1585_v39 }
 0x209   : > { %5029 = vmatmul.mubr.msk.f32.gmra.mxu0 %vm1616_vm13, %v1586_v32  ;;  %v975_v16 = vpop.permute.xlu1 %974 }
 0x20a   : > { %v973_v47 = vpop.permute.xlu0 %972  ;;  %v1489_v55 = vsel %vm1473_vm9, %v1456_v5, %v975_v16  ;;  %v335_v16 = vld [vmem:[%s5932_s11 + $0x1a0] sm:$0xff] }
 0x20b   : > { %1198 = vrot.lane.b32.xlu1 %v9536_v49, %s5836_s14  ;;  %v1488_v8 = vsel %vm1473_vm9, %v1455_v12, %v973_v47  ;;  %v336_v47 = vld [vmem:[%s5932_s11 + $0x1a8] sm:$0x3]  ;;  %v7499_v5 = vld [vmem:[#allocation2] sm:$0xff]  ;;  %v7503_v12 = vld [vmem:[#allocation2 + $0x10] sm:$0x3] }
 0x20c   : > { %1196 = vrot.lane.b32.xlu0 %v9537_v3, %s5836_s14  ;;  %v2110_v13 = vrot.slane %v7499_v5, 1 }
 0x20d   : > { %v1073_v27 = vpop.permute.xlu1 %1072 }
 0x20e   : > { %v1071_v35 = vpop.permute.xlu0 %1070  ;;  %v1522_v22 = vsel %vm1506_vm10, %v1489_v55, %v1073_v27  ;;  %v1140_v27 = vrot.slane %v335_v16, 1  ;;  %v1241_v55 = vrot.slane %v335_v16, 2 }
 0x20f   : > { %1299 = vrot.lane.b32.xlu1 %v9538_v42, %s5837_s15  ;;  %v1521_v26 = vsel %vm1506_vm10, %v1488_v8, %v1071_v35  ;;  %v1142_v35 = vrot.slane %v336_v47, 1 }
 0x210   : > { %1297 = vrot.lane.b32.xlu0 %v9539_v14, %s5837_s15 }
 0x211   : > { %v1175_v59 = vpop.permute.xlu1 %1174 }
 0x212   : > { %v1173_v20 = vpop.permute.xlu0 %1172  ;;  %v1555_v4 = vsel %vm1539_vm11, %v1522_v22, %v1175_v59  ;;  %v1143_v22 = vsel %vm385_vm2, %v1140_v27, %v1142_v35 }
 0x213   : > { %901 = vrot.lane.b32.xlu1 %v9536_v49, %s5833_s16  ;;  %v1554_v1 = vsel %vm1539_vm11, %v1521_v26, %v1173_v20  ;;  %v7501_v20 = vld [vmem:[#allocation2 + $0x8] sm:$0xff]  ;;  %v1243_v26 = vrot.slane %v336_v47, 2 }
 0x214   : > { %899 = vrot.lane.b32.xlu0 %v9537_v3, %s5833_s16  ;;  %v334_v3 = vld [vmem:[%s5932_s11 + $0x198] sm:$0xff]  ;;  %s5838_s11 = smov 32  }
 0x215   : > { %v1276_v29 = vpop.permute.xlu1 %1275  ;;  %v1240_v8 = vrot.slane %v334_v3, 2  ;;  %v1244_v50 = vsel %vm562_vm3, %v1241_v55, %v1243_v26 }
 0x216   : > { %v1588_v61 = vsel %vm1572_vm12, %v1555_v4, %v1276_v29  ;;  %v1274_v43 = vpop.permute.xlu0 %1273 }
 0x217   : > { %v1587_v46 = vsel %vm1572_vm12, %v1554_v1, %v1274_v43  ;;  %1002 = vrot.lane.b32.xlu1 %v9538_v42, %s5834_s8  ;;  %v2111_v1 = vrot.slane %v7501_v20, 1  ;;  %v1460_v43 = vsel %vm1440_vm8, %v6988_v33, %v7142_v48 }
 0x218   : > { %1000 = vrot.lane.b32.xlu0 %v9539_v14, %s5834_s8  ;;  %5031 = vmatprep.mubr.msk.f32.mxu0 %vm1616_vm13, %v1587_v46  ;;  %v1139_v14 = vrot.slane %v334_v3, 1 }
 0x219   : > { %5032 = vmatmul.mubr.msk.f32.gmra.mxu0 %vm1616_vm13, %v1588_v61  ;;  %v979_v38 = vpop.permute.xlu1 %978  ;;  %v2113_v61 = vrot.slane %v7503_v12, 1  ;;  %v2112_v0 = vsel %vm385_vm2, %v2110_v13, %v2111_v1 }
 0x21a   : > { %v977_v58 = vpop.permute.xlu0 %976  ;;  %v1491_v36 = vsel %vm1473_vm9, %v1458_v25, %v979_v38  ;;  %v1141_v29 = vsel %vm385_vm2, %v1139_v14, %v1140_v27  ;;  %v1242_v38 = vsel %vm562_vm3, %v1240_v8, %v1241_v55 }
 0x21b   : > { %1100 = vrot.lane.b32.xlu1 %v5738_v17, %s5835_s13  ;;  %v1490_v54 = vsel %vm1473_vm9, %v1457_v23, %v977_v58  ;;  %v2114_v10 = vsel %vm385_vm2, %v2111_v1, %v2113_v61 }
 0x21c   : > { %1098 = vrot.lane.b32.xlu0 %v5737_v57, %s5835_s13  ;;  %v5234_v63 = vpack.i.bf16 %v2114_v10, %v2112_v0 }
 0x21d   : > { %v1077_v34 = vpop.permute.xlu1 %1076 }
 0x21e   : > { %v1075_v60 = vpop.permute.xlu0 %1074  ;;  %v1524_v32 = vsel %vm1506_vm10, %v1491_v36, %v1077_v34 }
 0x21f   : > { %1202 = vrot.lane.b32.xlu1 %v842_v62, %s5836_s14  ;;  %v1523_v11 = vsel %vm1506_vm10, %v1490_v54, %v1075_v60 }
 0x220   : > { %1200 = vrot.lane.b32.xlu0 %v840_v52, %s5836_s14 }
 0x221   : > { %v1179_v15 = vpop.permute.xlu1 %1178 }
 0x222   : > { %v1177_v18 = vpop.permute.xlu0 %1176  ;;  %v1557_v21 = vsel %vm1539_vm11, %v1524_v32, %v1179_v15 }
 0x223   : > { %1303 = vrot.lane.b32.xlu1 %v943_v37, %s5837_s15  ;;  %v1556_v2 = vsel %vm1539_vm11, %v1523_v11, %v1177_v18  ;;  %v1461_v18 = vsel %vm1440_vm8, %v7004_v56, %v7152_v31 }
 0x224   : > { %1301 = vrot.lane.b32.xlu0 %v941_v40, %s5837_s15 }
 0x225   : > { %v1280_v28 = vpop.permute.xlu1 %1279 }
 0x226   : > { %v1590_v44 = vsel %vm1572_vm12, %v1557_v21, %v1280_v28  ;;  %v1278_v39 = vpop.permute.xlu0 %1277 }
 0x227   : > { %v1589_v45 = vsel %vm1572_vm12, %v1556_v2, %v1278_v39  ;;  %905 = vrot.lane.b32.xlu1 %v842_v62, %s5833_s16 }
 0x228   : > { %903 = vrot.lane.b32.xlu0 %v840_v52, %s5833_s16  ;;  %5034 = vmatprep.mubr.msk.f32.mxu0 %vm1616_vm13, %v1589_v45 }
 0x229   : > { %5035 = vmatmul.mubr.msk.f32.gmra.mxu0 %vm1616_vm13, %v1590_v44  ;;  %v983_v9 = vpop.permute.xlu1 %982 }
 0x22a   : > { %v981_v49 = vpop.permute.xlu0 %980  ;;  %v1493_v24 = vsel %vm1473_vm9, %v1460_v43, %v983_v9 }
 0x22b   : > { %1006 = vrot.lane.b32.xlu1 %v943_v37, %s5834_s8  ;;  %v1492_v53 = vsel %vm1473_vm9, %v1459_v6, %v981_v49 }
 0x22c   : > { %1004 = vrot.lane.b32.xlu0 %v941_v40, %s5834_s8  ;;  %v1462_v40 = vsel %vm1440_vm8, %v7000_v41, %v7150_v19  ;;  %s5843_s8 = smov [#allocation3]  }
 0x22d   : > { %v1081_v42 = vpop.permute.xlu1 %1080  ;;  %s5771_s9 = sshll.u32 %s5843_s8, 4  ;;  %s5772_s9 = int_to_ptr.vmem [resolvable:$false] %s5771_s9 }
 0x22e   : > { %v1079_v59 = vpop.permute.xlu0 %1078  ;;  %v1526_v57 = vsel %vm1506_vm10, %v1493_v24, %v1081_v42  ;;  %v9542_v24 = vld [vmem:[#allocation10_spill] sm:$0xff]  ;;  %s5773_s10 = scalar_lea.vmem %s5772_s9, 2048 }
 0x22f   : > { %1104 = vrot.lane.b32.xlu1 %v335_v16, %s5835_s13  ;;  %v1525_v33 = vsel %vm1506_vm10, %v1492_v53, %v1079_v59 }
 0x230   : > { %1102 = vrot.lane.b32.xlu0 %v334_v3, %s5835_s13  ;;  %v9541_v3 = vld [vmem:[#allocation8_spill] sm:$0xff] }
 0x231   : > { %v1183_v4 = vpop.permute.xlu1 %1182 }
 0x232   : > { %v1181_v46 = vpop.permute.xlu0 %1180  ;;  %v1559_v48 = vsel %vm1539_vm11, %v1526_v57, %v1183_v4 }
 0x233   : > { %1206 = vrot.lane.b32.xlu1 %v1143_v22, %s5836_s14  ;;  %v1558_v17 = vsel %vm1539_vm11, %v1525_v33, %v1181_v46 }
 0x234   : > { %1204 = vrot.lane.b32.xlu0 %v1141_v29, %s5836_s14 }
 0x235   : > { %v1284_v58 = vpop.permute.xlu1 %1283 }
 0x236   : > { %v1592_v30 = vsel %vm1572_vm12, %v1559_v48, %v1284_v58  ;;  %v1282_v62 = vpop.permute.xlu0 %1281 }
 0x237   : > { %v1591_v51 = vsel %vm1572_vm12, %v1558_v17, %v1282_v62  ;;  %1307 = vrot.lane.b32.xlu1 %v1244_v50, %s5837_s15  ;;  %v7572_v50 = vld [vmem:[%s9241_s2] ss:$0 sm:$0xff] }
 0x238   : > { %1305 = vrot.lane.b32.xlu0 %v1242_v38, %s5837_s15  ;;  %5037 = vmatprep.mubr.msk.f32.mxu0 %vm1616_vm13, %v1591_v51  ;;  %v9543_v38 = vld [vmem:[#allocation11_spill] sm:$0xff] }
 0x239   : > { %5038 = vmatmul.mubr.msk.f32.gmra.mxu0 %vm1616_vm13, %v1592_v30  ;;  %v987_v34 = vpop.permute.xlu1 %986 }
 0x23a   : > { %v985_v52 = vpop.permute.xlu0 %984  ;;  %v1495_v23 = vsel %vm1473_vm9, %v1462_v40, %v987_v34 }
 0x23b   : > { %v1494_v36 = vsel %vm1473_vm9, %v1461_v18, %v985_v52 }
 0x23c   : > { %5235 = vrot.lane.b32.xlu0 %v5234_v63, %s5838_s11 }
 0x23d   : > { %v1085_v60 = vpop.permute.xlu1 %1084 }
 0x23e   : > { %v1083_v37 = vpop.permute.xlu0 %1082  ;;  %v1528_v54 = vsel %vm1506_vm10, %v1495_v23, %v1085_v60 }
 0x23f   : > { %v1527_v32 = vsel %vm1506_vm10, %v1494_v36, %v1083_v37 }
 0x241   : > { %v1187_v15 = vpop.permute.xlu1 %1186 }
 0x242   : > { %v1185_v25 = vpop.permute.xlu0 %1184  ;;  %v1561_v11 = vsel %vm1539_vm11, %v1528_v54, %v1187_v15 }
 0x243   : > { %v1560_v28 = vsel %vm1539_vm11, %v1527_v32, %v1185_v25  ;;  %v3113_v32 = vld [vmem:[%s9242_s3 + $0x78] sm:$0xff] }
 0x245   : > { %v1288_v21 = vpop.permute.xlu1 %1287 }
 0x246   : > { %v1594_v41 = vsel %vm1572_vm12, %v1561_v11, %v1288_v21  ;;  %v1286_v19 = vpop.permute.xlu0 %1285  ;;  %v5839_v11 = vmov 0.0  }
 0x247   : > { %v1593_v2 = vsel %vm1572_vm12, %v1560_v28, %v1286_v19  ;;  %5114 = vmatprep.subr.mxu1 %v5839_v11  ;;  %3205 = vmatprep.subr.mxu0 %v5839_v11 }
 0x248   : > { %5040 = vmatprep.mubr.msk.f32.mxu0 %vm1616_vm13, %v1593_v2  ;;  %5146 = vmatpush1.msra.mxu1 %v3113_v32 }
 0x249   : > { %5041 = vmatmul.mubr.msk.f32.gmra.mxu0 %vm1616_vm13, %v1594_v41  ;;  %v890_v56 = vpop.permute.xlu1 %889  ;;  %5115 = vmatprep.subr.mxu1 %v5839_v11 }
 0x24a   : > { %v888_v31 = vpop.permute.xlu0 %887  ;;  %v1464_v47 = vsel %vm1440_vm8, %v7012_v7, %v890_v56  ;;  %3206 = vmatpush1.msra.mxu0 %v3113_v32 }
 0x24b   : > { %v1463_v27 = vsel %vm1440_vm8, %v9541_v3, %v888_v31  ;;  %3207 = vmatprep.subr.mxu0 %v5839_v11  ;;  %v3111_v3 = vld [vmem:[%s9242_s3 + $0x68] sm:$0xff] }
 0x24d   : > { %v991_v44 = vpop.permute.xlu1 %990 }
 0x24e   : > { %v989_v39 = vpop.permute.xlu0 %988  ;;  %v1497_v35 = vsel %vm1473_vm9, %v1464_v47, %v991_v44 }
 0x24f   : > { %v1496_v42 = vsel %vm1473_vm9, %v1463_v27, %v989_v39  ;;  %v3112_v39 = vld [vmem:[%s9242_s3 + $0x70] sm:$0xff] }
 0x250   : > { %5147 = vmatpush1.msra.mxu1 %v3112_v39  ;;  %3208 = vmatpush1.msra.mxu0 %v3112_v39  ;;  %v9544_v27 = vld [vmem:[#allocation14_spill] sm:$0xff]  ;;  %v3101_v39 = vld [vmem:[%s9242_s3 + $0x18] sm:$0xff] }
 0x251   : > { %v1089_v45 = vpop.permute.xlu1 %1088  ;;  %5116 = vmatprep.subr.mxu1 %v5839_v11  ;;  %3209 = vmatprep.subr.mxu0 %v5839_v11 }
 0x252   : > { %v1087_v9 = vpop.permute.xlu0 %1086  ;;  %v1530_v14 = vsel %vm1506_vm10, %v1497_v35, %v1089_v45  ;;  %5148 = vmatpush1.msra.mxu1 %v3111_v3  ;;  %3210 = vmatpush1.msra.mxu0 %v3111_v3  ;;  %v9546_v3 = vld [vmem:[#allocation18_spill] sm:$0xff] }
 0x253   : > { %v1529_v59 = vsel %vm1506_vm10, %v1496_v42, %v1087_v9  ;;  %5117 = vmatprep.subr.mxu1 %v5839_v11  ;;  %3211 = vmatprep.subr.mxu0 %v5839_v11 }
 0x255   : > { %v1191_v16 = vpop.permute.xlu1 %1190 }
 0x256   : > { %v1189_v49 = vpop.permute.xlu0 %1188  ;;  %v1563_v55 = vsel %vm1539_vm11, %v1530_v14, %v1191_v16 }
 0x257   : > { %v1562_v22 = vsel %vm1539_vm11, %v1529_v59, %v1189_v49 }
 0x259   : > { %v1292_v8 = vpop.permute.xlu1 %1291 }
 0x25a   : > { %v1596_v26 = vsel %vm1572_vm12, %v1563_v55, %v1292_v8  ;;  %v1290_v7 = vpop.permute.xlu0 %1289  ;;  %v9545_v55 = vld [vmem:[#allocation15_spill] sm:$0xff] }
 0x25b   : > { %v1595_v4 = vsel %vm1572_vm12, %v1562_v22, %v1290_v7 }
 0x25c   : > { %5043 = vmatprep.mubr.msk.f32.mxu0 %vm1616_vm13, %v1595_v4  ;;  %v3110_v4 = vld [vmem:[%s9242_s3 + $0x60] sm:$0xff] }
 0x25d   : > { %5044 = vmatmul.mubr.msk.f32.gmra.mxu0 %vm1616_vm13, %v1596_v26  ;;  %v894_v29 = vpop.permute.xlu1 %893  ;;  %5149 = vmatpush1.msra.mxu1 %v3110_v4 }
 0x25e   : > { %v892_v13 = vpop.permute.xlu0 %891  ;;  %v1466_v53 = vsel %vm1440_vm8, %v9542_v24, %v894_v29  ;;  %5118 = vmatprep.subr.mxu1 %v5839_v11  ;;  %v3108_v24 = vld [vmem:[%s9242_s3 + $0x50] sm:$0xff]  ;;  %3212 = vmatpush1.msra.mxu0 %v3110_v4 }
 0x25f   : > { %v1465_v33 = vsel %vm1440_vm8, %v9543_v38, %v892_v13  ;;  %3213 = vmatprep.subr.mxu0 %v5839_v11 }
 0x261   : > { %v995_v1 = vpop.permute.xlu1 %994 }
 0x262   : > { %v993_v61 = vpop.permute.xlu0 %992  ;;  %v1499_v48 = vsel %vm1473_vm9, %v1466_v53, %v995_v1  ;;  %v3109_v1 = vld [vmem:[%s9242_s3 + $0x58] sm:$0xff] }
 0x263   : > { %v1498_v58 = vsel %vm1473_vm9, %v1465_v33, %v993_v61  ;;  %5150 = vmatpush1.msra.mxu1 %v3109_v1  ;;  %3214 = vmatpush1.msra.mxu0 %v3109_v1 }
 0x264   : > { %5119 = vmatprep.subr.mxu1 %v5839_v11  ;;  %3215 = vmatprep.subr.mxu0 %v5839_v11 }
 0x265   : > { %v1093_v43 = vpop.permute.xlu1 %1092  ;;  %5151 = vmatpush1.msra.mxu1 %v3108_v24  ;;  %3216 = vmatpush1.msra.mxu0 %v3108_v24  ;;  %v3128_v24 = vld [vmem:[%s9242_s3 + $0xf0] sm:$0xff] }
 0x266   : > { %v1091_v46 = vpop.permute.xlu0 %1090  ;;  %v1532_v0 = vsel %vm1506_vm10, %v1499_v48, %v1093_v43  ;;  %v3107_v48 = vld [vmem:[%s9242_s3 + $0x48] sm:$0xff]  ;;  %5120 = vmatprep.subr.mxu1 %v5839_v11  ;;  %3217 = vmatprep.subr.mxu0 %v5839_v11 }
 0x267   : > { %v1531_v17 = vsel %vm1506_vm10, %v1498_v58, %v1091_v46  ;;  %5152 = vmatpush1.msra.mxu1 %v3107_v48  ;;  %3218 = vmatpush1.msra.mxu0 %v3107_v48 }
 0x268   : > { %5121 = vmatprep.subr.mxu1 %v5839_v11  ;;  %3219 = vmatprep.subr.mxu0 %v5839_v11 }
 0x269   : > { %v1195_v6 = vpop.permute.xlu1 %1194 }
 0x26a   : > { %v1193_v57 = vpop.permute.xlu0 %1192  ;;  %v1565_v30 = vsel %vm1539_vm11, %v1532_v0, %v1195_v6  ;;  %v3106_v0 = vld [vmem:[%s9242_s3 + $0x40] sm:$0xff] }
 0x26b   : > { %v1564_v63 = vsel %vm1539_vm11, %v1531_v17, %v1193_v57  ;;  %v3105_v17 = vld [vmem:[%s9242_s3 + $0x38] sm:$0xff]  ;;  %5153 = vmatpush1.msra.mxu1 %v3106_v0  ;;  %3220 = vmatpush1.msra.mxu0 %v3106_v0 }
 0x26c   : > { %v5012_v10 = vpop.f32.mrf.mxu0  ;;  %5122 = vmatprep.subr.mxu1 %v5839_v11  ;;  %3221 = vmatprep.subr.mxu0 %v5839_v11 }
 0x26d   : > { %v1789_v62 = vadd.f32 %v5012_v10, %v7572_v50  ;;  %v1296_v51 = vpop.permute.xlu1 %1295  ;;  %5154 = vmatpush1.msra.mxu1 %v3105_v17  ;;  %3222 = vmatpush1.msra.mxu0 %v3105_v17 }
 0x26e   : > { %v1598_v34 = vsel %vm1572_vm12, %v1565_v30, %v1296_v51  ;;  %v1783_v52 = vpop.f32.mrf.mxu0  ;;  %v1294_v60 = vpop.permute.xlu0 %1293  ;;  %5123 = vmatprep.subr.mxu1 %v5839_v11  ;;  %3223 = vmatprep.subr.mxu0 %v5839_v11 }
 0x26f   : > { %v1943_v37 = vmax.f32 %v1789_v62, 0.0  ;;  %v1784_v15 = vadd.f32 %v7572_v50, %v1783_v52  ;;  %v1597_v40 = vsel %vm1572_vm12, %v1564_v63, %v1294_v60 }
 0x270   : > { %5046 = vmatprep.mubr.msk.f32.mxu0 %vm1616_vm13, %v1597_v40 }
 0x271   : > { %1977 = vst.msk [vmem:[#allocation2 + $0x21] sm:$0xff] %vm1975_vm14, %v1943_v37  ;;  %v1942_v25 = vmax.f32 %v1784_v15, 0.0  ;;  %5047 = vmatmul.mubr.msk.f32.gmra.mxu0 %vm1616_vm13, %v1598_v34  ;;  %v898_v18 = vpop.permute.xlu1 %897  ;;  %v3104_v15 = vld [vmem:[%s9242_s3 + $0x30] sm:$0xff] }
 0x272   : > { %v896_v23 = vpop.permute.xlu0 %895  ;;  %v1468_v35 = vsel %vm1440_vm8, %v9544_v27, %v898_v18  ;;  %5155 = vmatpush1.msra.mxu1 %v3104_v15  ;;  %3224 = vmatpush1.msra.mxu0 %v3104_v15  ;;  %v7771_v15 = vld [vmem:[%s9242_s3 + $0xd0] sm:$0xff] }
 0x273   : > { %1976 = vst.msk [vmem:[#allocation2 + $0x19] sm:$0xff] %vm1975_vm14, %v1942_v25  ;;  %v1467_v8 = vsel %vm1440_vm8, %v9545_v55, %v896_v23  ;;  %5124 = vmatprep.subr.mxu1 %v5839_v11  ;;  %v3099_v55 = vld [vmem:[%s9242_s3 + $0x8] sm:$0xff]  ;;  %3225 = vmatprep.subr.mxu0 %v5839_v11 }
 0x275   : > { %v999_v36 = vpop.permute.xlu1 %998 }
 0x276   : > { %v997_v54 = vpop.permute.xlu0 %996  ;;  %v1501_v22 = vsel %vm1473_vm9, %v1468_v35, %v999_v36 }
 0x277   : > { %v1500_v29 = vsel %vm1473_vm9, %v1467_v8, %v997_v54  ;;  %v3103_v54 = vld [vmem:[%s9242_s3 + $0x28] sm:$0xff] }
 0x278   : > { %v7595_v21 = vld [vmem:[#allocation2 + $0x28] sm:$0x3]  ;;  %5156 = vmatpush1.msra.mxu1 %v3103_v54  ;;  %3226 = vmatpush1.msra.mxu0 %v3103_v54 }
 0x279   : > { %v1097_v28 = vpop.permute.xlu1 %1096  ;;  %v2118_v44 = vrot.slane %v7595_v21, 1  ;;  %5125 = vmatprep.subr.mxu1 %v5839_v11  ;;  %3227 = vmatprep.subr.mxu0 %v5839_v11  ;;  %v9548_v54 = vld [vmem:[#allocation21_spill] sm:$0xff] }
 0x27a   : > { %v1095_v41 = vpop.permute.xlu0 %1094  ;;  %v7599_v19 = vld [vmem:[#allocation2 + $0x18] sm:$0xff]  ;;  %v7601_v2 = vld [vmem:[#allocation2 + $0x20] sm:$0xff]  ;;  %v1534_v13 = vsel %vm1506_vm10, %v1501_v22, %v1097_v28 }
 0x27b   : > { %v2115_v56 = vrot.slane %v7599_v19, 1  ;;  %v2116_v31 = vrot.slane %v7601_v2, 1  ;;  %v1533_v61 = vsel %vm1506_vm10, %v1500_v29, %v1095_v41  ;;  %v3098_v29 = vld [vmem:[%s9242_s3] sm:$0xff] }
 0x27c   : > { %v5015_v45 = vpop.f32.mrf.mxu0 }
 0x27d   : > { %v1799_v9 = vadd.f32 %v5015_v45, %v7572_v50  ;;  %v1199_v16 = vpop.permute.xlu1 %1198  ;;  %v7611_v47 = vsel %vm385_vm2, %v2115_v56, %v2116_v31  ;;  %v7614_v49 = vsel %vm385_vm2, %v2116_v31, %v2118_v44  ;;  %v3102_v44 = vld [vmem:[%s9242_s3 + $0x20] sm:$0xff] }
 0x27e   : > { %v1793_v42 = vpop.f32.mrf.mxu0  ;;  %v1197_v14 = vpop.permute.xlu0 %1196  ;;  %v5239_v59 = vpack.i.bf16 %v7614_v49, %v7611_v47  ;;  %v1567_v43 = vsel %vm1539_vm11, %v1534_v13, %v1199_v16  ;;  %5157 = vmatpush1.msra.mxu1 %v3102_v44  ;;  %v3100_v16 = vld [vmem:[%s9242_s3 + $0x10] sm:$0xff]  ;;  %3228 = vmatpush1.msra.mxu0 %v3102_v44 }
 0x27f   : > { %v1945_v26 = vmax.f32 %v1799_v9, 0.0  ;;  %v1794_v7 = vadd.f32 %v7572_v50, %v1793_v42  ;;  %v1566_v53 = vsel %vm1539_vm11, %v1533_v61, %v1197_v14  ;;  %5126 = vmatprep.subr.mxu1 %v5839_v11  ;;  %v9547_v42 = vld [vmem:[#allocation19_spill] sm:$0xff]  ;;  %3229 = vmatprep.subr.mxu0 %v5839_v11 }
 0x280   : > { %5240 = vrot.lane.b32.xlu1 %v5239_v59, %s5838_s11  ;;  %5158 = vmatpush1.msra.mxu1 %v3101_v39 }
 0x281   : > { %1979 = vst.msk [vmem:[#allocation2 + $0x39] sm:$0xff] %vm1975_vm14, %v1945_v26  ;;  %v1944_v46 = vmax.f32 %v1794_v7, 0.0  ;;  %v1300_v6 = vpop.permute.xlu1 %1299  ;;  %5127 = vmatprep.subr.mxu1 %v5839_v11  ;;  %3230 = vmatpush1.msra.mxu0 %v3101_v39  ;;  %v7799_v39 = vld [vmem:[%s9242_s3 + $0xb8] sm:$0xff] }
 0x282   : > { %v1600_v57 = vsel %vm1572_vm12, %v1567_v43, %v1300_v6  ;;  %v1298_v38 = vpop.permute.xlu0 %1297  ;;  %5159 = vmatpush1.msra.mxu1 %v3100_v16  ;;  %3231 = vmatprep.subr.mxu0 %v5839_v11 }
 0x283   : > { %1978 = vst.msk [vmem:[#allocation2 + $0x31] sm:$0xff] %vm1975_vm14, %v1944_v46  ;;  %v1599_v33 = vsel %vm1572_vm12, %v1566_v53, %v1298_v38  ;;  %5128 = vmatprep.subr.mxu1 %v5839_v11  ;;  %v3129_v46 = vld [vmem:[%s9242_s3 + $0xf8] sm:$0xff]  ;;  %3232 = vmatpush1.msra.mxu0 %v3100_v16 }
 0x284   : > { %5049 = vmatprep.mubr.msk.f32.mxu0 %vm1616_vm13, %v1599_v33  ;;  %5160 = vmatpush1.msra.mxu1 %v3099_v55 }
 0x285   : > { %5050 = vmatmul.mubr.msk.f32.gmra.mxu0 %vm1616_vm13, %v1600_v57  ;;  %v902_v58 = vpop.permute.xlu1 %901  ;;  %5129 = vmatprep.subr.mxu1 %v5839_v11  ;;  %v3127_v57 = vld [vmem:[%s9242_s3 + $0xe8] sm:$0xff] }
 0x286   : > { %v900_v10 = vpop.permute.xlu0 %899  ;;  %v1470_v27 = vsel %vm1440_vm8, %v9546_v3, %v902_v58  ;;  %5161 = vmatpush1.msra.mxu1 %v3098_v29  ;;  %3233 = vmatprep.subr.mxu0 %v5839_v11 }
 0x287   : > { %v1469_v14 = vsel %vm1440_vm8, %v9547_v42, %v900_v10  ;;  %5130 = vmatprep.subr.mxu1 %v5839_v11  ;;  %3234 = vmatpush1.msra.mxu0 %v3099_v55 }
 0x288   : > { %v7667_v30 = vld [vmem:[#allocation2 + $0x40] sm:$0x3]  ;;  %5162 = vmatpush2.msra.mxu1 %v3129_v46  ;;  %3235 = vmatprep.subr.mxu0 %v5839_v11 }
 0x289   : > { %v1003_v62 = vpop.permute.xlu1 %1002  ;;  %v2123_v37 = vrot.slane %v7667_v30, 1  ;;  %5131 = vmatprep.subr.mxu1 %v5839_v11  ;;  %3236 = vmatpush1.msra.mxu0 %v3098_v29 }
 0x28a   : > { %v1001_v51 = vpop.permute.xlu0 %1000  ;;  %v7671_v63 = vld [vmem:[#allocation2 + $0x30] sm:$0xff]  ;;  %v7673_v34 = vld [vmem:[#allocation2 + $0x38] sm:$0xff]  ;;  %v1503_v59 = vsel %vm1473_vm9, %v1470_v27, %v1003_v62  ;;  %5163 = vmatpush2.msra.mxu1 %v3128_v24  ;;  %v3126_v62 = vld [vmem:[%s9242_s3 + $0xe0] sm:$0xff]  ;;  %3237 = vmatprep.subr.mxu0 %v5839_v11 }
 0x28b   : > { %v2120_v52 = vrot.slane %v7671_v63, 1  ;;  %v2121_v60 = vrot.slane %v7673_v34, 1  ;;  %v1502_v8 = vsel %vm1473_vm9, %v1469_v14, %v1001_v51  ;;  %5132 = vmatprep.subr.mxu1 %v5839_v11  ;;  %3238 = vmatpush2.msra.mxu0 %v3129_v46 }
 0x28c   : > { %v5018_v40 = vpop.f32.mrf.mxu0  ;;  %5164 = vmatpush2.msra.mxu1 %v3127_v57  ;;  %3239 = vmatprep.subr.mxu0 %v5839_v11 }
 0x28d   : > { %v1809_v25 = vadd.f32 %v5018_v40, %v7572_v50  ;;  %v1101_v18 = vpop.permute.xlu1 %1100  ;;  %v7685_v23 = vsel %vm385_vm2, %v2120_v52, %v2121_v60  ;;  %v7688_v36 = vsel %vm385_vm2, %v2121_v60, %v2123_v37  ;;  %5133 = vmatprep.subr.mxu1 %v5839_v11  ;;  %v3125_v60 = vld [vmem:[%s9242_s3 + $0xd8] sm:$0xff]  ;;  %v7777_v40 = vld [vmem:[%s9242_s3 + $0xc8] sm:$0xff]  ;;  %3240 = vmatpush2.msra.mxu0 %v3128_v24 }
 0x28e   : > { %v1803_v32 = vpop.f32.mrf.mxu0  ;;  %v1099_v28 = vpop.permute.xlu0 %1098  ;;  %v5244_v41 = vpack.i.bf16 %v7688_v36, %v7685_v23  ;;  %v1536_v22 = vsel %vm1506_vm10, %v1503_v59, %v1101_v18  ;;  %5165 = vmatpush2.msra.mxu1 %v3126_v62  ;;  %v7784_v18 = vld [vmem:[%s9242_s3 + $0xc0] sm:$0xff]  ;;  %3241 = vmatprep.subr.mxu0 %v5839_v11  ;;  %v7816_v59 = vld [vmem:[%s9242_s3 + $0xb0] sm:$0xff] }
 0x28f   : > { %v1947_v56 = vmax.f32 %v1809_v25, 0.0  ;;  %v1804_v31 = vadd.f32 %v7572_v50, %v1803_v32  ;;  %v1535_v26 = vsel %vm1506_vm10, %v1502_v8, %v1099_v28  ;;  %5134 = vmatprep.subr.mxu1 %v5839_v11  ;;  %3242 = vmatpush2.msra.mxu0 %v3127_v57  ;;  %v3118_v57 = vld [vmem:[%s9242_s3 + $0xa0] sm:$0xff] }
 0x290   : > { %5245 = vrot.lane.b32.xlu0 %v5244_v41, %s5838_s11  ;;  %5166 = vmatpush2.msra.mxu1 %v3125_v60 }
 0x291   : > { %1981 = vst.msk [vmem:[#allocation2 + $0x51] sm:$0xff] %vm1975_vm14, %v1947_v56  ;;  %v1946_v45 = vmax.f32 %v1804_v31, 0.0  ;;  %v1203_v9 = vpop.permute.xlu1 %1202  ;;  %5135 = vmatprep.subr.mxu1 %v5839_v11  ;;  %v9549_v56 = vld [vmem:[#allocation22_spill] sm:$0xff]  ;;  %3243 = vmatprep.subr.mxu0 %v5839_v11 }
 0x292   : > { %v1201_v35 = vpop.permute.xlu0 %1200  ;;  %v1569_v7 = vsel %vm1539_vm11, %v1536_v22, %v1203_v9  ;;  %5167 = vmatpush2.msra.mxu1 %v7771_v15  ;;  %3244 = vmatpush2.msra.mxu0 %v3126_v62 }
 0x293   : > { %1980 = vst.msk [vmem:[#allocation2 + $0x49] sm:$0xff] %vm1975_vm14, %v1946_v45  ;;  %v1568_v13 = vsel %vm1539_vm11, %v1535_v26, %v1201_v35  ;;  %5136 = vmatprep.subr.mxu1 %v5839_v11  ;;  %3245 = vmatprep.subr.mxu0 %v5839_v11 }
 0x294   : > { %5168 = vmatpush2.msra.mxu1 %v7777_v40  ;;  %3246 = vmatpush2.msra.mxu0 %v3125_v60 }
 0x295   : > { %v1304_v4 = vpop.permute.xlu1 %1303  ;;  %5137 = vmatprep.subr.mxu1 %v5839_v11  ;;  %3247 = vmatprep.subr.mxu0 %v5839_v11 }
 0x296   : > { %v1602_v1 = vsel %vm1572_vm12, %v1569_v7, %v1304_v4  ;;  %v1302_v61 = vpop.permute.xlu0 %1301  ;;  %5169 = vmatpush2.msra.mxu1 %v7784_v18  ;;  %3248 = vmatpush2.msra.mxu0 %v7771_v15 }
 0x297   : > { %v1601_v43 = vsel %vm1572_vm12, %v1568_v13, %v1302_v61  ;;  %5138 = vmatprep.subr.mxu1 %v5839_v11  ;;  %v3119_v61 = vld [vmem:[%s9242_s3 + $0xa8] sm:$0xff]  ;;  %3249 = vmatprep.subr.mxu0 %v5839_v11 }
 0x298   : > { %5052 = vmatprep.mubr.msk.f32.mxu0 %vm1616_vm13, %v1601_v43  ;;  %v7803_v16 = vld [vmem:[#allocation2 + $0x58] sm:$0x3]  ;;  %5170 = vmatpush2.msra.mxu1 %v7799_v39 }
 0x299   : > { %5053 = vmatmul.mubr.msk.f32.gmra.mxu0 %vm1616_vm13, %v1602_v1  ;;  %v906_v6 = vpop.permute.xlu1 %905  ;;  %v2128_v4 = vrot.slane %v7803_v16, 1  ;;  %5139 = vmatprep.subr.mxu1 %v5839_v11  ;;  %v2304_v62 = vrot.slane %v7803_v16, 2 }
 0x29a   : > { %v904_v53 = vpop.permute.xlu0 %903  ;;  %v1472_v32 = vsel %vm1440_vm8, %v9548_v54, %v906_v6  ;;  %v7788_v41 = vld [vmem:[#allocation2 + $0x50] sm:$0xff]  ;;  %5171 = vmatpush2.msra.mxu1 %v7816_v59  ;;  %3250 = vmatpush2.msra.mxu0 %v7777_v40  ;;  %v2291_v40 = vrot.slane %v7599_v19, 2 }
 0x29b   : > { %v1471_v31 = vsel %vm1440_vm8, %v9549_v56, %v904_v53  ;;  %v2126_v14 = vrot.slane %v7788_v41, 1  ;;  %5140 = vmatprep.subr.mxu1 %v5839_v11  ;;  %3251 = vmatprep.subr.mxu0 %v5839_v11 }
 0x29c   : > { %v5021_v38 = vpop.f32.mrf.mxu0  ;;  %5172 = vmatpush2.msra.mxu1 %v3119_v61  ;;  %3252 = vmatpush2.msra.mxu0 %v7784_v18 }
 0x29d   : > { %v1819_v33 = vadd.f32 %v5021_v38, %v7572_v50  ;;  %v1007_v48 = vpop.permute.xlu1 %1006  ;;  %v7839_v46 = vsel %vm385_vm2, %v2126_v14, %v2128_v4  ;;  %5141 = vmatprep.subr.mxu1 %v5839_v11  ;;  %3253 = vmatprep.subr.mxu0 %v5839_v11  ;;  %v2286_v4 = vrot.slane %v7499_v5, 2 }
 0x29e   : > { %v1813_v58 = vpop.f32.mrf.mxu0  ;;  %v1005_v0 = vpop.permute.xlu0 %1004  ;;  %v1505_v44 = vsel %vm1473_vm9, %v1472_v32, %v1007_v48  ;;  %v7859_v48 = vld [vmem:[%s9242_s3 + $0x98] sm:$0xff]  ;;  %5173 = vmatpush2.msra.mxu1 %v3118_v57  ;;  %3254 = vmatpush2.msra.mxu0 %v7799_v39 }
 0x29f   : > { %v1949_v10 = vmax.f32 %v1819_v33, 0.0  ;;  %v1814_v17 = vadd.f32 %v7572_v50, %v1813_v58  ;;  %v1504_v45 = vsel %vm1473_vm9, %v1471_v31, %v1005_v0  ;;  %5142 = vmatprep.subr.mxu1 %v5839_v11  ;;  %v7871_v0 = vld [vmem:[%s9242_s3 + $0x90] sm:$0xff]  ;;  %3255 = vmatprep.subr.mxu0 %v5839_v11 }
 0x2a0   : > { %5174 = vmatpush2.msra.mxu1 %v7859_v48  ;;  %3256 = vmatpush2.msra.mxu0 %v7816_v59 }
 0x2a1   : > { %1983 = vst.msk [vmem:[#allocation2 + $0x69] sm:$0xff] %vm1975_vm14, %v1949_v10  ;;  %v1948_v51 = vmax.f32 %v1814_v17, 0.0  ;;  %v1105_v52 = vpop.permute.xlu1 %1104  ;;  %5143 = vmatprep.subr.mxu1 %v5839_v11  ;;  %v2302_v10 = vrot.slane %v7788_v41, 2  ;;  %v3115_v17 = vld [vmem:[%s9242_s3 + $0x88] sm:$0xff]  ;;  %3257 = vmatprep.subr.mxu0 %v5839_v11 }
 0x2a2   : > { %v1103_v37 = vpop.permute.xlu0 %1102  ;;  %v1538_v9 = vsel %vm1506_vm10, %v1505_v44, %v1105_v52  ;;  %5175 = vmatpush2.msra.mxu1 %v7871_v0  ;;  %v3114_v52 = vld [vmem:[%s9242_s3 + $0x80] sm:$0xff]  ;;  %3258 = vmatpush2.msra.mxu0 %v3119_v61  ;;  %v2287_v61 = vrot.slane %v7501_v20, 2 }
 0x2a3   : > { %1982 = vst.msk [vmem:[#allocation2 + $0x61] sm:$0xff] %vm1975_vm14, %v1948_v51  ;;  %v1537_v27 = vsel %vm1506_vm10, %v1504_v45, %v1103_v37  ;;  %5144 = vmatprep.subr.mxu1 %v5839_v11  ;;  %v7897_v15 = vsel %vm562_vm3, %v2302_v10, %v2304_v62  ;;  %3259 = vmatprep.subr.mxu0 %v5839_v11 }
 0x2a4   : > { %5176 = vmatpush2.msra.mxu1 %v3115_v17  ;;  %3260 = vmatpush2.msra.mxu0 %v3118_v57 }
 0x2a5   : > { %v1207_v25 = vpop.permute.xlu1 %1206  ;;  %5145 = vmatprep.subr.mxu1 %v5839_v11  ;;  %3261 = vmatprep.subr.mxu0 %v5839_v11 }
 0x2a6   : > { %v1205_v28 = vpop.permute.xlu0 %1204  ;;  %v1571_v35 = vsel %vm1539_vm11, %v1538_v9, %v1207_v25  ;;  %v2292_v25 = vrot.slane %v7601_v2, 2  ;;  %5177 = vmatpush2.msra.mxu1 %v3114_v52  ;;  %3262 = vmatpush2.msra.mxu0 %v7859_v48 }
 0x2a7   : > { %v1570_v55 = vsel %vm1539_vm11, %v1537_v27, %v1205_v28  ;;  %3263 = vmatprep.subr.mxu0 %v5839_v11 }
 0x2a8   : > { %v7805_v3 = vld [vmem:[#allocation2 + $0x70] sm:$0x3]  ;;  %v2293_v59 = vsel %vm562_vm3, %v2291_v40, %v2292_v25  ;;  %3264 = vmatpush2.msra.mxu0 %v7871_v0 }
 0x2a9   : > { %v1308_v42 = vpop.permute.xlu1 %1307  ;;  %v2309_v13 = vrot.slane %v7805_v3, 2  ;;  %3265 = vmatprep.subr.mxu0 %v5839_v11 }
 0x2aa   : > { %v1604_v8 = vsel %vm1572_vm12, %v1571_v35, %v1308_v42  ;;  %v1306_v22 = vpop.permute.xlu0 %1305  ;;  %v7820_v26 = vld [vmem:[#allocation2 + $0x68] sm:$0xff]  ;;  %v7884_v51 = vld [vmem:[#allocation2 + $0x60] sm:$0xff]  ;;  %3266 = vmatpush2.msra.mxu0 %v3115_v17 }
 0x2ab   : > { %v1603_v7 = vsel %vm1572_vm12, %v1570_v55, %v1306_v22  ;;  %v2307_v29 = vrot.slane %v7820_v26, 2  ;;  %v2130_v56 = vrot.slane %v7884_v51, 1  ;;  %v2131_v31 = vrot.slane %v7820_v26, 1  ;;  %3267 = vmatprep.subr.mxu0 %v5839_v11 }
 0x2ac   : > { %v5024_v1 = vpop.f32.mrf.mxu0  ;;  %5055 = vmatprep.mubr.msk.f32.mxu0 %vm1616_vm13, %v1603_v7  ;;  %3268 = vmatpush2.msra.mxu0 %v3114_v52 }
 0x2ad   : > { %v1829_v43 = vadd.f32 %v5024_v1, %v7572_v50  ;;  %5056 = vmatmul.mubr.msk.f32.gmra.mxu0 %vm1616_vm13, %v1604_v8  ;;  %v7844_v6 = vsel %vm562_vm3, %v2307_v29, %v2309_v13  ;;  %v7939_v13 = vsel %vm385_vm2, %v2130_v56, %v2131_v31  ;;  %v2294_v1 = vrot.slane %v7595_v21, 2 }
 0x2ae   : > { %v1823_v24 = vpop.f32.mrf.mxu0  ;;  %v5249_v53 = vpack.i.bf16 %v7839_v46, %v7844_v6  ;;  %v2288_v21 = vsel %vm562_vm3, %v2286_v4, %v2287_v61 }
 0x2af   : > { %v1951_v38 = vmax.f32 %v1829_v43, 0.0  ;;  %v1824_v33 = vadd.f32 %v7572_v50, %v1823_v24  ;;  %v2306_v43 = vrot.slane %v7884_v51, 2  ;;  %v7951_v5 = vsel %vm562_vm3, %v2292_v25, %v2294_v1 }
 0x2b0   : > { %5250 = vrot.lane.b32.xlu1 %v5249_v53, %s5838_s11  ;;  %v5269_v20 = vpack.i.bf16 %v7951_v5, %v7939_v13 }
 0x2b1   : > { %1985 = vst.msk [vmem:[#allocation2 + $0x81] sm:$0xff] %vm1975_vm14, %v1951_v38  ;;  %v1950_v58 = vmax.f32 %v1824_v33, 0.0  ;;  %v7961_v24 = vsel %vm562_vm3, %v2306_v43, %v2307_v29 }
 0x2b2   : > { %v5279_v53 = vpack.i.bf16 %v7961_v24, %v2288_v21 }
 0x2b3   : > { %1984 = vst.msk [vmem:[#allocation2 + $0x79] sm:$0xff] %vm1975_vm14, %v1950_v58 }
 0x2b8   : > { %v7890_v60 = vld [vmem:[#allocation2 + $0x88] sm:$0x3] }
 0x2b9   : > { %v5027_v37 = vpop.f32.mrf.mxu0  ;;  %v2138_v32 = vrot.slane %v7890_v60, 1  ;;  %v2314_v40 = vrot.slane %v7890_v60, 2 }
 0x2ba   : > { %v1839_v18 = vadd.f32 %v5027_v37, %v7572_v50  ;;  %v7903_v54 = vld [vmem:[#allocation2 + $0x80] sm:$0xff]  ;;  %v7906_v28 = vld [vmem:[#allocation2 + $0x78] sm:$0xff] }
 0x2bb   : > { %v1833_v44 = vpop.f32.mrf.mxu0  ;;  %v5254_v39 = vpack.i.bf16 %v7897_v15, %v7903_v54  ;;  %v2136_v45 = vrot.slane %v7903_v54, 1  ;;  %v2311_v9 = vrot.slane %v7906_v28, 2  ;;  %v2312_v16 = vrot.slane %v7903_v54, 2 }
 0x2bc   : > { %v1953_v27 = vmax.f32 %v1839_v18, 0.0  ;;  %v1834_v35 = vadd.f32 %v7572_v50, %v1833_v44  ;;  %v5289_v11 = vpack.i.bf16 %v7906_v28, %v7599_v19  ;;  %v2289_v44 = vrot.slane %v7503_v12, 2 }
 0x2bd   : > { %5255 = vrot.lane.b32.xlu0 %v5254_v39, %s5840_s17  ;;  %v7922_v42 = vsel %vm385_vm2, %v2136_v45, %v2138_v32  ;;  %v7926_v55 = vsel %vm562_vm3, %v2311_v9, %v2312_v16  ;;  %v2133_v32 = vrot.slane %v7805_v3, 1  ;;  %v7990_v19 = vsel %vm562_vm3, %v2312_v16, %v2314_v40 }
 0x2be   : > { %1987 = vst.msk [vmem:[#allocation2 + $0x99] sm:$0xff] %vm1975_vm14, %v1953_v27  ;;  %v1952_v8 = vmax.f32 %v1834_v35, 0.0  ;;  %v5259_v22 = vpack.i.bf16 %v7820_v26, %v7922_v42  ;;  %v7932_v7 = vpack.i.bf16 %v7926_v55, %v2293_v59  ;;  %9550 = vst [vmem:[#allocation23_spill] sm:$0xff] %v7990_v19  ;;  %v2290_v35 = vsel %vm562_vm3, %v2287_v61, %v2289_v44 }
 0x2bf   : > { %v8003_v3 = vsel %vm385_vm2, %v2131_v31, %v2133_v32  ;;  %v2296_v59 = vrot.slane %v7671_v63, 2  ;;  %v2297_v31 = vrot.slane %v7673_v34, 2  ;;  %v5304_v4 = vpack.i.bf16 %v7844_v6, %v2290_v35 }
 0x2c0   : > { %1986 = vst.msk [vmem:[#allocation2 + $0x91] sm:$0xff] %vm1975_vm14, %v1952_v8  ;;  %5260 = vrot.lane.b32.xlu1 %v5259_v22, %s5841_s23  ;;  %v5294_v27 = vpack.i.bf16 %v8003_v3, %v7990_v19  ;;  %v2135_v61 = vrot.slane %v7906_v28, 1  ;;  %v5314_v21 = vpack.i.bf16 %v7903_v54, %v7601_v2  ;;  %v5359_v44 = vpack.i.bf16 %v7990_v19, %v7951_v5 }
 0x2c1   : > { %5265 = vrot.lane.b32.xlu0 %v7932_v7, %s5838_s11  ;;  %v8026_v1 = vsel %vm562_vm3, %v2296_v59, %v2297_v31 }
 0x2c4   : > { %5270 = vrot.lane.b32.xlu1 %v5269_v20, %s5838_s11 }
 0x2c5   : > { %v7981_v62 = vld [vmem:[#allocation2 + $0xa0] sm:$0x3] }
 0x2c6   : > { %v2143_v56 = vrot.slane %v7981_v62, 1 }
 0x2c7   : > { %v2026_v57 = vld [vmem:[#allocation2 + $0x90] sm:$0xff]  ;;  %v7966_v38 = vld [vmem:[#allocation2 + $0x98] sm:$0xff] }
 0x2c8   : > { %5280 = vrot.lane.b32.xlu1 %v5279_v53, %s5840_s17  ;;  %v7970_v33 = vpack.i.bf16 %v2026_v57, %v7671_v63  ;;  %v2140_v48 = vrot.slane %v2026_v57, 1  ;;  %v2141_v29 = vrot.slane %v7966_v38, 1  ;;  %v7998_v60 = vpack.i.bf16 %v7966_v38, %v7673_v34  ;;  %v2017_v34 = vld [vmem:[#allocation2 + $0x48] sm:$0xff] }
 0x2c9   : > { %v5030_v58 = vpop.f32.mrf.mxu0  ;;  %v2316_v16 = vrot.slane %v2026_v57, 2  ;;  %v2317_v12 = vrot.slane %v7966_v38, 2 }
 0x2ca   : > { %v1849_v0 = vadd.f32 %v5030_v58, %v7572_v50  ;;  %5275 = vrot.lane.b32.xlu0 %v7970_v33, %s5840_s17  ;;  %v7979_v17 = vsel %vm385_vm2, %v2140_v48, %v2141_v29  ;;  %v8006_v9 = vsel %vm385_vm2, %v2141_v29, %v2143_v56  ;;  %v8044_v48 = vsel %vm385_vm2, %v2135_v61, %v2136_v45 }
 0x2cb   : > { %v1843_v52 = vpop.f32.mrf.mxu0  ;;  %v5284_v37 = vpack.i.bf16 %v7979_v17, %v7685_v23  ;;  %v5309_v8 = vpack.i.bf16 %v8006_v9, %v7688_v36  ;;  %v8021_v22 = vsel %vm562_vm3, %v2316_v16, %v2317_v12  ;;  %v2299_v29 = vrot.slane %v7667_v30, 2 }
 0x2cc   : > { %v1955_v25 = vmax.f32 %v1849_v0, 0.0  ;;  %v1844_v18 = vadd.f32 %v7572_v50, %v1843_v52  ;;  %5290 = vrot.lane.b32.xlu1 %v5289_v11, %s5841_s23  ;;  %9551 = vst [vmem:[#allocation24_spill] sm:$0xff] %v8021_v22  ;;  %v8032_v63 = vpack.i.bf16 %v8021_v22, %v8026_v1  ;;  %v2125_v58 = vrot.slane %v2017_v34, 1 }
 0x2cd   : > { %v8050_v2 = vsel %vm562_vm3, %v2297_v31, %v2299_v29 }
 0x2ce   : > { %1989 = vst.msk [vmem:[#allocation2 + $0xb1] sm:$0xff] %vm1975_vm14, %v1955_v25  ;;  %v1954_v39 = vmax.f32 %v1844_v18, 0.0  ;;  %5285 = vrot.lane.b32.xlu0 %v5284_v37, %s5841_s23  ;;  %v5324_v30 = vpack.i.bf16 %v8050_v2, %v8044_v48  ;;  %v8062_v45 = vsel %vm385_vm2, %v2125_v58, %v2126_v14  ;;  %v2319_v25 = vrot.slane %v7981_v62, 2 }
 0x2d0   : > { %1988 = vst.msk [vmem:[#allocation2 + $0xa9] sm:$0xff] %vm1975_vm14, %v1954_v39  ;;  %5300 = vrot.lane.b32.xlu1 %v7998_v60, %s5840_s17  ;;  %v8072_v56 = vsel %vm562_vm3, %v2317_v12, %v2319_v25 }
 0x2d1   : > { %9552 = vst [vmem:[#allocation25_spill] sm:$0xff] %v8072_v56  ;;  %v5349_v14 = vpack.i.bf16 %v7922_v42, %v8072_v56 }
 0x2d2   : > { %5295 = vrot.lane.b32.xlu0 %v5294_v27, %s5838_s11 }
 0x2d4   : > { %5310 = vrot.lane.b32.xlu1 %v5309_v8, %s5841_s23 }
 0x2d5   : > { %v2031_v62 = vld [vmem:[#allocation2 + $0xb8] sm:$0x3] }
 0x2d6   : > { %5305 = vrot.lane.b32.xlu0 %v5304_v4, %s5840_s17  ;;  %v2148_v39 = vrot.slane %v2031_v62, 1 }
 0x2d7   : > { %v2029_v43 = vld [vmem:[#allocation2 + $0xa8] sm:$0xff]  ;;  %v8034_v20 = vld [vmem:[#allocation2 + $0xb0] sm:$0xff] }
 0x2d8   : > { %5320 = vrot.lane.b32.xlu1 %v8032_v63, %s5838_s11  ;;  %v2145_v53 = vrot.slane %v2029_v43, 1  ;;  %v2146_v57 = vrot.slane %v8034_v20, 1  ;;  %v5329_v11 = vpack.i.bf16 %v2029_v43, %v2017_v34  ;;  %v8089_v16 = vpack.i.bf16 %v8034_v20, %v7788_v41 }
 0x2d9   : > { %v5033_v38 = vpop.f32.mrf.mxu0  ;;  %v2321_v27 = vrot.slane %v2029_v43, 2  ;;  %v2322_v35 = vrot.slane %v8034_v20, 2 }
 0x2da   : > { %v1859_v0 = vadd.f32 %v5033_v38, %v7572_v50  ;;  %5315 = vrot.lane.b32.xlu0 %v5314_v21, %s5841_s23  ;;  %v8053_v37 = vsel %vm385_vm2, %v2145_v53, %v2146_v57  ;;  %v8092_v12 = vsel %vm385_vm2, %v2146_v57, %v2148_v39 }
 0x2db   : > { %v1853_v52 = vpop.f32.mrf.mxu0  ;;  %v8069_v32 = vpack.i.bf16 %v8053_v37, %v8062_v45  ;;  %v5364_v4 = vpack.i.bf16 %v8092_v12, %v7839_v46  ;;  %v8104_v61 = vsel %vm562_vm3, %v2321_v27, %v2322_v35 }
 0x2dc   : > { %v1957_v40 = vmax.f32 %v1859_v0, 0.0  ;;  %v1854_v54 = vadd.f32 %v7572_v50, %v1853_v52  ;;  %5330 = vrot.lane.b32.xlu1 %v5329_v11, %s5840_s17  ;;  %9553 = vst [vmem:[#allocation26_spill] sm:$0xff] %v8104_v61  ;;  %v2324_v0 = vrot.slane %v2031_v62, 2 }
 0x2de   : > { %1991 = vst.msk [vmem:[#allocation2 + $0xc9] sm:$0xff] %vm1975_vm14, %v1957_v40  ;;  %v1956_v18 = vmax.f32 %v1854_v54, 0.0  ;;  %5325 = vrot.lane.b32.xlu0 %v5324_v30, %s5838_s11  ;;  %v8137_v54 = vsel %vm562_vm3, %v2322_v35, %v2324_v0 }
 0x2df   : > { %9554 = vst [vmem:[#allocation27_spill] sm:$0xff] %v8137_v54 }
 0x2e0   : > { %1990 = vst.msk [vmem:[#allocation2 + $0xc1] sm:$0xff] %vm1975_vm14, %v1956_v18  ;;  %5340 = vrot.lane.b32.xlu1 %v8069_v32, %s5841_s23 }
 0x2e2   : > { %5335 = vrot.lane.b32.xlu0 %v7932_v7, %s5840_s17 }
 0x2e4   : > { %5350 = vrot.lane.b32.xlu1 %v5349_v14, %s5838_s11 }
 0x2e5   : > { %v2034_v58 = vld [vmem:[#allocation2 + $0xd0] sm:$0x3] }
 0x2e6   : > { %5345 = vrot.lane.b32.xlu0 %v7970_v33, %s5841_s23  ;;  %v2301_v33 = vrot.slane %v2017_v34, 2  ;;  %v5379_v34 = vpack.i.bf16 %v7897_v15, %v7979_v17 }
 0x2e7   : > { %v2032_v20 = vld [vmem:[#allocation2 + $0xc0] sm:$0xff]  ;;  %v8110_v21 = vld [vmem:[#allocation2 + $0xc8] sm:$0xff] }
 0x2e8   : > { %5360 = vrot.lane.b32.xlu1 %v5359_v44, %s5840_s17  ;;  %v2150_v57 = vrot.slane %v2032_v20, 1  ;;  %v2151_v38 = vrot.slane %v8110_v21, 1  ;;  %v8126_v29 = vpack.i.bf16 %v2032_v20, %v7884_v51  ;;  %v5409_v25 = vpack.i.bf16 %v8110_v21, %v7820_v26 }
 0x2e9   : > { %v5036_v7 = vpop.f32.mrf.mxu0  ;;  %v2327_v62 = vrot.slane %v8110_v21, 2 }
 0x2ea   : > { %v1869_v59 = vadd.f32 %v5036_v7, %v7572_v50  ;;  %5355 = vrot.lane.b32.xlu0 %v8089_v16, %s5840_s17  ;;  %v5404_v7 = vpack.i.bf16 %v8006_v9, %v8137_v54 }
 0x2eb   : > { %v1863_v5 = vpop.f32.mrf.mxu0 }
 0x2ec   : > { %v1959_v31 = vmax.f32 %v1869_v59, 0.0  ;;  %v1864_v8 = vadd.f32 %v7572_v50, %v1863_v5  ;;  %5370 = vrot.lane.b32.xlu1 %v7998_v60, %s5841_s23  ;;  %v8115_v60 = vsel %vm562_vm3, %v2301_v33, %v2302_v10  ;;  %v8129_v10 = vsel %vm385_vm2, %v2150_v57, %v2151_v38 }
 0x2ed   : > { %v5374_v53 = vpack.i.bf16 %v8104_v61, %v8115_v60  ;;  %v5394_v52 = vpack.i.bf16 %v8129_v10, %v7939_v13  ;;  %v2329_v57 = vrot.slane %v2034_v58, 2 }
 0x2ee   : > { %1993 = vst.msk [vmem:[#allocation2 + $0xe1] sm:$0xff] %vm1975_vm14, %v1959_v31  ;;  %v1958_v43 = vmax.f32 %v1864_v8, 0.0  ;;  %5365 = vrot.lane.b32.xlu0 %v5364_v4, %s5841_s23  ;;  %v8171_v4 = vld [vmem:[%s9242_s3 + $0x118] sm:$0xff] }
 0x2ef   : > { %5058 = vmatprep.subr.mxu0 %v8171_v4 }
 0x2f0   : > { %1992 = vst.msk [vmem:[#allocation2 + $0xd9] sm:$0xff] %vm1975_vm14, %v1958_v43  ;;  %5380 = vrot.lane.b32.xlu1 %v5379_v34, %s5838_s11 }
 0x2f2   : > { %5375 = vrot.lane.b32.xlu0 %v5374_v53, %s5838_s11 }
 0x2f4   : > { %5390 = vrot.lane.b32.xlu1 %v8032_v63, %s5840_s17  ;;  %v2153_v63 = vrot.slane %v2034_v58, 1 }
 0x2f6   : > { %5385 = vrot.lane.b32.xlu0 %v8126_v29, %s5840_s17  ;;  %v8144_v14 = vsel %vm385_vm2, %v2151_v38, %v2153_v63  ;;  %v8185_v38 = vld [vmem:[%s9241_s2] ss:$0 sm:$0xff]  ;;  %v8193_v63 = vsel %vm562_vm3, %v2327_v62, %v2329_v57 }
 0x2f7   : > { %v5419_v26 = vpack.i.bf16 %v8144_v14, %v8003_v3  ;;  %v2035_v59 = vld [vmem:[#allocation2 + $0xd8] sm:$0xff]  ;;  %v8162_v5 = vld [vmem:[#allocation2 + $0xe0] sm:$0xff]  ;;  %9556 = vst [vmem:[#allocation29_spill] sm:$0xff] %v8193_v63 }
 0x2f8   : > { %5400 = vrot.lane.b32.xlu1 %v5329_v11, %s5841_s23  ;;  %v2326_v11 = vrot.slane %v2032_v20, 2  ;;  %v2155_v31 = vrot.slane %v2035_v59, 1  ;;  %v2156_v8 = vrot.slane %v8162_v5, 1  ;;  %v5439_v43 = vpack.i.bf16 %v2035_v59, %v7906_v28 }
 0x2f9   : > { %v5039_v40 = vpop.f32.mrf.mxu0 }
 0x2fa   : > { %v1879_v30 = vadd.f32 %v5039_v40, %v7572_v50  ;;  %5395 = vrot.lane.b32.xlu0 %v5394_v52, %s5841_s23  ;;  %v8156_v35 = vsel %vm562_vm3, %v2326_v11, %v2327_v62  ;;  %v8179_v34 = vsel %vm385_vm2, %v2155_v31, %v2156_v8  ;;  %v2037_v52 = vld [vmem:[#allocation2 + $0xe8] sm:$0x3]  ;;  %v2331_v62 = vrot.slane %v2035_v59, 2 }
 0x2fb   : > { %v1873_v18 = vpop.f32.mrf.mxu0  ;;  %9555 = vst [vmem:[#allocation28_spill] sm:$0xff] %v8156_v35  ;;  %v5429_v33 = vpack.i.bf16 %v8156_v35, %v7961_v24 }
 0x2fc   : > { %v1961_v44 = vmax.f32 %v1879_v30, 0.0  ;;  %v1874_v39 = vadd.f32 %v7572_v50, %v1873_v18  ;;  %5410 = vrot.lane.b32.xlu1 %v5409_v25, %s5840_s17  ;;  %v5414_v50 = vpack.i.bf16 %v8072_v56, %v8050_v2  ;;  %v2158_v25 = vrot.slane %v2037_v52, 1 }
 0x2fe   : > { %1995 = vst.msk [vmem:[#allocation2 + $0xf9] sm:$0xff] %vm1975_vm14, %v1961_v44  ;;  %v1960_v27 = vmax.f32 %v1874_v39, 0.0  ;;  %5405 = vrot.lane.b32.xlu0 %v5404_v7, %s5838_s11  ;;  %v8202_v11 = vsel %vm385_vm2, %v2156_v8, %v2158_v25  ;;  %v2332_v44 = vrot.slane %v8162_v5, 2 }
 0x2ff   : > { %9557 = vst [vmem:[#allocation39_spill] sm:$0xff] %v8202_v11  ;;  %v5469_v39 = vpack.i.bf16 %v8110_v21, %v8202_v11 }
 0x300   : > { %1994 = vst.msk [vmem:[#allocation2 + $0xf1] sm:$0xff] %vm1975_vm14, %v1960_v27  ;;  %5420 = vrot.lane.b32.xlu1 %v5419_v26, %s5841_s23  ;;  %v5464_v27 = vpack.i.bf16 %v8137_v54, %v8162_v5  ;;  %v8217_v26 = vsel %vm562_vm3, %v2331_v62, %v2332_v44 }
 0x301   : > { %9558 = vst [vmem:[#allocation6_spill] sm:$0xff] %v8217_v26 }
 0x302   : > { %5415 = vrot.lane.b32.xlu0 %v5414_v50, %s5840_s17  ;;  %v2334_v50 = vrot.slane %v2037_v52, 2 }
 0x304   : > { %5430 = vrot.lane.b32.xlu1 %v5429_v33, %s5838_s11  ;;  %v8223_v8 = vsel %vm562_vm3, %v2332_v44, %v2334_v50 }
 0x305   : > { %v2040_v21 = vld [vmem:[#allocation2 + $0x100] sm:$0x3]  ;;  %9559 = vst [vmem:[#allocation7_spill] sm:$0xff] %v8223_v8 }
 0x306   : > { %5425 = vrot.lane.b32.xlu0 %v8089_v16, %s5841_s23  ;;  %v5449_v16 = vpack.i.bf16 %v8179_v34, %v8044_v48  ;;  %v2163_v57 = vrot.slane %v2040_v21, 1 }
 0x307   : > { %v8211_v7 = vld [vmem:[#allocation2 + $0xf8] sm:$0xff] }
 0x308   : > { %5440 = vrot.lane.b32.xlu1 %v5439_v43, %s5840_s17  ;;  %v2161_v31 = vrot.slane %v8211_v7, 1  ;;  %v5474_v43 = vpack.i.bf16 %v8129_v10, %v8217_v26 }
 0x309   : > { %v5042_v20 = vpop.f32.mrf.mxu0 }
 0x30a   : > { %v1889_v0 = vadd.f32 %v8185_v38, %v5042_v20  ;;  %5435 = vrot.lane.b32.xlu0 %v8069_v32, %s5838_s11  ;;  %v5459_v32 = vpack.i.bf16 %v8092_v12, %v8193_v63 }
 0x30b   : > { %v1883_v40 = vpop.f32.mrf.mxu0 }
 0x30c   : > { %v1963_v30 = vmax.f32 %v1889_v0, 0.0  ;;  %v1884_v58 = vadd.f32 %v8185_v38, %v1883_v40  ;;  %5450 = vrot.lane.b32.xlu1 %v5449_v16, %s5841_s23  ;;  %v5489_v0 = vpack.i.bf16 %v8144_v14, %v8223_v8  ;;  %v8235_v16 = vsel %vm385_vm2, %v2161_v31, %v2163_v57 }
 0x30d   : > { %9561 = vst [vmem:[#allocation40_spill] sm:$0xff] %v8235_v16 }
 0x30e   : > { %1997 = vst.msk [vmem:[#allocation2 + $0x111] sm:$0xff] %vm1975_vm14, %v1963_v30  ;;  %v1962_v18 = vmax.f32 %v1884_v58, 0.0  ;;  %5445 = vrot.lane.b32.xlu0 %v5374_v53, %s5840_s17  ;;  %v2038_v53 = vld [vmem:[#allocation2 + $0xf0] sm:$0xff]  ;;  %v2337_v58 = vrot.slane %v8211_v7, 2 }
 0x30f   : > { %v2160_v33 = vrot.slane %v2038_v53, 1  ;;  %v2336_v30 = vrot.slane %v2038_v53, 2 }
 0x310   : > { %1996 = vst.msk [vmem:[#allocation2 + $0x109] sm:$0xff] %vm1975_vm14, %v1962_v18  ;;  %5460 = vrot.lane.b32.xlu1 %v5459_v32, %s5838_s11  ;;  %v5499_v18 = vpack.i.bf16 %v8162_v5, %v8235_v16 }
 0x311   : > { %v8229_v20 = vsel %vm385_vm2, %v2160_v33, %v2161_v31  ;;  %v8253_v50 = vsel %vm562_vm3, %v2336_v30, %v2337_v58  ;;  %v2339_v33 = vrot.slane %v2040_v21, 2 }
 0x312   : > { %5455 = vrot.lane.b32.xlu0 %v8126_v29, %s5841_s23  ;;  %v5479_v29 = vpack.i.bf16 %v8156_v35, %v2038_v53  ;;  %9560 = vst [vmem:[#allocation41_spill] sm:$0xff] %v8229_v20  ;;  %v5484_v52 = vpack.i.bf16 %v2035_v59, %v8229_v20  ;;  %v5494_v59 = vpack.i.bf16 %v8193_v63, %v8211_v7  ;;  %9562 = vst [vmem:[#allocation43_spill] sm:$0xff] %v8253_v50 }
 0x313   : > { %v5504_v21 = vpack.i.bf16 %v8179_v34, %v8253_v50 }
 0x314   : > { %5470 = vrot.lane.b32.xlu1 %v5469_v39, %s5841_s23 }
 0x315   : > { %v2043_v57 = vld [vmem:[#allocation2 + $0x118] sm:$0x3] }
 0x316   : > { %5465 = vrot.lane.b32.xlu0 %v5464_v27, %s5840_s17  ;;  %v2168_v30 = vrot.slane %v2043_v57, 1 }
 0x317   : > { %v8244_v32 = vld [vmem:[#allocation2 + $0x108] sm:$0xff]  ;;  %v8246_v62 = vld [vmem:[#allocation2 + $0x110] sm:$0xff] }
 0x318   : > { %5480 = vrot.lane.b32.xlu1 %v5479_v29, %s5840_s17  ;;  %v2165_v31 = vrot.slane %v8244_v32, 1  ;;  %v2166_v5 = vrot.slane %v8246_v62, 1 }
 0x31a   : > { %5475 = vrot.lane.b32.xlu0 %v5474_v43, %s5838_s11  ;;  %v5509_v43 = vpack.i.bf16 %v8217_v26, %v8244_v32 }
 0x31c   : > { %5490 = vrot.lane.b32.xlu1 %v5489_v0, %s5838_s11  ;;  %v8262_v0 = vsel %vm562_vm3, %v2337_v58, %v2339_v33  ;;  %v8276_v58 = vpop.permute.xlu1 %5240 }
 0x31d   : > { %v5045_v40 = vpop.f32.mrf.mxu0  ;;  %9563 = vst [vmem:[#allocation42_spill] sm:$0xff] %v8262_v0 }
 0x31e   : > { %v1899_v25 = vadd.f32 %v8185_v38, %v5045_v40  ;;  %5485 = vrot.lane.b32.xlu0 %v5484_v52, %s5841_s23  ;;  %v8268_v52 = vpop.permute.xlu0 %5235  ;;  %v8271_v40 = vsel %vm385_vm2, %v2165_v31, %v2166_v5 }
 0x31f   : > { %v1893_v44 = vpop.f32.mrf.mxu0  ;;  %9564 = vst [vmem:[#allocation9_spill] sm:$0xff] %v8271_v40 }
 0x320   : > { %v1965_v39 = vmax.f32 %v1899_v25, 0.0  ;;  %v1894_v27 = vadd.f32 %v8185_v38, %v1893_v44  ;;  %5500 = vrot.lane.b32.xlu1 %v5499_v18, %s5841_s23  ;;  %v5519_v25 = vpack.i.bf16 %v8202_v11, %v8262_v0  ;;  %v8279_v18 = vsel %vm385_vm2, %v2166_v5, %v2168_v30 }
 0x321   : > { %9565 = vst [vmem:[#allocation45_spill] sm:$0xff] %v8279_v18  ;;  %v5514_v44 = vpack.i.bf16 %v2038_v53, %v8271_v40  ;;  %v5524_v53 = vpack.i.bf16 %v8223_v8, %v8246_v62 }
 0x322   : > { %1999 = vst.msk [vmem:[#allocation2 + $0x129] sm:$0xff] %vm1975_vm14, %v1965_v39  ;;  %v1964_v29 = vmax.f32 %v1894_v27, 0.0  ;;  %5495 = vrot.lane.b32.xlu0 %v5494_v59, %s5840_s17  ;;  %v2341_v39 = vrot.slane %v8244_v32, 2  ;;  %v2342_v27 = vrot.slane %v8246_v62, 2  ;;  %v5529_v59 = vpack.i.bf16 %v8211_v7, %v8279_v18  ;;  %v8288_v33 = vpop.permute.xlu0 %5245  ;;  %v5251_v31 = vpop.permute.xlu1 %5250 }
 0x323   : > { %v2344_v7 = vrot.slane %v2043_v57, 2 }
 0x324   : > { %1998 = vst.msk [vmem:[#allocation2 + $0x121] sm:$0xff] %vm1975_vm14, %v1964_v29  ;;  %5510 = vrot.lane.b32.xlu1 %v5509_v43, %s5840_s17  ;;  %v8300_v30 = vsel %vm562_vm3, %v2341_v39, %v2342_v27 }
 0x325   : > { %9566 = vst [vmem:[#allocation44_spill] sm:$0xff] %v8300_v30  ;;  %v8306_v35 = vsel %vm562_vm3, %v2342_v27, %v2344_v7  ;;  %v5534_v39 = vpack.i.bf16 %v8229_v20, %v8300_v30 }
 0x326   : > { %5505 = vrot.lane.b32.xlu0 %v5504_v21, %s5838_s11  ;;  %v5549_v27 = vpack.i.bf16 %v8235_v16, %v8306_v35 }
 0x328   : > { %5520 = vrot.lane.b32.xlu1 %v5519_v25, %s5838_s11  ;;  %v5253_v25 = vunpack.i.h.bf16 %v5251_v31 }
 0x329   : > { %v2046_v63 = vld [vmem:[#allocation2 + $0x130] sm:$0x3] }
 0x32a   : > { %5515 = vrot.lane.b32.xlu0 %v5514_v44, %s5841_s23  ;;  %v5252_v44 = vunpack.i.l.bf16 %v5251_v31  ;;  %v2911_v7 = vsel %vm1975_vm14, %v7788_v41, %v5253_v25 }
 0x32b   : > { %v8290_v29 = vld [vmem:[#allocation2 + $0x120] sm:$0xff]  ;;  %v8292_v5 = vld [vmem:[#allocation2 + $0x128] sm:$0xff] }
 0x32c   : > { %5530 = vrot.lane.b32.xlu1 %v5529_v59, %s5841_s23  ;;  %v2170_v43 = vrot.slane %v8290_v29, 1  ;;  %v2171_v21 = vrot.slane %v8292_v5, 1  ;;  %v5539_v26 = vpack.i.bf16 %v8253_v50, %v8290_v29  ;;  %v2346_v25 = vrot.slane %v8290_v29, 2 }
 0x32e   : > { %5525 = vrot.lane.b32.xlu0 %v5524_v53, %s5840_s17  ;;  %v8312_v57 = vsel %vm385_vm2, %v2170_v43, %v2171_v21  ;;  %v2173_v53 = vrot.slane %v2046_v63, 1 }
 0x32f   : > { %v5256_v59 = vpop.permute.xlu0 %5255  ;;  %v5544_v20 = vpack.i.bf16 %v8244_v32, %v8312_v57  ;;  %v2347_v32 = vrot.slane %v8292_v5, 2 }
 0x330   : > { %v5258_v8 = vunpack.i.h.bf16 %v5256_v59  ;;  %v5257_v54 = vunpack.i.l.bf16 %v5256_v59  ;;  %5540 = vrot.lane.b32.xlu1 %v5539_v26, %s5840_s17  ;;  %v3009_v26 = vsel %vm1975_vm14, %v8003_v3, %v5252_v44  ;;  %v2349_v44 = vrot.slane %v2046_v63, 2 }
 0x331   : > { %v5048_v31 = vpop.f32.mrf.mxu0 }
 0x332   : > { %v1909_v50 = vadd.f32 %v8185_v38, %v5048_v31  ;;  %v5261_v61 = vpop.permute.xlu1 %5260  ;;  %5535 = vrot.lane.b32.xlu0 %v5534_v39, %s5838_s11  ;;  %v8325_v31 = vsel %vm385_vm2, %v2171_v21, %v2173_v53  ;;  %v3041_v16 = vsel %vm2936_vm15, %v3009_v26, %v5257_v54  ;;  %v2944_v3 = vsel %vm2936_vm15, %v2911_v7, %v5258_v8 }
 0x333   : > { %v5263_v43 = vunpack.i.h.bf16 %v5261_v61  ;;  %v5262_v59 = vunpack.i.l.bf16 %v5261_v61  ;;  %v1903_v56 = vpop.f32.mrf.mxu0  ;;  %v5266_v54 = vpop.permute.xlu0 %5265  ;;  %v5554_v8 = vpack.i.bf16 %v8262_v0, %v8292_v5 }
 0x334   : > { %v1967_v22 = vmax.f32 %v1909_v50, 0.0  ;;  %v1904_v39 = vadd.f32 %v8185_v38, %v1903_v56  ;;  %5550 = vrot.lane.b32.xlu1 %v5549_v27, %s5838_s11  ;;  %v5559_v56 = vpack.i.bf16 %v8246_v62, %v8325_v31  ;;  %v5268_v62 = vunpack.i.h.bf16 %v5266_v54 }
 0x335   : > { %v3073_v41 = vsel %vm2969_vm0, %v3041_v16, %v5262_v59  ;;  %v2977_v61 = vsel %vm2969_vm0, %v2944_v3, %v5263_v43  ;;  %v8347_v16 = vsel %vm562_vm3, %v2346_v25, %v2347_v32  ;;  %v8351_v27 = vsel %vm562_vm3, %v2347_v32, %v2349_v44  ;;  %v5740_v43 = vld [vmem:[#allocation2] sm:$0xff] }
 0x336   : > { %2001 = vst.msk [vmem:[#allocation2 + $0x141] sm:$0xff] %vm1975_vm14, %v1967_v22  ;;  %v1966_v21 = vmax.f32 %v1904_v39, 0.0  ;;  %v8336_v50 = vpop.permute.xlu1 %5270  ;;  %5545 = vrot.lane.b32.xlu0 %v5544_v20, %s5841_s23  ;;  %3304 = vmatprep.mubr.f32.mxu1 %v3073_v41  ;;  %v5237_v22 = vunpack.i.l.bf16 %v8268_v52  ;;  %v5267_v20 = vunpack.i.l.bf16 %v5266_v54  ;;  %v5564_v7 = vpack.i.bf16 %v8271_v40, %v8347_v16 }
 0x337   : > { %3305 = vmatmul.mubr.f32.vlgmr.msra.gmra.mxu1 %v2977_v61  ;;  %v5272_v39 = vunpack.i.l.bf16 %v8336_v50  ;;  %v5579_v32 = vpack.i.bf16 %v8279_v18, %v8351_v27 }
 0x338   : > { %2000 = vst.msk [vmem:[#allocation2 + $0x139] sm:$0xff] %vm1975_vm14, %v1966_v21  ;;  %5560 = vrot.lane.b32.xlu1 %v5559_v56, %s5841_s23  ;;  %v2904_v59 = vsel %vm1975_vm14, %v5740_v43, %v5237_v22  ;;  %v3002_v25 = vsel %vm1975_vm14, %v7611_v47, %v5267_v20  ;;  %v5273_v21 = vunpack.i.h.bf16 %v8336_v50  ;;  %v3010_v22 = vsel %vm1975_vm14, %v8044_v48, %v5268_v62 }
 0x339   : > { %v2912_v48 = vsel %vm1975_vm14, %v7884_v51, %v5272_v39 }
 0x33a   : > { %v5281_v53 = vpop.permute.xlu1 %5280  ;;  %5555 = vrot.lane.b32.xlu0 %v5554_v8, %s5840_s17 }
 0x33b   : > { %v5282_v3 = vunpack.i.l.bf16 %v5281_v53  ;;  %v5283_v56 = vunpack.i.h.bf16 %v5281_v53 }
 0x33c   : > { %v5276_v26 = vpop.permute.xlu0 %5275 }
 0x33d   : > { %v5278_v41 = vunpack.i.h.bf16 %v5276_v26  ;;  %v5277_v63 = vunpack.i.l.bf16 %v5276_v26  ;;  %v8369_v26 = vld [vmem:[#allocation2 + $0x148] sm:$0x3]  ;;  %v2937_v53 = vsel %vm2936_vm15, %v2904_v59, %v5282_v3  ;;  %v2945_v51 = vsel %vm2936_vm15, %v2912_v48, %v5283_v56 }
 0x33e   : > { %v5291_v61 = vpop.permute.xlu1 %5290  ;;  %5565 = vrot.lane.b32.xlu0 %v5564_v7, %s5838_s11  ;;  %v2178_v19 = vrot.slane %v8369_v26, 1 }
 0x33f   : > { %v5292_v54 = vunpack.i.l.bf16 %v5291_v61  ;;  %v8363_v8 = vld [vmem:[#allocation2 + $0x138] sm:$0xff]  ;;  %v8367_v44 = vld [vmem:[#allocation2 + $0x140] sm:$0xff]  ;;  %v5293_v7 = vunpack.i.h.bf16 %v5291_v61  ;;  %v3034_v61 = vsel %vm2936_vm15, %v3002_v25, %v5277_v63  ;;  %v3042_v40 = vsel %vm2936_vm15, %v3010_v22, %v5278_v41 }
 0x340   : > { %v5286_v43 = vpop.permute.xlu0 %5285  ;;  %v5569_v47 = vpack.i.bf16 %v8300_v30, %v8363_v8  ;;  %v2175_v20 = vrot.slane %v8363_v8, 1  ;;  %v2176_v50 = vrot.slane %v8367_v44, 1  ;;  %v2352_v56 = vrot.slane %v8367_v44, 2 }
 0x341   : > { %v5288_v18 = vunpack.i.h.bf16 %v5286_v43  ;;  %v5287_v0 = vunpack.i.l.bf16 %v5286_v43  ;;  %v2970_v3 = vsel %vm2969_vm0, %v2937_v53, %v5292_v54  ;;  %v2978_v63 = vsel %vm2969_vm0, %v2945_v51, %v5293_v7 }
 0x342   : > { %v5301_v62 = vpop.permute.xlu1 %5300  ;;  %5570 = vrot.lane.b32.xlu1 %v5569_v47, %s5840_s17  ;;  %v8382_v30 = vsel %vm385_vm2, %v2175_v20, %v2176_v50  ;;  %v8393_v25 = vsel %vm385_vm2, %v2176_v50, %v2178_v19  ;;  %v3003_v7 = vsel %vm1975_vm14, %v7614_v49, %v5273_v21 }
 0x343   : > { %v3066_v11 = vsel %vm2969_vm0, %v3034_v61, %v5287_v0  ;;  %v3074_v59 = vsel %vm2969_vm0, %v3042_v40, %v5288_v18  ;;  %v5302_v39 = vunpack.i.l.bf16 %v5301_v62  ;;  %v5574_v41 = vpack.i.bf16 %v8290_v29, %v8382_v30 }
 0x344   : > { %v5296_v43 = vpop.permute.xlu0 %5295  ;;  %3269 = vmatprep.mubr.f32.mxu0 %v3066_v11  ;;  %3309 = vmatprep.mubr.f32.mxu1 %v3074_v59  ;;  %v5238_v0 = vunpack.i.h.bf16 %v8268_v52  ;;  %v2351_v18 = vrot.slane %v8363_v8, 2  ;;  %v3132_v11 = vld [vmem:[%s9242_s3 + $0x110] sm:$0xff]  ;;  %v5303_v29 = vunpack.i.h.bf16 %v5301_v62  ;;  %v5584_v52 = vpack.i.bf16 %v8306_v35, %v8367_v44 }
 0x345   : > { %v5297_v22 = vunpack.i.l.bf16 %v5296_v43  ;;  %v5051_v40 = vpop.f32.mrf.mxu0  ;;  %3270 = vmatmul.mubr.f32.vlgmr.msra.gmra.mxu0 %v2970_v3  ;;  %3310 = vmatmul.mubr.f32.gmra.mxu1 %v2978_v63  ;;  %v5589_v53 = vpack.i.bf16 %v8292_v5, %v8393_v25  ;;  %v3035_v59 = vsel %vm2936_vm15, %v3003_v7, %v5302_v39  ;;  %v5298_v49 = vunpack.i.h.bf16 %v5296_v43  ;;  %v5741_v63 = vld [vmem:[#allocation2 + $0x8] sm:$0xff] }
 0x346   : > { %5575 = vrot.lane.b32.xlu0 %v5574_v41, %s5841_s23  ;;  %v1919_v19 = vadd.f32 %v8185_v38, %v5051_v40  ;;  %v5311_v54 = vpop.permute.xlu1 %5310  ;;  %5580 = vrot.lane.b32.xlu1 %v5579_v32, %s5838_s11  ;;  %v3130_v40 = vld [vmem:[%s9242_s3 + $0x100] sm:$0xff] }
 0x347   : > { %v5313_v47 = vunpack.i.h.bf16 %v5311_v54  ;;  %v5312_v20 = vunpack.i.l.bf16 %v5311_v54  ;;  %v1913_v50 = vpop.f32.mrf.mxu0  ;;  %v3011_v48 = vsel %vm1975_vm14, %v7922_v42, %v5297_v22  ;;  %5059 = vmatpush3.msra.mxu0 %v8171_v4  ;;  %v8421_v42 = vsel %vm562_vm3, %v2351_v18, %v2352_v56  ;;  %v3131_v4 = vld [vmem:[%s9242_s3 + $0x108] sm:$0xff] }
 0x348   : > { %v1969_v62 = vmax.f32 %v1919_v19, 0.0  ;;  %v1914_v32 = vadd.f32 %v8185_v38, %v1913_v50  ;;  %v5306_v61 = vpop.permute.xlu0 %5305  ;;  %v3043_v3 = vsel %vm2936_vm15, %v3011_v48, %v5303_v29  ;;  %5060 = vmatprep.subr.mxu0 %v3132_v11  ;;  %v2905_v22 = vsel %vm1975_vm14, %v5741_v63, %v5238_v0  ;;  %v5742_v54 = vld [vmem:[#allocation2 + $0x68] sm:$0xff] }
 0x349   : > { %v3067_v21 = vsel %vm2969_vm0, %v3035_v59, %v5312_v20  ;;  %v3075_v51 = vsel %vm2969_vm0, %v3043_v3, %v5313_v47  ;;  %5061 = vmatpush3.msra.mxu0 %v3132_v11  ;;  %v5308_v39 = vunpack.i.h.bf16 %v5306_v61  ;;  %v5307_v41 = vunpack.i.l.bf16 %v5306_v61 }
 0x34a   : > { %2003 = vst.msk [vmem:[#allocation2 + $0x159] sm:$0xff] %vm1975_vm14, %v1969_v62  ;;  %v1968_v5 = vmax.f32 %v1914_v32, 0.0  ;;  %5585 = vrot.lane.b32.xlu0 %v5584_v52, %s5840_s17  ;;  %v5321_v43 = vpop.permute.xlu1 %5320  ;;  %5590 = vrot.lane.b32.xlu1 %v5589_v53, %s5841_s23  ;;  %v5594_v11 = vpack.i.bf16 %v8312_v57, %v8421_v42  ;;  %v2913_v52 = vsel %vm1975_vm14, %v5742_v54, %v5298_v49  ;;  %v5242_v59 = vunpack.i.l.bf16 %v8276_v58 }
 0x34b   : > { %3274 = vmatprep.mubr.f32.mxu0 %v3067_v21  ;;  %3314 = vmatprep.mubr.f32.mxu1 %v3075_v51  ;;  %v5322_v7 = vunpack.i.l.bf16 %v5321_v43  ;;  %v2938_v47 = vsel %vm2936_vm15, %v2905_v22, %v5307_v41  ;;  %v2946_v20 = vsel %vm2936_vm15, %v2913_v52, %v5308_v39  ;;  %v5323_v50 = vunpack.i.h.bf16 %v5321_v43 }
 0x34c   : > { %2002 = vst.msk [vmem:[#allocation2 + $0x151] sm:$0xff] %vm1975_vm14, %v1968_v5  ;;  %v5316_v18 = vpop.permute.xlu0 %5315  ;;  %5062 = vmatprep.subr.mxu0 %v3131_v4  ;;  %v2354_v21 = vrot.slane %v8369_v26, 2 }
 0x34d   : > { %v5318_v29 = vunpack.i.h.bf16 %v5316_v18  ;;  %v5317_v19 = vunpack.i.l.bf16 %v5316_v18  ;;  %5063 = vmatpush3.msra.mxu0 %v3131_v4  ;;  %v3004_v49 = vsel %vm1975_vm14, %v7685_v23, %v5322_v7  ;;  %v3012_v41 = vsel %vm1975_vm14, %v7979_v17, %v5323_v50 }
 0x34e   : > { %5595 = vrot.lane.b32.xlu0 %v5594_v11, %s5838_s11  ;;  %v5331_v0 = vpop.permute.xlu1 %5330  ;;  %5064 = vmatprep.subr.mxu0 %v3130_v40 }
 0x34f   : > { %v5332_v53 = vunpack.i.l.bf16 %v5331_v0  ;;  %v2971_v48 = vsel %vm2969_vm0, %v2938_v47, %v5317_v19  ;;  %v2979_v62 = vsel %vm2969_vm0, %v2946_v20, %v5318_v29  ;;  %5065 = vmatpush3.msra.mxu0 %v3130_v40  ;;  %v5333_v32 = vunpack.i.h.bf16 %v5331_v0 }
 0x350   : > { %v8442_v61 = vpop.permute.xlu0 %5325  ;;  %3275 = vmatmul.mubr.f32.gmra.mxu0 %v2971_v48  ;;  %3315 = vmatmul.mubr.f32.gmra.mxu1 %v2979_v62  ;;  %v8468_v19 = vsel %vm562_vm3, %v2352_v56, %v2354_v21 }
 0x351   : > { %v3036_v39 = vsel %vm2936_vm15, %v3004_v49, %v5332_v53  ;;  %v3044_v40 = vsel %vm2936_vm15, %v3012_v41, %v5333_v32  ;;  %v8460_v18 = vld [vmem:[#allocation2 + $0x160] sm:$0x3]  ;;  %v5327_v11 = vunpack.i.l.bf16 %v8442_v61  ;;  %v5609_v56 = vpack.i.bf16 %v8325_v31, %v8468_v19  ;;  %v5743_v53 = vld [vmem:[#allocation2 + $0x18] sm:$0xff] }
 0x352   : > { %v5341_v3 = vpop.permute.xlu1 %5340  ;;  %v2183_v20 = vrot.slane %v8460_v18, 1  ;;  %v2906_v48 = vsel %vm1975_vm14, %v5743_v53, %v5242_v59 }
 0x353   : > { %v5343_v51 = vunpack.i.h.bf16 %v5341_v3  ;;  %v5342_v4 = vunpack.i.l.bf16 %v5341_v3  ;;  %v8448_v5 = vld [vmem:[#allocation2 + $0x150] sm:$0xff]  ;;  %v8453_v43 = vld [vmem:[#allocation2 + $0x158] sm:$0xff] }
 0x354   : > { %v5336_v63 = vpop.permute.xlu0 %5335  ;;  %v5599_v22 = vpack.i.bf16 %v8347_v16, %v8448_v5  ;;  %v2180_v23 = vrot.slane %v8448_v5, 1  ;;  %v2181_v26 = vrot.slane %v8453_v43, 1  ;;  %v2356_v62 = vrot.slane %v8448_v5, 2 }
 0x355   : > { %v3068_v29 = vsel %vm2969_vm0, %v3036_v39, %v5342_v4  ;;  %v3076_v17 = vsel %vm2969_vm0, %v3044_v40, %v5343_v51  ;;  %v5338_v54 = vunpack.i.h.bf16 %v5336_v63  ;;  %v5337_v52 = vunpack.i.l.bf16 %v5336_v63 }
 0x356   : > { %v8470_v7 = vpop.permute.xlu1 %5350  ;;  %5600 = vrot.lane.b32.xlu1 %v5599_v22, %s5840_s17  ;;  %3279 = vmatprep.mubr.f32.mxu0 %v3068_v29  ;;  %v8474_v0 = vsel %vm385_vm2, %v2180_v23, %v2181_v26  ;;  %v2357_v32 = vrot.slane %v8453_v43, 2  ;;  %v8488_v51 = vsel %vm385_vm2, %v2181_v26, %v2183_v20  ;;  %v5243_v63 = vunpack.i.h.bf16 %v8276_v58 }
 0x357   : > { %3319 = vmatprep.mubr.f32.mxu1 %v3076_v17  ;;  %v5604_v47 = vpack.i.bf16 %v8363_v8, %v8474_v0  ;;  %v2914_v8 = vsel %vm1975_vm14, %v7906_v28, %v5327_v11  ;;  %v2939_v59 = vsel %vm2936_vm15, %v2906_v48, %v5337_v52  ;;  %v5614_v28 = vpack.i.bf16 %v8351_v27, %v8453_v43 }
 0x358   : > { %v5346_v50 = vpop.permute.xlu0 %5345  ;;  %v2947_v41 = vsel %vm2936_vm15, %v2914_v8, %v5338_v54  ;;  %v5619_v17 = vpack.i.bf16 %v8367_v44, %v8488_v51  ;;  %v8505_v58 = vsel %vm562_vm3, %v2356_v62, %v2357_v32  ;;  %v5328_v54 = vunpack.i.h.bf16 %v8442_v61 }
 0x359   : > { %v5348_v3 = vunpack.i.h.bf16 %v5346_v50  ;;  %v5347_v49 = vunpack.i.l.bf16 %v5346_v50  ;;  %5605 = vrot.lane.b32.xlu0 %v5604_v47, %s5841_s23  ;;  %v5054_v21 = vpop.f32.mrf.mxu0  ;;  %v5352_v52 = vunpack.i.l.bf16 %v8470_v7  ;;  %v5353_v47 = vunpack.i.h.bf16 %v8470_v7 }
 0x35a   : > { %v1929_v4 = vadd.f32 %v8185_v38, %v5054_v21  ;;  %v5361_v39 = vpop.permute.xlu1 %5360  ;;  %5610 = vrot.lane.b32.xlu1 %v5609_v56, %s5838_s11  ;;  %v5624_v62 = vpack.i.bf16 %v8382_v30, %v8505_v58  ;;  %v5247_v61 = vunpack.i.l.bf16 %v8288_v33  ;;  %v5744_v21 = vld [vmem:[#allocation2 + $0x20] sm:$0xff] }
 0x35b   : > { %v1923_v22 = vpop.f32.mrf.mxu0  ;;  %v2972_v40 = vsel %vm2969_vm0, %v2939_v59, %v5347_v49  ;;  %v2980_v23 = vsel %vm2969_vm0, %v2947_v41, %v5348_v3  ;;  %v5363_v44 = vunpack.i.h.bf16 %v5361_v39  ;;  %v5362_v48 = vunpack.i.l.bf16 %v5361_v39 }
 0x35c   : > { %v1971_v26 = vmax.f32 %v1929_v4, 0.0  ;;  %v1924_v11 = vadd.f32 %v8185_v38, %v1923_v22  ;;  %v5356_v29 = vpop.permute.xlu0 %5355  ;;  %3280 = vmatmul.mubr.f32.gmra.mxu0 %v2972_v40  ;;  %3320 = vmatmul.mubr.f32.gmra.mxu1 %v2980_v23  ;;  %v2907_v8 = vsel %vm1975_vm14, %v5744_v21, %v5243_v63  ;;  %v3005_v39 = vsel %vm1975_vm14, %v7688_v36, %v5328_v54 }
 0x35d   : > { %5615 = vrot.lane.b32.xlu0 %v5614_v28, %s5840_s17  ;;  %v5358_v50 = vunpack.i.h.bf16 %v5356_v29  ;;  %v5357_v56 = vunpack.i.l.bf16 %v5356_v29  ;;  %v3013_v41 = vsel %vm1975_vm14, %v8006_v9, %v5352_v52  ;;  %v5745_v28 = vld [vmem:[#allocation2 + $0x80] sm:$0xff]  ;;  %v2359_v63 = vrot.slane %v8460_v18, 2 }
 0x35e   : > { %2005 = vst.msk [vmem:[#allocation2 + $0x171] sm:$0xff] %vm1975_vm14, %v1971_v26  ;;  %v1970_v20 = vmax.f32 %v1924_v11, 0.0  ;;  %v5371_v53 = vpop.permute.xlu1 %5370  ;;  %5620 = vrot.lane.b32.xlu1 %v5619_v17, %s5841_s23  ;;  %v2915_v26 = vsel %vm1975_vm14, %v5745_v28, %v5353_v47  ;;  %v2940_v36 = vsel %vm2936_vm15, %v2907_v8, %v5362_v48 }
 0x35f   : > { %v5373_v3 = vunpack.i.h.bf16 %v5371_v53  ;;  %v5372_v49 = vunpack.i.l.bf16 %v5371_v53  ;;  %v3037_v40 = vsel %vm2936_vm15, %v3005_v39, %v5357_v56  ;;  %v3045_v23 = vsel %vm2936_vm15, %v3013_v41, %v5358_v50  ;;  %v5747_v39 = vld [vmem:[#allocation2 + $0x90] sm:$0xff] }
 0x360   : > { %2004 = vst.msk [vmem:[#allocation2 + $0x169] sm:$0xff] %vm1975_vm14, %v1970_v20  ;;  %v5366_v7 = vpop.permute.xlu0 %5365  ;;  %v2948_v17 = vsel %vm2936_vm15, %v2915_v26, %v5363_v44  ;;  %v8538_v47 = vsel %vm562_vm3, %v2357_v32, %v2359_v63 }
 0x361   : > { %v5368_v4 = vunpack.i.h.bf16 %v5366_v7  ;;  %v5367_v59 = vunpack.i.l.bf16 %v5366_v7  ;;  %5625 = vrot.lane.b32.xlu0 %v5624_v62, %s5838_s11  ;;  %v2973_v54 = vsel %vm2969_vm0, %v2940_v36, %v5372_v49  ;;  %v2981_v52 = vsel %vm2969_vm0, %v2948_v17, %v5373_v3  ;;  %v5746_v62 = vld [vmem:[#allocation2 + $0x30] sm:$0xff] }
 0x362   : > { %v8523_v22 = vpop.permute.xlu1 %5380  ;;  %v5639_v48 = vpack.i.bf16 %v8393_v25, %v8538_v47  ;;  %v2908_v3 = vsel %vm1975_vm14, %v5746_v62, %v5247_v61 }
 0x363   : > { %v3069_v11 = vsel %vm2969_vm0, %v3037_v40, %v5367_v59  ;;  %v3077_v29 = vsel %vm2969_vm0, %v3045_v23, %v5368_v4  ;;  %v5382_v18 = vunpack.i.l.bf16 %v8523_v22  ;;  %v5383_v4 = vunpack.i.h.bf16 %v8523_v22 }
 0x364   : > { %v5376_v9 = vpop.permute.xlu0 %5375  ;;  %3284 = vmatprep.mubr.f32.mxu0 %v3069_v11  ;;  %3324 = vmatprep.mubr.f32.mxu1 %v3077_v29 }
 0x365   : > { %3285 = vmatmul.mubr.f32.gmra.mxu0 %v2973_v54  ;;  %3325 = vmatmul.mubr.f32.gmra.mxu1 %v2981_v52  ;;  %v8541_v50 = vld [vmem:[#allocation2 + $0x178] sm:$0x3]  ;;  %v5377_v56 = vunpack.i.l.bf16 %v5376_v9  ;;  %v5378_v32 = vunpack.i.h.bf16 %v5376_v9  ;;  %v2916_v41 = vsel %vm1975_vm14, %v5747_v39, %v5382_v18 }
 0x366   : > { %v5391_v20 = vpop.permute.xlu1 %5390  ;;  %v2188_v40 = vrot.slane %v8541_v50, 1 }
 0x367   : > { %v8543_v53 = vld [vmem:[#allocation2 + $0x168] sm:$0xff]  ;;  %v8545_v44 = vld [vmem:[#allocation2 + $0x170] sm:$0xff]  ;;  %v5392_v59 = vunpack.i.l.bf16 %v5391_v20  ;;  %v5393_v23 = vunpack.i.h.bf16 %v5391_v20  ;;  %v3006_v22 = vsel %vm1975_vm14, %v8062_v45, %v5377_v56  ;;  %v3014_v54 = vsel %vm1975_vm14, %v8053_v37, %v5378_v32 }
 0x368   : > { %v5386_v49 = vpop.permute.xlu0 %5385  ;;  %v5629_v7 = vpack.i.bf16 %v8421_v42, %v8543_v53  ;;  %v2185_v21 = vrot.slane %v8543_v53, 1  ;;  %v2186_v8 = vrot.slane %v8545_v44, 1  ;;  %v2361_v29 = vrot.slane %v8543_v53, 2 }
 0x369   : > { %v5388_v28 = vunpack.i.h.bf16 %v5386_v49  ;;  %v5387_v61 = vunpack.i.l.bf16 %v5386_v49  ;;  %v2362_v36 = vrot.slane %v8545_v44, 2  ;;  %v5644_v52 = vpack.i.bf16 %v8468_v19, %v8545_v44 }
 0x36a   : > { %v5401_v26 = vpop.permute.xlu1 %5400  ;;  %5630 = vrot.lane.b32.xlu1 %v5629_v7, %s5840_s17  ;;  %v8559_v63 = vsel %vm385_vm2, %v2185_v21, %v2186_v8  ;;  %v8572_v18 = vsel %vm385_vm2, %v2186_v8, %v2188_v40  ;;  %v2941_v56 = vsel %vm2936_vm15, %v2908_v3, %v5392_v59  ;;  %v2949_v21 = vsel %vm2936_vm15, %v2916_v41, %v5393_v23 }
 0x36b   : > { %v5634_v11 = vpack.i.bf16 %v8448_v5, %v8559_v63  ;;  %v5402_v17 = vunpack.i.l.bf16 %v5401_v26  ;;  %v5403_v20 = vunpack.i.h.bf16 %v5401_v26  ;;  %v3038_v37 = vsel %vm2936_vm15, %v3006_v22, %v5387_v61 }
 0x36c   : > { %v5396_v9 = vpop.permute.xlu0 %5395  ;;  %v3046_v32 = vsel %vm2936_vm15, %v3014_v54, %v5388_v28  ;;  %v5649_v26 = vpack.i.bf16 %v8453_v43, %v8572_v18  ;;  %v8588_v3 = vsel %vm562_vm3, %v2361_v29, %v2362_v36 }
 0x36d   : > { %v5398_v5 = vunpack.i.h.bf16 %v5396_v9  ;;  %v5397_v62 = vunpack.i.l.bf16 %v5396_v9  ;;  %5635 = vrot.lane.b32.xlu0 %v5634_v11, %s5841_s23  ;;  %v5057_v45 = vpop.f32.mrf.mxu0  ;;  %v2974_v41 = vsel %vm2969_vm0, %v2941_v56, %v5402_v17  ;;  %v2982_v43 = vsel %vm2969_vm0, %v2949_v21, %v5403_v20 }
 0x36e   : > { %v1939_v49 = vadd.f32 %v8185_v38, %v5057_v45  ;;  %v5411_v7 = vpop.permute.xlu1 %5410  ;;  %5640 = vrot.lane.b32.xlu1 %v5639_v48, %s5838_s11  ;;  %v5654_v17 = vpack.i.bf16 %v8474_v0, %v8588_v3  ;;  %v5248_v20 = vunpack.i.h.bf16 %v8288_v33 }
 0x36f   : > { %v1933_v8 = vpop.f32.mrf.mxu0  ;;  %v3070_v39 = vsel %vm2969_vm0, %v3038_v37, %v5397_v62  ;;  %v3078_v40 = vsel %vm2969_vm0, %v3046_v32, %v5398_v5  ;;  %v5412_v59 = vunpack.i.l.bf16 %v5411_v7  ;;  %v5413_v11 = vunpack.i.h.bf16 %v5411_v7  ;;  %v5748_v32 = vld [vmem:[#allocation2 + $0x38] sm:$0xff] }
 0x370   : > { %v1973_v48 = vmax.f32 %v1939_v49, 0.0  ;;  %v1934_v61 = vadd.f32 %v8185_v38, %v1933_v8  ;;  %v5406_v28 = vpop.permute.xlu0 %5405  ;;  %3289 = vmatprep.mubr.f32.mxu0 %v3070_v39  ;;  %3329 = vmatprep.mubr.f32.mxu1 %v3078_v40  ;;  %v3007_v38 = vsel %vm1975_vm14, %v7839_v46, %v5383_v4  ;;  %v2909_v21 = vsel %vm1975_vm14, %v5748_v32, %v5248_v20  ;;  %v5749_v40 = vld [vmem:[#allocation2 + $0x98] sm:$0xff] }
 0x371   : > { %v5407_v23 = vunpack.i.l.bf16 %v5406_v28  ;;  %5645 = vrot.lane.b32.xlu0 %v5644_v52, %s5840_s17  ;;  %3290 = vmatmul.mubr.f32.gmra.mxu0 %v2974_v41  ;;  %v3039_v62 = vsel %vm2936_vm15, %v3007_v38, %v5412_v59  ;;  %v5408_v56 = vunpack.i.h.bf16 %v5406_v28 }
 0x372   : > { %2007 = vst.msk [vmem:[#allocation2 + $0x189] sm:$0xff] %vm1975_vm14, %v1973_v48  ;;  %v1972_v22 = vmax.f32 %v1934_v61, 0.0  ;;  %3330 = vmatmul.mubr.f32.gmra.mxu1 %v2982_v43  ;;  %v5421_v29 = vpop.permute.xlu1 %5420  ;;  %5650 = vrot.lane.b32.xlu1 %v5649_v26, %s5841_s23 }
 0x373   : > { %v5423_v9 = vunpack.i.h.bf16 %v5421_v29  ;;  %v5422_v54 = vunpack.i.l.bf16 %v5421_v29  ;;  %v3015_v52 = vsel %vm1975_vm14, %v8092_v12, %v5407_v23  ;;  %v2364_v12 = vrot.slane %v8541_v50, 2 }
 0x374   : > { %2006 = vst.msk [vmem:[#allocation2 + $0x181] sm:$0xff] %vm1975_vm14, %v1972_v22  ;;  %v5416_v5 = vpop.permute.xlu0 %5415  ;;  %v3047_v45 = vsel %vm2936_vm15, %v3015_v52, %v5413_v11  ;;  %v2917_v26 = vsel %vm1975_vm14, %v5749_v40, %v5408_v56 }
 0x375   : > { %5655 = vrot.lane.b32.xlu0 %v5654_v17, %s5838_s11  ;;  %v3071_v46 = vsel %vm2969_vm0, %v3039_v62, %v5422_v54  ;;  %v3079_v4 = vsel %vm2969_vm0, %v3047_v45, %v5423_v9  ;;  %v5418_v49 = vunpack.i.h.bf16 %v5416_v5  ;;  %v5417_v7 = vunpack.i.l.bf16 %v5416_v5 }
 0x376   : > { %v5431_v37 = vpop.permute.xlu1 %5430  ;;  %3294 = vmatprep.mubr.f32.mxu0 %v3071_v46  ;;  %3334 = vmatprep.mubr.f32.mxu1 %v3079_v4  ;;  %v8615_v48 = vsel %vm562_vm3, %v2362_v36, %v2364_v12 }
 0x377   : > { %v5433_v59 = vunpack.i.h.bf16 %v5431_v37  ;;  %v5432_v61 = vunpack.i.l.bf16 %v5431_v37  ;;  %v2942_v41 = vsel %vm2936_vm15, %v2909_v21, %v5417_v7  ;;  %v2950_v50 = vsel %vm2936_vm15, %v2917_v26, %v5418_v49 }
 0x378   : > { %v5426_v33 = vpop.permute.xlu0 %5425  ;;  %v5669_v20 = vpack.i.bf16 %v8488_v51, %v8615_v48 }
 0x379   : > { %v5428_v8 = vunpack.i.h.bf16 %v5426_v33  ;;  %v5427_v39 = vunpack.i.l.bf16 %v5426_v33  ;;  %v8625_v38 = vld [vmem:[#allocation2 + $0x190] sm:$0x3]  ;;  %v3008_v45 = vsel %vm1975_vm14, %v7939_v13, %v5432_v61  ;;  %v3016_v56 = vsel %vm1975_vm14, %v8129_v10, %v5433_v59 }
 0x37a   : > { %v5441_v28 = vpop.permute.xlu1 %5440  ;;  %v2564_v46 = vrot.slane %v8625_v38, 1 }
 0x37b   : > { %v5443_v23 = vunpack.i.h.bf16 %v5441_v28  ;;  %v2975_v43 = vsel %vm2969_vm0, %v2942_v41, %v5427_v39  ;;  %v2983_v11 = vsel %vm2969_vm0, %v2950_v50, %v5428_v8  ;;  %v8621_v22 = vld [vmem:[#allocation2 + $0x180] sm:$0xff]  ;;  %v8623_v29 = vld [vmem:[#allocation2 + $0x188] sm:$0xff]  ;;  %v5442_v36 = vunpack.i.l.bf16 %v5441_v28  ;;  %v8657_v41 = vld [vmem:[#allocation2 + $0x198] sm:$0xff] }
 0x37c   : > { %v5436_v9 = vpop.permute.xlu0 %5435  ;;  %3295 = vmatmul.mubr.f32.gmra.mxu0 %v2975_v43  ;;  %3335 = vmatmul.mubr.f32.gmra.mxu1 %v2983_v11  ;;  %v5659_v54 = vpack.i.bf16 %v8505_v58, %v8621_v22  ;;  %v2561_v17 = vrot.slane %v8621_v22, 1  ;;  %v2562_v52 = vrot.slane %v8623_v29, 1  ;;  %v2598_v21 = vrot.slane %v8621_v22, 2  ;;  %v8659_v50 = vld [vmem:[#allocation2 + $0x1a0] sm:$0xff] }
 0x37d   : > { %v5438_v4 = vunpack.i.h.bf16 %v5436_v9  ;;  %v3040_v33 = vsel %vm2936_vm15, %v3008_v45, %v5442_v36  ;;  %v3048_v32 = vsel %vm2936_vm15, %v3016_v56, %v5443_v23  ;;  %v2599_v13 = vrot.slane %v8623_v29, 2 }
 0x37e   : > { %v5451_v5 = vpop.permute.xlu1 %5450  ;;  %5660 = vrot.lane.b32.xlu1 %v5659_v54, %s5840_s17  ;;  %v8635_v62 = vsel %vm385_vm2, %v2561_v17, %v2562_v52  ;;  %v5437_v8 = vunpack.i.l.bf16 %v5436_v9  ;;  %v8652_v40 = vsel %vm385_vm2, %v2562_v52, %v2564_v46  ;;  %v5674_v28 = vpack.i.bf16 %v8538_v47, %v8623_v29  ;;  %v5750_v52 = vld [vmem:[#allocation2 + $0x48] sm:$0xff] }
 0x37f   : > { %v5453_v49 = vunpack.i.h.bf16 %v5451_v5  ;;  %v5452_v7 = vunpack.i.l.bf16 %v5451_v5  ;;  %v5664_v37 = vpack.i.bf16 %v8543_v53, %v8635_v62  ;;  %v5679_v43 = vpack.i.bf16 %v8545_v44, %v8652_v40  ;;  %v5751_v5 = vld [vmem:[#allocation2 + $0xa8] sm:$0xff] }
 0x380   : > { %v5446_v12 = vpop.permute.xlu0 %5445  ;;  %v8664_v11 = vsel %vm562_vm3, %v2598_v21, %v2599_v13  ;;  %v2798_v36 = vrot.slane %v8657_v41, 1  ;;  %v2799_v9 = vrot.slane %v8659_v50, 1  ;;  %v2918_v45 = vsel %vm1975_vm14, %v5751_v5, %v5438_v4 }
 0x381   : > { %5665 = vrot.lane.b32.xlu0 %v5664_v37, %s5841_s23  ;;  %v3072_v10 = vsel %vm2969_vm0, %v3040_v33, %v5452_v7  ;;  %v3080_v39 = vsel %vm2969_vm0, %v3048_v32, %v5453_v49  ;;  %v5448_v26 = vunpack.i.h.bf16 %v5446_v12  ;;  %v5447_v59 = vunpack.i.l.bf16 %v5446_v12  ;;  %v8674_v12 = vld [vmem:[#allocation2 + $0x1a8] sm:$0x3] }
 0x382   : > { %v5461_v61 = vpop.permute.xlu1 %5460  ;;  %5670 = vrot.lane.b32.xlu1 %v5669_v20, %s5838_s11  ;;  %3299 = vmatprep.mubr.f32.mxu0 %v3072_v10  ;;  %v2910_v20 = vsel %vm1975_vm14, %v5750_v52, %v5437_v8  ;;  %v5684_v21 = vpack.i.bf16 %v8559_v63, %v8664_v11  ;;  %v2601_v4 = vrot.slane %v8625_v38, 2  ;;  %v5689_v10 = vpack.i.bf16 %v8588_v3, %v8657_v41 }
 0x383   : > { %3339 = vmatprep.mubr.f32.mxu1 %v3080_v39  ;;  %v5463_v56 = vunpack.i.h.bf16 %v5461_v61  ;;  %v5462_v46 = vunpack.i.l.bf16 %v5461_v61  ;;  %v2943_v7 = vsel %vm2936_vm15, %v2910_v20, %v5447_v59  ;;  %v2951_v37 = vsel %vm2936_vm15, %v2918_v45, %v5448_v26 }
 0x384   : > { %v5456_v23 = vpop.permute.xlu0 %5455  ;;  %v2800_v39 = vsel %vm385_vm2, %v2798_v36, %v2799_v9  ;;  %v8688_v61 = vsel %vm562_vm3, %v2599_v13, %v2601_v4  ;;  %v2801_v38 = vrot.slane %v8674_v12, 1 }
 0x385   : > { %v5458_v54 = vunpack.i.h.bf16 %v5456_v23  ;;  %v5457_v17 = vunpack.i.l.bf16 %v5456_v23  ;;  %5675 = vrot.lane.b32.xlu0 %v5674_v28, %s5840_s17  ;;  %v3017_v36 = vsel %vm1975_vm14, %v8144_v14, %v5462_v46  ;;  %v5694_v52 = vpack.i.bf16 %v8621_v22, %v2800_v39 }
 0x386   : > { %v5471_v49 = vpop.permute.xlu1 %5470  ;;  %5680 = vrot.lane.b32.xlu1 %v5679_v43, %s5841_s23  ;;  %v5699_v45 = vpack.i.bf16 %v8572_v18, %v8688_v61  ;;  %v2802_v22 = vsel %vm385_vm2, %v2799_v9, %v2801_v38  ;;  %vm4633_vm2 = vcmask 1042434  }
 0x387   : > { %v2976_v33 = vsel %vm2969_vm0, %v2943_v7, %v5457_v17  ;;  %v2984_v32 = vsel %vm2969_vm0, %v2951_v37, %v5458_v54  ;;  %v5473_v28 = vunpack.i.h.bf16 %v5471_v49  ;;  %v5472_v23 = vunpack.i.l.bf16 %v5471_v49  ;;  %v5752_v54 = vld [vmem:[#allocation2 + $0xb0] sm:$0xff]  ;;  %v5753_v37 = vld [vmem:[#allocation2 + $0xc0] sm:$0xff] }
 0x388   : > { %v5466_v8 = vpop.permute.xlu0 %5465  ;;  %3300 = vmatmul.mubr.f32.gmra.mxu0 %v2976_v33  ;;  %3340 = vmatmul.mubr.f32.gmra.mxu1 %v2984_v32  ;;  %v2919_v17 = vsel %vm1975_vm14, %v5752_v54, %v5463_v56  ;;  %v9567_v54 = vld [vmem:[#allocation39_spill] sm:$0xff] }
 0x389   : > { %v5468_v26 = vunpack.i.h.bf16 %v5466_v8  ;;  %v5467_v59 = vunpack.i.l.bf16 %v5466_v8  ;;  %5685 = vrot.lane.b32.xlu0 %v5684_v21, %s5838_s11  ;;  %5066 = vmatprep.mubr.msk.f32.mxu0 %vm1975_vm14, %v8026_v1 }
 0x38a   : > { %v5481_v43 = vpop.permute.xlu1 %5480  ;;  %5690 = vrot.lane.b32.xlu1 %v5689_v10, %s5840_s17 }
 0x38b   : > { %v3049_v1 = vsel %vm2936_vm15, %v3017_v36, %v5467_v59  ;;  %v2952_v13 = vsel %vm2936_vm15, %v2919_v17, %v5468_v26  ;;  %v5483_v32 = vunpack.i.h.bf16 %v5481_v43  ;;  %v5482_v21 = vunpack.i.l.bf16 %v5481_v43 }
 0x38c   : > { %v5476_v20 = vpop.permute.xlu0 %5475  ;;  %5067 = vmatmul.mubr.msk.f32.vlgmr.msra.gmra.mxu0 %vm1975_vm14, %v8050_v2  ;;  %v3081_v5 = vsel %vm2969_vm0, %v3049_v1, %v5472_v23  ;;  %v2985_v14 = vsel %vm2969_vm0, %v2952_v13, %v5473_v28  ;;  %v5704_v2 = vpack.i.bf16 %v8615_v48, %v8659_v50 }
 0x38d   : > { %v5478_v46 = vunpack.i.h.bf16 %v5476_v20  ;;  %v5477_v49 = vunpack.i.l.bf16 %v5476_v20  ;;  %5695 = vrot.lane.b32.xlu0 %v5694_v52, %s5841_s23  ;;  %3344 = vmatprep.mubr.f32.mxu1 %v3081_v5  ;;  %v5754_v52 = vld [vmem:[#allocation2 + $0xc8] sm:$0xff]  ;;  %v9568_v5 = vld [vmem:[#allocation23_spill] sm:$0xff] }
 0x38e   : > { %5069 = vmatprep.mubr.msk.f32.mxu0 %vm1975_vm14, %v8115_v60  ;;  %v5491_v56 = vpop.permute.xlu1 %5490  ;;  %5700 = vrot.lane.b32.xlu1 %v5699_v45, %s5838_s11  ;;  %v5709_v60 = vpack.i.bf16 %v8623_v29, %v2802_v22 }
 0x38f   : > { %3345 = vmatmul.mubr.f32.gmra.mxu1 %v2985_v14  ;;  %v3018_v7 = vsel %vm1975_vm14, %v8179_v34, %v5477_v49  ;;  %v2920_v33 = vsel %vm1975_vm14, %v5753_v37, %v5478_v46  ;;  %v5493_v10 = vunpack.i.h.bf16 %v5491_v56  ;;  %v5492_v34 = vunpack.i.l.bf16 %v5491_v56  ;;  %v9569_v49 = vld [vmem:[#allocation24_spill] sm:$0xff]  ;;  %v9570_v56 = vld [vmem:[#allocation41_spill] sm:$0xff] }
 0x390   : > { %v5486_v4 = vpop.permute.xlu0 %5485  ;;  %5070 = vmatmul.mubr.msk.f32.gmra.mxu0 %vm1975_vm14, %v7897_v15  ;;  %v3050_v26 = vsel %vm2936_vm15, %v3018_v7, %v5482_v21  ;;  %v2953_v59 = vsel %vm2936_vm15, %v2920_v33, %v5483_v32  ;;  %v5755_v7 = vld [vmem:[#allocation2 + $0xd8] sm:$0xff] }
 0x391   : > { %v5488_v9 = vunpack.i.h.bf16 %v5486_v4  ;;  %v5487_v8 = vunpack.i.l.bf16 %v5486_v4  ;;  %5705 = vrot.lane.b32.xlu0 %v5704_v2, %s5840_s17  ;;  %5072 = vmatprep.mubr.msk.f32.mxu0 %vm1975_vm14, %v7961_v24  ;;  %v3019_v17 = vsel %vm1975_vm14, %v9567_v54, %v5492_v34  ;;  %v2921_v1 = vsel %vm1975_vm14, %v5754_v52, %v5493_v10  ;;  %v9571_v4 = vld [vmem:[#allocation25_spill] sm:$0xff]  ;;  %v9575_v52 = vld [vmem:[#allocation40_spill] sm:$0xff]  ;;  %s4929_s17 = sshll.u32 %s5897_s22, 10  ;;  %s9199_s22 = scalar_lea.sflag [#allocation4], %s215_s30 }
 0x392   : > { %v5501_v39 = vpop.permute.xlu1 %5500  ;;  %5710 = vrot.lane.b32.xlu1 %v5709_v60, %s5841_s23  ;;  %s4724_s23 = sshll.u32 %s5934_s12, 4  ;;  %s9189_s6 = scalar_lea.hbm %s9244_s5, %s4929_s17  ;;  %s9191_s23 = int_to_ptr.vmem [resolvable:$true] %s4724_s23 }
 0x393   : > { %v3082_v15 = vsel %vm2969_vm0, %v3050_v26, %v5487_v8  ;;  %v2986_v29 = vsel %vm2969_vm0, %v2953_v59, %v5488_v9  ;;  %v5503_v23 = vunpack.i.h.bf16 %v5501_v39  ;;  %v5502_v43 = vunpack.i.l.bf16 %v5501_v39  ;;  %v9572_v8 = vld [vmem:[#allocation26_spill] sm:$0xff]  ;;  %s5767_s7 = scalar_lea.vmem %s9191_s23, 1024  ;;  %p5774_p1 = scmp.lt.s32.totalorder %s9191_s23, %s5772_s9 }
 0x394   : > { %v5496_v38 = vpop.permute.xlu0 %5495  ;;  %3349 = vmatprep.mubr.f32.mxu1 %v3082_v15  ;;  %5073 = vmatmul.mubr.msk.f32.gmra.mxu0 %vm1975_vm14, %v7844_v6  ;;  %p5768_p12 = scmp.ne.s32.totalorder %s9191_s23, %s5767_s7  ;;  %p5775_p2 = scmp.lt.s32.totalorder %s5773_s10, %s5767_s7 }
 0x395   : > { %v5498_v28 = vunpack.i.h.bf16 %v5496_v38  ;;  %v5497_v24 = vunpack.i.l.bf16 %v5496_v38  ;;  %3350 = vmatmul.mubr.f32.gmra.mxu1 %v2986_v29  ;;  %5075 = vmatprep.mubr.msk.f32.mxu0 %vm1975_vm14, %v7926_v55 }
 0x396   : > { %v5511_v36 = vpop.permute.xlu1 %5510  ;;  %p5769_p13 = pnand %p5768_p12, %p5914_p5  ;;  %p5776_p3 = por %p5775_p2, %p5774_p1 }
 0x397   : > { %v3051_v13 = vsel %vm2936_vm15, %v3019_v17, %v5497_v24  ;;  %v2954_v20 = vsel %vm2936_vm15, %v2921_v1, %v5498_v28  ;;  %v5513_v33 = vunpack.i.h.bf16 %v5511_v36  ;;  %v5512_v32 = vunpack.i.l.bf16 %v5511_v36  ;;  %v9573_v28 = vld [vmem:[#allocation27_spill] sm:$0xff] }
 0x398   : > { %v5506_v6 = vpop.permute.xlu0 %5505  ;;  %5076 = vmatmul.mubr.msk.f32.gmra.mxu0 %vm1975_vm14, %v9568_v5  ;;  %v3083_v45 = vsel %vm2969_vm0, %v3051_v13, %v5502_v43  ;;  %v2987_v55 = vsel %vm2969_vm0, %v2954_v20, %v5503_v23  ;;  %v9574_v43 = vld [vmem:[#allocation28_spill] sm:$0xff]  ;;  %p5770_p0 = pneg %p5769_p13 }
 0x399   : > { %v5508_v14 = vunpack.i.h.bf16 %v5506_v6  ;;  %v5507_v46 = vunpack.i.l.bf16 %v5506_v6  ;;  %3354 = vmatprep.mubr.f32.mxu1 %v3083_v45  ;;  %5078 = vmatprep.mubr.msk.f32.mxu0 %vm1975_vm14, %v9569_v49  ;;  %v5756_v13 = vld [vmem:[#allocation2 + $0xe0] sm:$0xff] }
 0x39a   : > { %v5521_v22 = vpop.permute.xlu1 %5520  ;;  %3355 = vmatmul.mubr.f32.gmra.mxu1 %v2987_v55  ;;  %v9576_v55 = vld [vmem:[#allocation29_spill] sm:$0xff]  ;;  %p5777_p4 = pnand %p5776_p3, %p5770_p0 }
 0x39b   : > { %v3020_v2 = vsel %vm1975_vm14, %v9570_v56, %v5507_v46  ;;  %v2922_v37 = vsel %vm1975_vm14, %v5755_v7, %v5508_v14  ;;  %v5523_v10 = vunpack.i.h.bf16 %v5521_v22  ;;  %v5522_v34 = vunpack.i.l.bf16 %v5521_v22  ;;  %v9577_v56 = vld [vmem:[#allocation6_spill] sm:$0xff]  ;;  %v9578_v7 = vld [vmem:[#allocation9_spill] sm:$0xff] }
 0x39c   : > { %v5516_v21 = vpop.permute.xlu0 %5515  ;;  %5079 = vmatmul.mubr.msk.f32.gmra.mxu0 %vm1975_vm14, %v9571_v4  ;;  %v3052_v26 = vsel %vm2936_vm15, %v3020_v2, %v5512_v32  ;;  %v2955_v59 = vsel %vm2936_vm15, %v2922_v37, %v5513_v33  ;;  %v5757_v33 = vld [vmem:[#allocation2 + $0xf0] sm:$0xff] }
 0x39d   : > { %v5518_v60 = vunpack.i.h.bf16 %v5516_v21  ;;  %v5517_v9 = vunpack.i.l.bf16 %v5516_v21  ;;  %5081 = vmatprep.mubr.msk.f32.mxu0 %vm1975_vm14, %v9572_v8  ;;  %v3021_v1 = vsel %vm1975_vm14, %v9575_v52, %v5522_v34  ;;  %v2923_v20 = vsel %vm1975_vm14, %v5756_v13, %v5523_v10  ;;  %v9580_v34 = vld [vmem:[#allocation43_spill] sm:$0xff] }
 0x39e   : > { %v5531_v39 = vpop.permute.xlu1 %5530 }
 0x39f   : > { %v3084_v15 = vsel %vm2969_vm0, %v3052_v26, %v5517_v9  ;;  %v2988_v29 = vsel %vm2969_vm0, %v2955_v59, %v5518_v60  ;;  %v5533_v36 = vunpack.i.h.bf16 %v5531_v39  ;;  %v5532_v54 = vunpack.i.l.bf16 %v5531_v39  ;;  %v9579_v9 = vld [vmem:[#allocation7_spill] sm:$0xff] }
 0x3a0   : > { %v5526_v38 = vpop.permute.xlu0 %5525  ;;  %3359 = vmatprep.mubr.f32.mxu1 %v3084_v15  ;;  %5082 = vmatmul.mubr.msk.f32.gmra.mxu0 %vm1975_vm14, %v9573_v28 }
 0x3a1   : > { %v5528_v24 = vunpack.i.h.bf16 %v5526_v38  ;;  %v5527_v23 = vunpack.i.l.bf16 %v5526_v38  ;;  %3360 = vmatmul.mubr.f32.gmra.mxu1 %v2988_v29  ;;  %5084 = vmatprep.mubr.msk.f32.mxu0 %vm1975_vm14, %v9574_v43 }
 0x3a2   : > { %v5541_v17 = vpop.permute.xlu1 %5540 }
 0x3a3   : > { %v3053_v6 = vsel %vm2936_vm15, %v3021_v1, %v5527_v23  ;;  %v2956_v5 = vsel %vm2936_vm15, %v2923_v20, %v5528_v24  ;;  %v5543_v21 = vunpack.i.h.bf16 %v5541_v17  ;;  %v5542_v4 = vunpack.i.l.bf16 %v5541_v17  ;;  %v9581_v23 = vld [vmem:[#allocation42_spill] sm:$0xff]  ;;  %v9583_v1 = vld [vmem:[#allocation45_spill] sm:$0xff]  ;;  %v5758_v20 = vld [vmem:[#allocation2 + $0xf8] sm:$0xff] }
 0x3a4   : > { %v5536_v45 = vpop.permute.xlu0 %5535  ;;  %5085 = vmatmul.mubr.msk.f32.gmra.mxu0 %vm1975_vm14, %v9576_v55  ;;  %v3085_v14 = vsel %vm2969_vm0, %v3053_v6, %v5532_v54  ;;  %v2989_v46 = vsel %vm2969_vm0, %v2956_v5, %v5533_v36  ;;  %v9582_v54 = vld [vmem:[#allocation44_spill] sm:$0xff] }
 0x3a5   : > { %v5538_v49 = vunpack.i.h.bf16 %v5536_v45  ;;  %v5537_v22 = vunpack.i.l.bf16 %v5536_v45  ;;  %3364 = vmatprep.mubr.f32.mxu1 %v3085_v14  ;;  %5087 = vmatprep.mubr.msk.f32.mxu0 %vm1975_vm14, %v9577_v56 }
 0x3a6   : > { %v5551_v2 = vpop.permute.xlu1 %5550  ;;  %3365 = vmatmul.mubr.f32.gmra.mxu1 %v2989_v46 }
 0x3a7   : > { %v3022_v37 = vsel %vm1975_vm14, %v9578_v7, %v5537_v22  ;;  %v2924_v32 = vsel %vm1975_vm14, %v5757_v33, %v5538_v49  ;;  %v5553_v39 = vunpack.i.h.bf16 %v5551_v2  ;;  %v5552_v26 = vunpack.i.l.bf16 %v5551_v2 }
 0x3a8   : > { %v5546_v60 = vpop.permute.xlu0 %5545  ;;  %5088 = vmatmul.mubr.msk.f32.gmra.mxu0 %vm1975_vm14, %v9579_v9  ;;  %v3054_v59 = vsel %vm2936_vm15, %v3022_v37, %v5542_v4  ;;  %v2957_v15 = vsel %vm2936_vm15, %v2924_v32, %v5543_v21  ;;  %v5759_v32 = vld [vmem:[#allocation2 + $0x108] sm:$0xff] }
 0x3a9   : > { %v5548_v8 = vunpack.i.h.bf16 %v5546_v60  ;;  %v5547_v10 = vunpack.i.l.bf16 %v5546_v60  ;;  %5090 = vmatprep.mubr.msk.f32.mxu0 %vm1975_vm14, %v9580_v34  ;;  %v3023_v13 = vsel %vm1975_vm14, %v9583_v1, %v5552_v26  ;;  %v2925_v6 = vsel %vm1975_vm14, %v5758_v20, %v5553_v39 }
 0x3aa   : > { %v5561_v29 = vpop.permute.xlu1 %5560 }
 0x3ab   : > { %v3086_v38 = vsel %vm2969_vm0, %v3054_v59, %v5547_v10  ;;  %v2990_v28 = vsel %vm2969_vm0, %v2957_v15, %v5548_v8  ;;  %v5563_v17 = vunpack.i.h.bf16 %v5561_v29  ;;  %v5562_v52 = vunpack.i.l.bf16 %v5561_v29  ;;  %v5760_v15 = vld [vmem:[#allocation2 + $0x110] sm:$0xff] }
 0x3ac   : > { %v5556_v24 = vpop.permute.xlu0 %5555  ;;  %3369 = vmatprep.mubr.f32.mxu1 %v3086_v38  ;;  %5091 = vmatmul.mubr.msk.f32.gmra.mxu0 %vm1975_vm14, %v9581_v23  ;;  %v2899_v38 = vrot.slane %v8657_v41, 2 }
 0x3ad   : > { %v5558_v43 = vunpack.i.h.bf16 %v5556_v24  ;;  %v5557_v36 = vunpack.i.l.bf16 %v5556_v24  ;;  %3370 = vmatmul.mubr.f32.gmra.mxu1 %v2990_v28  ;;  %5093 = vmatprep.mubr.msk.f32.mxu0 %vm1975_vm14, %v9582_v54  ;;  %v2900_v28 = vrot.slane %v8659_v50, 2 }
 0x3af   : > { %v3055_v5 = vsel %vm2936_vm15, %v3023_v13, %v5557_v36  ;;  %v2958_v45 = vsel %vm2936_vm15, %v2925_v6, %v5558_v43  ;;  %v2901_v41 = vsel %vm562_vm3, %v2899_v38, %v2900_v28 }
 0x3b0   : > { %5094 = vmatmul.mubr.msk.f32.gmra.mxu0 %vm1975_vm14, %v8306_v35  ;;  %v3087_v55 = vsel %vm2969_vm0, %v3055_v5, %v5562_v52  ;;  %v2991_v14 = vsel %vm2969_vm0, %v2958_v45, %v5563_v17  ;;  %v5566_v46 = vpop.permute.xlu0 %5565 }
 0x3b1   : > { %3374 = vmatprep.mubr.f32.mxu1 %v3087_v55  ;;  %5096 = vmatprep.mubr.msk.f32.mxu0 %vm1975_vm14, %v8347_v16  ;;  %v5568_v22 = vunpack.i.h.bf16 %v5566_v46  ;;  %v5567_v56 = vunpack.i.l.bf16 %v5566_v46 }
 0x3b2   : > { %3375 = vmatmul.mubr.f32.gmra.mxu1 %v2991_v14 }
 0x3b3   : > { %v2926_v21 = vsel %vm1975_vm14, %v5759_v32, %v5568_v22 }
 0x3b4   : > { %v5571_v49 = vpop.permute.xlu1 %5570  ;;  %5097 = vmatmul.mubr.msk.f32.gmra.mxu0 %vm1975_vm14, %v8351_v27  ;;  %v3024_v27 = vsel %vm1975_vm14, %v8312_v57, %v5567_v56 }
 0x3b5   : > { %5099 = vmatprep.mubr.msk.f32.mxu0 %vm1975_vm14, %v8421_v42  ;;  %v5573_v35 = vunpack.i.h.bf16 %v5571_v49  ;;  %v5572_v2 = vunpack.i.l.bf16 %v5571_v49 }
 0x3b7   : > { %v3056_v60 = vsel %vm2936_vm15, %v3024_v27, %v5572_v2  ;;  %v2959_v9 = vsel %vm2936_vm15, %v2926_v21, %v5573_v35 }
 0x3b8   : > { %v5576_v7 = vpop.permute.xlu0 %5575  ;;  %v5581_v37 = vpop.permute.xlu1 %5580  ;;  %5100 = vmatmul.mubr.msk.f32.gmra.mxu0 %vm1975_vm14, %v8468_v19 }
 0x3b9   : > { %v5578_v33 = vunpack.i.h.bf16 %v5576_v7  ;;  %v5577_v16 = vunpack.i.l.bf16 %v5576_v7  ;;  %5102 = vmatprep.mubr.msk.f32.mxu0 %vm1975_vm14, %v8505_v58  ;;  %v5583_v4 = vunpack.i.h.bf16 %v5581_v37  ;;  %v5582_v42 = vunpack.i.l.bf16 %v5581_v37 }
 0x3bb   : > { %v3088_v8 = vsel %vm2969_vm0, %v3056_v60, %v5577_v16  ;;  %v2992_v19 = vsel %vm2969_vm0, %v2959_v9, %v5578_v33  ;;  %v3025_v59 = vsel %vm1975_vm14, %v8325_v31, %v5582_v42  ;;  %v2927_v29 = vsel %vm1975_vm14, %v5760_v15, %v5583_v4  ;;  %v5762_v33 = vld [vmem:[#allocation2 + $0x128] sm:$0xff] }
 0x3bc   : > { %v5586_v10 = vpop.permute.xlu0 %5585  ;;  %3379 = vmatprep.mubr.f32.mxu1 %v3088_v8  ;;  %v5591_v34 = vpop.permute.xlu1 %5590  ;;  %5103 = vmatmul.mubr.msk.f32.gmra.mxu0 %vm1975_vm14, %v8538_v47  ;;  %v2902_v31 = vrot.slane %v8674_v12, 2 }
 0x3bd   : > { %v5588_v57 = vunpack.i.h.bf16 %v5586_v10  ;;  %v5587_v58 = vunpack.i.l.bf16 %v5586_v10  ;;  %v5593_v39 = vunpack.i.h.bf16 %v5591_v34  ;;  %v5592_v26 = vunpack.i.l.bf16 %v5591_v34  ;;  %3380 = vmatmul.mubr.f32.gmra.mxu1 %v2992_v19  ;;  %5105 = vmatprep.mubr.msk.f32.mxu0 %vm1975_vm14, %v8588_v3 }
 0x3be   : > { %v2903_v43 = vsel %vm562_vm3, %v2900_v28, %v2902_v31  ;;  %vm4635_vm3 = vcmask 1043459  }
 0x3bf   : > { %v3057_v47 = vsel %vm2936_vm15, %v3025_v59, %v5587_v58  ;;  %v2960_v24 = vsel %vm2936_vm15, %v2927_v29, %v5588_v57 }
 0x3c0   : > { %v3089_v23 = vsel %vm2969_vm0, %v3057_v47, %v5592_v26  ;;  %5106 = vmatmul.mubr.msk.f32.gmra.mxu0 %vm1975_vm14, %v8615_v48  ;;  %v2993_v3 = vsel %vm2969_vm0, %v2960_v24, %v5593_v39  ;;  %v5596_v50 = vpop.permute.xlu0 %5595  ;;  %v5763_v26 = vld [vmem:[#allocation2 + $0x138] sm:$0xff] }
 0x3c1   : > { %3384 = vmatprep.mubr.f32.mxu1 %v3089_v23  ;;  %5108 = vmatprep.mubr.msk.f32.mxu0 %vm1975_vm14, %v8664_v11  ;;  %v5598_v48 = vunpack.i.h.bf16 %v5596_v50  ;;  %v5597_v36 = vunpack.i.l.bf16 %v5596_v50 }
 0x3c2   : > { %3385 = vmatmul.mubr.f32.gmra.mxu1 %v2993_v3 }
 0x3c3   : > { %v3026_v20 = vsel %vm1975_vm14, %v8382_v30, %v5597_v36 }
 0x3c4   : > { %5109 = vmatmul.mubr.msk.f32.gmra.mxu0 %vm1975_vm14, %v8688_v61  ;;  %v5761_v61 = vld [vmem:[#allocation2 + $0x120] sm:$0xff] }
 0x3c5   : > { %5111 = vmatprep.mubr.msk.f32.mxu0 %vm1975_vm14, %v2901_v41  ;;  %v2928_v6 = vsel %vm1975_vm14, %v5761_v61, %v5598_v48  ;;  %v5764_v48 = vld [vmem:[#allocation2 + $0x140] sm:$0xff] }
 0x3c8   : > { %v5601_v54 = vpop.permute.xlu1 %5600  ;;  %5112 = vmatmul.mubr.msk.f32.gmra.mxu0 %vm1975_vm14, %v2903_v43 }
 0x3c9   : > { %v5603_v17 = vunpack.i.h.bf16 %v5601_v54  ;;  %v5602_v11 = vunpack.i.l.bf16 %v5601_v54 }
 0x3cb   : > { %v5606_v52 = vpop.permute.xlu0 %5605  ;;  %v3058_v55 = vsel %vm2936_vm15, %v3026_v20, %v5602_v11  ;;  %v2961_v14 = vsel %vm2936_vm15, %v2928_v6, %v5603_v17 }
 0x3cc   : > { %v5608_v12 = vunpack.i.h.bf16 %v5606_v52  ;;  %v5607_v1 = vunpack.i.l.bf16 %v5606_v52  ;;  %v5611_v13 = vpop.permute.xlu1 %5610 }
 0x3cd   : > { %v5613_v5 = vunpack.i.h.bf16 %v5611_v13  ;;  %v5612_v45 = vunpack.i.l.bf16 %v5611_v13 }
 0x3ce   : > { %v3090_v46 = vsel %vm2969_vm0, %v3058_v55, %v5607_v1  ;;  %v2994_v49 = vsel %vm2969_vm0, %v2961_v14, %v5608_v12 }
 0x3cf   : > { %v5616_v22 = vpop.permute.xlu0 %5615  ;;  %3389 = vmatprep.mubr.f32.mxu1 %v3090_v46  ;;  %v3027_v37 = vsel %vm1975_vm14, %v8393_v25, %v5612_v45  ;;  %v2929_v16 = vsel %vm1975_vm14, %v5762_v33, %v5613_v5  ;;  %v5765_v46 = vld [vmem:[#allocation2 + $0x150] sm:$0xff] }
 0x3d0   : > { %v5618_v56 = vunpack.i.h.bf16 %v5616_v22  ;;  %v5617_v35 = vunpack.i.l.bf16 %v5616_v22  ;;  %v5621_v2 = vpop.permute.xlu1 %5620  ;;  %3390 = vmatmul.mubr.f32.gmra.mxu1 %v2994_v49 }
 0x3d1   : > { %v5623_v30 = vunpack.i.h.bf16 %v5621_v2  ;;  %v5622_v7 = vunpack.i.l.bf16 %v5621_v2 }
 0x3d2   : > { %v3059_v27 = vsel %vm2936_vm15, %v3027_v37, %v5617_v35  ;;  %v2962_v32 = vsel %vm2936_vm15, %v2929_v16, %v5618_v56 }
 0x3d3   : > { %v3091_v21 = vsel %vm2969_vm0, %v3059_v27, %v5622_v7  ;;  %v2995_v4 = vsel %vm2969_vm0, %v2962_v32, %v5623_v30  ;;  %v5626_v42 = vpop.permute.xlu0 %5625 }
 0x3d4   : > { %3394 = vmatprep.mubr.f32.mxu1 %v3091_v21  ;;  %v5628_v60 = vunpack.i.h.bf16 %v5626_v42  ;;  %v5627_v9 = vunpack.i.l.bf16 %v5626_v42 }
 0x3d5   : > { %3395 = vmatmul.mubr.f32.gmra.mxu1 %v2995_v4 }
 0x3d6   : > { %v3028_v39 = vsel %vm1975_vm14, %v8474_v0, %v5627_v9  ;;  %v2930_v59 = vsel %vm1975_vm14, %v5763_v26, %v5628_v60  ;;  %v5766_v60 = vld [vmem:[#allocation2 + $0x158] sm:$0xff] }
 0x3dc   : > { %v5631_v8 = vpop.permute.xlu1 %5630 }
 0x3dd   : > { %v5633_v19 = vunpack.i.h.bf16 %v5631_v8  ;;  %v5632_v10 = vunpack.i.l.bf16 %v5631_v8 }
 0x3df   : > { %v5636_v25 = vpop.permute.xlu0 %5635  ;;  %v3060_v38 = vsel %vm2936_vm15, %v3028_v39, %v5632_v10  ;;  %v2963_v28 = vsel %vm2936_vm15, %v2930_v59, %v5633_v19 }
 0x3e0   : > { %v5638_v34 = vunpack.i.h.bf16 %v5636_v25  ;;  %v5637_v57 = vunpack.i.l.bf16 %v5636_v25  ;;  %v5641_v58 = vpop.permute.xlu1 %5640 }
 0x3e1   : > { %v5643_v15 = vunpack.i.h.bf16 %v5641_v58  ;;  %v5642_v29 = vunpack.i.l.bf16 %v5641_v58 }
 0x3e2   : > { %v3092_v47 = vsel %vm2969_vm0, %v3060_v38, %v5637_v57  ;;  %v2996_v24 = vsel %vm2969_vm0, %v2963_v28, %v5638_v34 }
 0x3e3   : > { %v5646_v23 = vpop.permute.xlu0 %5645  ;;  %3399 = vmatprep.mubr.f32.mxu1 %v3092_v47  ;;  %v3029_v43 = vsel %vm1975_vm14, %v8488_v51, %v5642_v29  ;;  %v2931_v36 = vsel %vm1975_vm14, %v5764_v48, %v5643_v15 }
 0x3e4   : > { %v5648_v3 = vunpack.i.h.bf16 %v5646_v23  ;;  %v5647_v31 = vunpack.i.l.bf16 %v5646_v23  ;;  %v5651_v41 = vpop.permute.xlu1 %5650  ;;  %3400 = vmatmul.mubr.f32.gmra.mxu1 %v2996_v24 }
 0x3e5   : > { %v5653_v0 = vunpack.i.h.bf16 %v5651_v41  ;;  %v5652_v50 = vunpack.i.l.bf16 %v5651_v41 }
 0x3e6   : > { %v3061_v54 = vsel %vm2936_vm15, %v3029_v43, %v5647_v31  ;;  %v2964_v17 = vsel %vm2936_vm15, %v2931_v36, %v5648_v3 }
 0x3e7   : > { %v3093_v11 = vsel %vm2969_vm0, %v3061_v54, %v5652_v50  ;;  %v2997_v52 = vsel %vm2969_vm0, %v2964_v17, %v5653_v0  ;;  %v5656_v12 = vpop.permute.xlu0 %5655 }
 0x3e8   : > { %3404 = vmatprep.mubr.f32.mxu1 %v3093_v11  ;;  %v5658_v1 = vunpack.i.h.bf16 %v5656_v12  ;;  %v5657_v13 = vunpack.i.l.bf16 %v5656_v12 }
 0x3e9   : > { %3405 = vmatmul.mubr.f32.gmra.mxu1 %v2997_v52 }
 0x3ea   : > { %v3030_v14 = vsel %vm1975_vm14, %v8559_v63, %v5657_v13  ;;  %v2932_v49 = vsel %vm1975_vm14, %v5765_v46, %v5658_v1 }
 0x3f0   : > { %v5661_v20 = vpop.permute.xlu1 %5660 }
 0x3f1   : > { %v5663_v61 = vunpack.i.h.bf16 %v5661_v20  ;;  %v5662_v6 = vunpack.i.l.bf16 %v5661_v20 }
 0x3f3   : > { %v5666_v51 = vpop.permute.xlu0 %5665  ;;  %v3062_v35 = vsel %vm2936_vm15, %v3030_v14, %v5662_v6  ;;  %v2965_v2 = vsel %vm2936_vm15, %v2932_v49, %v5663_v61 }
 0x3f4   : > { %v5668_v5 = vunpack.i.h.bf16 %v5666_v51  ;;  %v5667_v45 = vunpack.i.l.bf16 %v5666_v51  ;;  %v5671_v55 = vpop.permute.xlu1 %5670 }
 0x3f5   : > { %v5673_v22 = vunpack.i.h.bf16 %v5671_v55  ;;  %v5672_v56 = vunpack.i.l.bf16 %v5671_v55 }
 0x3f6   : > { %v3094_v30 = vsel %vm2969_vm0, %v3062_v35, %v5667_v45  ;;  %v2998_v7 = vsel %vm2969_vm0, %v2965_v2, %v5668_v5 }
 0x3f7   : > { %v5676_v37 = vpop.permute.xlu0 %5675  ;;  %v8866_v33 = vpop.f32.mrf.mxu1  ;;  %3409 = vmatprep.mubr.f32.mxu1 %v3094_v30  ;;  %v3031_v42 = vsel %vm1975_vm14, %v8572_v18, %v5672_v56  ;;  %v2933_v9 = vsel %vm1975_vm14, %v5766_v60, %v5673_v22 }
 0x3f8   : > { %v5678_v16 = vunpack.i.h.bf16 %v5676_v37  ;;  %v5677_v27 = vunpack.i.l.bf16 %v5676_v37  ;;  %v5681_v63 = vpop.permute.xlu1 %5680  ;;  %3410 = vmatmul.mubr.f32.gmra.mxu1 %v2998_v7 }
 0x3f9   : > { %v5683_v32 = vunpack.i.h.bf16 %v5681_v63  ;;  %v5682_v21 = vunpack.i.l.bf16 %v5681_v63  ;;  %v3308_v4 = vpop.f32.mrf.mxu1 }
 0x3fa   : > { %v3063_v8 = vsel %vm2936_vm15, %v3031_v42, %v5677_v27  ;;  %v2966_v19 = vsel %vm2936_vm15, %v2933_v9, %v5678_v16  ;;  %v5842_v9 = vmov 1983009808  }
 0x3fb   : > { %v5686_v10 = vpop.permute.xlu0 %5685  ;;  %v3095_v25 = vsel %vm2969_vm0, %v3063_v8, %v5682_v21  ;;  %v2999_v34 = vsel %vm2969_vm0, %v2966_v19, %v5683_v32  ;;  %v3721_v8 = vunpack.c.l.s4 %v5842_v9  ;;  %v3723_v19 = vlaneseq }
 0x3fc   : > { %v5688_v57 = vunpack.i.h.bf16 %v5686_v10  ;;  %v5687_v58 = vunpack.i.l.bf16 %v5686_v10  ;;  %v5691_v39 = vpop.permute.xlu1 %5690  ;;  %3414 = vmatprep.mubr.f32.mxu1 %v3095_v25  ;;  %v8894_v10 = vld [vmem:[%s9243_s4] ss:$0 sm:$0xff] }
 0x3fd   : > { %v5693_v26 = vunpack.i.h.bf16 %v5691_v39  ;;  %v5692_v59 = vunpack.i.l.bf16 %v5691_v39  ;;  %3415 = vmatmul.mubr.f32.gmra.mxu1 %v2999_v34  ;;  %v3724_v39 = vshrl.u32 %v3723_v19, 7 }
 0x3fe   : > { %v3032_v18 = vsel %vm1975_vm14, %v8635_v62, %v5687_v58  ;;  %v2934_v15 = vsel %vm1975_vm14, %v8543_v53, %v5688_v57  ;;  %v3722_v58 = vunpack.c.0.s8 %v3721_v8 }
 0x3ff   : > { %v5696_v29 = vpop.permute.xlu0 %5695  ;;  %v3064_v3 = vsel %vm2936_vm15, %v3032_v18, %v5692_v59  ;;  %v2967_v31 = vsel %vm2936_vm15, %v2934_v15, %v5693_v26 }
 0x400   : > { %v5698_v38 = vunpack.i.h.bf16 %v5696_v29  ;;  %v5697_v28 = vunpack.i.l.bf16 %v5696_v29  ;;  %v5701_v47 = vpop.permute.xlu1 %5700 }
 0x401   : > { %v5703_v24 = vunpack.i.h.bf16 %v5701_v47  ;;  %v5702_v23 = vunpack.i.l.bf16 %v5701_v47 }
 0x402   : > { %v3096_v41 = vsel %vm2969_vm0, %v3064_v3, %v5697_v28  ;;  %v3000_v0 = vsel %vm2969_vm0, %v2967_v31, %v5698_v38 }
 0x403   : > { %v5706_v50 = vpop.permute.xlu0 %5705  ;;  %3419 = vmatprep.mubr.f32.mxu1 %v3096_v41  ;;  %v3033_v11 = vsel %vm1975_vm14, %v8652_v40, %v5702_v23  ;;  %v2935_v52 = vsel %vm1975_vm14, %v8545_v44, %v5703_v24  ;;  %v8900_v23 = vsub.s32 %v3722_v58, %v3724_v39 }
 0x404   : > { %v5708_v62 = vunpack.i.h.bf16 %v5706_v50  ;;  %v5707_v43 = vunpack.i.l.bf16 %v5706_v50  ;;  %v5711_v48 = vpop.permute.xlu1 %5710  ;;  %3420 = vmatmul.mubr.f32.gmra.mxu1 %v3000_v0  ;;  %v8902_v0 = vsub.s32 0, %v3724_v39 }
 0x405   : > { %v5713_v53 = vunpack.i.h.bf16 %v5711_v48  ;;  %v5712_v36 = vunpack.i.l.bf16 %v5711_v48  ;;  %v3271_v54 = vpop.f32.mrf.mxu0  ;;  %v3311_v17 = vpop.f32.mrf.mxu1 }
 0x406   : > { %v3065_v12 = vsel %vm2936_vm15, %v3033_v11, %v5707_v43  ;;  %v2968_v1 = vsel %vm2936_vm15, %v2935_v52, %v5708_v62  ;;  %v3272_v26 = vadd.f32 %v8894_v10, %v3271_v54  ;;  %v3307_v62 = vadd.f32 %v8894_v10, %v8866_v33 }
 0x407   : > { %v3273_v13 = vpop.f32.mrf.mxu0  ;;  %v3313_v20 = vpop.f32.mrf.mxu1  ;;  %v3097_v61 = vsel %vm2969_vm0, %v3065_v12, %v5712_v36  ;;  %v3001_v6 = vsel %vm2969_vm0, %v2968_v1, %v5713_v53  ;;  %v8907_v43 = vadd.f32 %v8894_v10, %v3311_v17 }
 0x408   : > { %3424 = vmatprep.mubr.f32.mxu1 %v3097_v61 }
 0x409   : > { %3425 = vmatmul.mubr.f32.gmra.mxu1 %v3001_v6 }
 0x410   : > { %v3276_v51 = vpop.f32.mrf.mxu0  ;;  %v3316_v5 = vpop.f32.mrf.mxu1 }
 0x411   : > { %v3277_v34 = vadd.f32 %v8894_v10, %v3276_v51  ;;  %v8910_v48 = vadd.f32 %v8894_v10, %v3316_v5 }
 0x412   : > { %v3278_v45 = vpop.f32.mrf.mxu0  ;;  %v3318_v55 = vpop.f32.mrf.mxu1 }
 0x41c   : > { %v3281_v40 = vpop.f32.mrf.mxu0  ;;  %v3321_v14 = vpop.f32.mrf.mxu1 }
 0x41d   : > { %v3282_v38 = vadd.f32 %v8894_v10, %v3281_v40  ;;  %v8914_v54 = vadd.f32 %v8894_v10, %v3321_v14 }
 0x41e   : > { %v3283_v46 = vpop.f32.mrf.mxu0  ;;  %v3323_v44 = vpop.f32.mrf.mxu1 }
 0x425   : > { %v3286_v49 = vpop.f32.mrf.mxu0  ;;  %v3326_v22 = vpop.f32.mrf.mxu1 }
 0x426   : > { %v3287_v59 = vadd.f32 %v8894_v10, %v3286_v49  ;;  %v8917_v13 = vadd.f32 %v8894_v10, %v3326_v22 }
 0x427   : > { %v3288_v56 = vpop.f32.mrf.mxu0  ;;  %v3328_v35 = vpop.f32.mrf.mxu1 }
 0x431   : > { %v3291_v2 = vpop.f32.mrf.mxu0 }
 0x432   : > { %v3331_v30 = vpop.f32.mrf.mxu1  ;;  %v3292_v33 = vadd.f32 %v8894_v10, %v3291_v2 }
 0x433   : > { %v3293_v7 = vpop.f32.mrf.mxu0  ;;  %v8921_v17 = vadd.f32 %v8894_v10, %v3331_v30 }
 0x434   : > { %v3333_v37 = vpop.f32.mrf.mxu1 }
 0x43c   : > { %v3296_v16 = vpop.f32.mrf.mxu0  ;;  %v3336_v27 = vpop.f32.mrf.mxu1 }
 0x43d   : > { %v3297_v53 = vadd.f32 %v8894_v10, %v3296_v16  ;;  %v8924_v6 = vadd.f32 %v8894_v10, %v3336_v27 }
 0x43e   : > { %v3298_v63 = vpop.f32.mrf.mxu0  ;;  %v3338_v32 = vpop.f32.mrf.mxu1 }
 0x448   : > { %v3301_v21 = vpop.f32.mrf.mxu0  ;;  %v3341_v4 = vpop.f32.mrf.mxu1 }
 0x449   : > { %v3302_v40 = vadd.f32 %v8894_v10, %v3301_v21  ;;  %v8929_v14 = vadd.f32 %v8894_v10, %v3341_v4 }
 0x44a   : > { %v3303_v42 = vpop.f32.mrf.mxu0  ;;  %v3343_v60 = vpop.f32.mrf.mxu1 }
 0x44c   : > { %v5068_v25 = vpop.f32.mrf.mxu0 }
 0x44d   : > { %v3502_v18 = vadd.f32 %v5068_v25, %v3277_v34 }
 0x44e   : > { %v3496_v57 = vpop.f32.mrf.mxu0 }
 0x44f   : > { %v3346_v15 = vpop.f32.mrf.mxu1  ;;  %v3497_v28 = vadd.f32 %v3496_v57, %v3272_v26  ;;  %v3656_v31 = vmax.f32 %v3502_v18, 0.0 }
 0x450   : > { %v5071_v29 = vpop.f32.mrf.mxu0  ;;  %v8932_v46 = vadd.f32 %v8894_v10, %v3346_v15 }
 0x451   : > { %v3348_v47 = vpop.f32.mrf.mxu1  ;;  %v3512_v24 = vadd.f32 %v5071_v29, %v3287_v59  ;;  %v3655_v11 = vmax.f32 %v3497_v28, 0.0 }
 0x452   : > { %v3506_v3 = vpop.f32.mrf.mxu0 }
 0x453   : > { %v3658_v41 = vmax.f32 %v3512_v24, 0.0  ;;  %v3507_v50 = vadd.f32 %v3506_v3, %v3282_v38 }
 0x454   : > { %v5074_v36 = vpop.f32.mrf.mxu0 }
 0x455   : > { %v3688_v52 = vmax.f32 %v3656_v31, %v3658_v41  ;;  %v3657_v12 = vmax.f32 %v3507_v50, 0.0  ;;  %v3351_v1 = vpop.f32.mrf.mxu1  ;;  %v3522_v20 = vadd.f32 %v5074_v36, %v3297_v53 }
 0x456   : > { %v3516_v61 = vpop.f32.mrf.mxu0  ;;  %v8939_v37 = vadd.f32 %v8894_v10, %v3351_v1 }
 0x457   : > { %v3736_v51 = vcombine.high %v3688_v52, %v3688_v52  ;;  %v3743_v5 = vrot.slane %v3688_v52, %v8900_v23  ;;  %v3687_v45 = vmax.f32 %v3655_v11, %v3657_v12  ;;  %v3353_v55 = vpop.f32.mrf.mxu1  ;;  %v8934_v44 = vadd.f32 %v3516_v61, %v3292_v33 }
 0x458   : > { %v5077_v49 = vpop.f32.mrf.mxu0  ;;  %v3660_v7 = vmax.f32 %v3522_v20, 0.0 }
 0x459   : > { %v3750_v22 = vrot.slane %v3736_v51, %v8900_v23  ;;  %v3751_v56 = vcombine.high %v3743_v5, %v3743_v5  ;;  %v4864_v35 = vrot.slane %v3743_v5, 9  ;;  %v3719_v2 = vcombine.high %v3687_v45, %v3687_v45 }
 0x45a   : > { %v3726_v30 = vrot.slane %v3687_v45, %v8900_v23  ;;  %v3532_v16 = vadd.f32 %v5077_v49, %v3307_v62  ;;  %v3356_v27 = vpop.f32.mrf.mxu1  ;;  %v3526_v63 = vpop.f32.mrf.mxu0  ;;  %v3659_v26 = vmax.f32 %v8934_v44, 0.0 }
 0x45b   : > { %v3752_v32 = vcombine.high %v3750_v22, %v3750_v22  ;;  %v4865_v21 = vrot.slane %v3751_v56, 9  ;;  %v4866_v4 = vrot.slane %v3750_v22, 9  ;;  %v4251_v42 = vmax.f32 %v3743_v5, %v4864_v35 }
 0x45c   : > { %v3733_v60 = vrot.slane %v3719_v2, %v8900_v23  ;;  %v3734_v9 = vcombine.high %v3726_v30, %v3726_v30  ;;  %v4860_v8 = vrot.slane %v3726_v30, 9  ;;  %v3662_v19 = vmax.f32 %v3532_v16, 0.0  ;;  %v3358_v25 = vpop.f32.mrf.mxu1  ;;  %v5080_v34 = vpop.f32.mrf.mxu0 }
 0x45d   : > { %v4867_v57 = vrot.slane %v3752_v32, 9  ;;  %v4252_v58 = vmax.f32 %v3751_v56, %v4865_v21  ;;  %v4253_v39 = vmax.f32 %v3750_v22, %v4866_v4  ;;  %v4394_v47 = vrot.slane %v4251_v42, %v8902_v0 }
 0x45e   : > { %v3735_v59 = vcombine.high %v3733_v60, %v3733_v60  ;;  %v4861_v18 = vrot.slane %v3734_v9, 9  ;;  %v4862_v15 = vrot.slane %v3733_v60, 9  ;;  %v4247_v29 = vmax.f32 %v3726_v30, %v4860_v8  ;;  %v3536_v38 = vpop.f32.mrf.mxu0 }
 0x45f   : > { %v4254_v28 = vmax.f32 %v3752_v32, %v4867_v57  ;;  %v4398_v24 = vrot.slane %v4252_v58, %v8902_v0  ;;  %v3690_v3 = vmax.f32 %v3660_v7, %v3662_v19  ;;  %v4402_v31 = vrot.slane %v4253_v39, %v8902_v0 }
 0x460   : > { %v4863_v41 = vrot.slane %v3735_v59, 9  ;;  %v4248_v50 = vmax.f32 %v3734_v9, %v4861_v18  ;;  %v4249_v62 = vmax.f32 %v3733_v60, %v4862_v15  ;;  %v5083_v53 = vpop.f32.mrf.mxu0  ;;  %v4378_v11 = vrot.slane %v4247_v29, %v8902_v0 }
 0x461   : > { %v4406_v36 = vrot.slane %v4254_v28, %v8902_v0  ;;  %v3770_v52 = vcombine.high %v3690_v3, %v3690_v3  ;;  %v3777_v12 = vrot.slane %v3690_v3, %v8900_v23  ;;  %v3361_v1 = vpop.f32.mrf.mxu1  ;;  %v3527_v51 = vadd.f32 %v3526_v63, %v3302_v40 }
 0x462   : > { %v4250_v33 = vmax.f32 %v3735_v59, %v4863_v41  ;;  %v4382_v20 = vrot.slane %v4248_v50, %v8902_v0  ;;  %v4386_v61 = vrot.slane %v4249_v62, %v8902_v0  ;;  %v3546_v5 = vpop.f32.mrf.mxu0  ;;  %v8953_v49 = vadd.f32 %v8894_v10, %v3356_v27 }
 0x463   : > { %v3784_v45 = vrot.slane %v3770_v52, %v8900_v23  ;;  %v3785_v55 = vcombine.high %v3777_v12, %v3777_v12  ;;  %v4872_v44 = vrot.slane %v3777_v12, 9  ;;  %v3363_v22 = vpop.f32.mrf.mxu1  ;;  %v3661_v2 = vmax.f32 %v3527_v51, 0.0 }
 0x464   : > { %v4390_v56 = vrot.slane %v4250_v33, %v8902_v0  ;;  %v4632_v35 = vsel %vm4631_vm1, %v4382_v20, %v4378_v11  ;;  %v3542_v30 = vadd.f32 %v5080_v34, %v8910_v48  ;;  %v5086_v7 = vpop.f32.mrf.mxu0  ;;  %v3537_v42 = vadd.f32 %v3536_v38, %v8907_v43 }
 0x465   : > { %v4634_v16 = vsel %vm4633_vm2, %v4386_v61, %v4632_v35  ;;  %v3786_v40 = vcombine.high %v3784_v45, %v3784_v45  ;;  %v4873_v63 = vrot.slane %v3785_v55, 9  ;;  %v4874_v32 = vrot.slane %v3784_v45, 9 }
 0x466   : > { %v4636_v21 = vsel %vm4635_vm3, %v4390_v56, %v4634_v16  ;;  %v8960_v4 = vmax.f32 %v3777_v12, %v4872_v44  ;;  %v3689_v27 = vmax.f32 %v3659_v26, %v3661_v2  ;;  %v3366_v60 = vpop.f32.mrf.mxu1  ;;  %v3556_v9 = vpop.f32.mrf.mxu0  ;;  %v3664_v39 = vmax.f32 %v3542_v30, 0.0 }
 0x467   : > { %v4638_v8 = vsel %vm4637_vm4, %v4394_v47, %v4636_v21  ;;  %v4875_v19 = vrot.slane %v3786_v40, 9  ;;  %v8964_v25 = vmax.f32 %v3785_v55, %v4873_v63  ;;  %v8966_v48 = vmax.f32 %v3784_v45, %v4874_v32 }
 0x468   : > { %v4640_v34 = vsel %vm4639_vm5, %v4398_v24, %v4638_v8  ;;  %v3753_v57 = vcombine.high %v3689_v27, %v3689_v27  ;;  %v3760_v58 = vrot.slane %v3689_v27, %v8900_v23  ;;  %v3368_v59 = vpop.f32.mrf.mxu1  ;;  %v5089_v26 = vpop.f32.mrf.mxu0  ;;  %v4426_v15 = vrot.slane %v8960_v4, %v8902_v0 }
 0x469   : > { %v4642_v43 = vsel %vm4641_vm6, %v4402_v31, %v4640_v34  ;;  %v8971_v18 = vmax.f32 %v3786_v40, %v4875_v19  ;;  %v4430_v29 = vrot.slane %v8964_v25, %v8902_v0  ;;  %v4434_v3 = vrot.slane %v8966_v48, %v8902_v0 }
 0x46a   : > { %v4644_v38 = vsel %vm4643_vm7, %v4406_v36, %v4642_v43  ;;  %v3767_v28 = vrot.slane %v3753_v57, %v8900_v23  ;;  %v3768_v47 = vcombine.high %v3760_v58, %v3760_v58  ;;  %v4868_v24 = vrot.slane %v3760_v58, 9  ;;  %v3566_v62 = vpop.f32.mrf.mxu0 }
 0x46b   : > { %4702 = vst.msk [vmem:[%s5934_s12] sm:$0xff] %vm1975_vm14, %v4644_v38  ;;  %v4438_v31 = vrot.slane %v8971_v18, %v8902_v0  ;;  %v3663_v41 = vmax.f32 %v3537_v42, 0.0  ;;  %v3552_v50 = vadd.f32 %v5083_v53, %v8917_v13  ;;  %v8987_v20 = vadd.f32 %v8894_v10, %v3361_v1 }
 0x46c   : > { %v3769_v11 = vcombine.high %v3767_v28, %v3767_v28  ;;  %v4869_v52 = vrot.slane %v3768_v47, 9  ;;  %v4870_v12 = vrot.slane %v3767_v28, 9  ;;  %v4255_v36 = vmax.f32 %v3760_v58, %v4868_v24  ;;  %v8997_v30 = vpop.f32.mrf.mxu0 }
 0x46d   : > { %v3666_v33 = vmax.f32 %v3552_v50, 0.0  ;;  %v3547_v61 = vadd.f32 %v3546_v5, %v8914_v54  ;;  %v3562_v51 = vadd.f32 %v5086_v7, %v8924_v6  ;;  %v8991_v45 = vpop.f32.mrf.mxu1  ;;  %v8994_v13 = vadd.f32 %v8894_v10, %v3366_v60 }
 0x46e   : > { %v4871_v55 = vrot.slane %v3769_v11, 9  ;;  %v4256_v44 = vmax.f32 %v3768_v47, %v4869_v52  ;;  %v4257_v22 = vmax.f32 %v3767_v28, %v4870_v12  ;;  %v4410_v53 = vrot.slane %v4255_v36, %v8902_v0  ;;  %v9011_v48 = vpop.f32.mrf.mxu0 }
 0x46f   : > { %v3692_v56 = vmax.f32 %v3664_v39, %v3666_v33  ;;  %v3665_v35 = vmax.f32 %v3547_v61, 0.0  ;;  %v3668_v2 = vmax.f32 %v3562_v51, 0.0  ;;  %v3373_v1 = vpop.f32.mrf.mxu1  ;;  %v3572_v5 = vadd.f32 %v5089_v26, %v8932_v46 }
 0x470   : > { %v4258_v16 = vmax.f32 %v3769_v11, %v4871_v55  ;;  %v4414_v54 = vrot.slane %v4256_v44, %v8902_v0  ;;  %v4418_v6 = vrot.slane %v4257_v22, %v8902_v0  ;;  %v3557_v32 = vadd.f32 %v3556_v9, %v8921_v17 }
 0x471   : > { %v3804_v7 = vcombine.high %v3692_v56, %v3692_v56  ;;  %v3811_v40 = vrot.slane %v3692_v56, %v8900_v23  ;;  %v3691_v63 = vmax.f32 %v3663_v41, %v3665_v35  ;;  %v3670_v27 = vmax.f32 %v3572_v5, 0.0 }
 0x472   : > { %v4422_v21 = vrot.slane %v4258_v16, %v8902_v0  ;;  %v4645_v4 = vsel %vm4631_vm1, %v4414_v54, %v4410_v53  ;;  %v3567_v42 = vadd.f32 %v3566_v62, %v8929_v14  ;;  %v9007_v60 = vpop.f32.mrf.mxu1  ;;  %v9019_v62 = vpop.f32.mrf.mxu0  ;;  %v3667_v12 = vmax.f32 %v3557_v32, 0.0 }
 0x473   : > { %v4646_v8 = vsel %vm4633_vm2, %v4418_v6, %v4645_v4  ;;  %v3818_v19 = vrot.slane %v3804_v7, %v8900_v23  ;;  %v3819_v46 = vcombine.high %v3811_v40, %v3811_v40  ;;  %v4880_v25 = vrot.slane %v3811_v40, 9 }
 0x474   : > { %v4647_v34 = vsel %vm4635_vm3, %v4422_v21, %v4646_v8  ;;  %v3787_v17 = vcombine.high %v3691_v63, %v3691_v63  ;;  %v3794_v9 = vrot.slane %v3691_v63, %v8900_v23  ;;  %v3694_v57 = vmax.f32 %v3668_v2, %v3670_v27  ;;  %v3378_v58 = vpop.f32.mrf.mxu1  ;;  %v9028_v35 = vpop.f32.mrf.mxu0 }
 0x475   : > { %v4648_v39 = vsel %vm4637_vm4, %v4426_v15, %v4647_v34  ;;  %v3820_v14 = vcombine.high %v3818_v19, %v3818_v19  ;;  %v4881_v59 = vrot.slane %v3819_v46, 9  ;;  %v4882_v26 = vrot.slane %v3818_v19, 9 }
 0x476   : > { %v4649_v43 = vsel %vm4639_vm5, %v4430_v29, %v4648_v39  ;;  %v4267_v18 = vmax.f32 %v3811_v40, %v4880_v25  ;;  %v3801_v38 = vrot.slane %v3787_v17, %v8900_v23  ;;  %v3802_v28 = vcombine.high %v3794_v9, %v3794_v9  ;;  %v5098_v25 = vpop.f32.mrf.mxu0 }
 0x477   : > { %v4650_v47 = vsel %vm4641_vm6, %v4434_v3, %v4649_v43  ;;  %v4883_v24 = vrot.slane %v3820_v14, 9  ;;  %v4268_v41 = vmax.f32 %v3819_v46, %v4881_v59  ;;  %v4269_v50 = vmax.f32 %v3818_v19, %v4882_v26 }
 0x478   : > { %v4651_v11 = vsel %vm4643_vm7, %v4438_v31, %v4650_v47  ;;  %v3803_v15 = vcombine.high %v3801_v38, %v3801_v38  ;;  %v4876_v52 = vrot.slane %v3794_v9, 9  ;;  %v4458_v29 = vrot.slane %v4267_v18, %v8902_v0 }
 0x479   : > { %4703 = vst.msk [vmem:[%s5934_s12 + $0x8] sm:$0xff] %vm1975_vm14, %v4651_v11  ;;  %v4270_v36 = vmax.f32 %v3820_v14, %v4883_v24  ;;  %v4462_v33 = vrot.slane %v4268_v41, %v8902_v0  ;;  %v4877_v61 = vrot.slane %v3802_v28, 9  ;;  %v4878_v51 = vrot.slane %v3801_v38, 9 }
 0x47a   : > { %v4879_v3 = vrot.slane %v3803_v15, 9  ;;  %v4263_v55 = vmax.f32 %v3794_v9, %v4876_v52  ;;  %v3838_v44 = vcombine.high %v3694_v57, %v3694_v57  ;;  %v4466_v22 = vrot.slane %v4269_v50, %v8902_v0 }
 0x47b   : > { %v4264_v53 = vmax.f32 %v3802_v28, %v4877_v61  ;;  %v3845_v31 = vrot.slane %v3694_v57, %v8900_v23  ;;  %v3669_v56 = vmax.f32 %v3567_v42, 0.0  ;;  %v4265_v2 = vmax.f32 %v3801_v38, %v4878_v51 }
 0x47c   : > { %v4266_v1 = vmax.f32 %v3803_v15, %v4879_v3  ;;  %v4442_v16 = vrot.slane %v4263_v55, %v8902_v0  ;;  %v3852_v54 = vrot.slane %v3838_v44, %v8900_v23  ;;  %v4470_v39 = vrot.slane %v4270_v36, %v8902_v0  ;;  %v3596_v15 = vpop.f32.mrf.mxu0 }
 0x47d   : > { %v4446_v6 = vrot.slane %v4264_v53, %v8902_v0  ;;  %v3853_v5 = vcombine.high %v3845_v31, %v3845_v31  ;;  %v4888_v7 = vrot.slane %v3845_v31, 9  ;;  %v3693_v40 = vmax.f32 %v3667_v12, %v3669_v56  ;;  %v3381_v63 = vpop.f32.mrf.mxu1 }
 0x47e   : > { %v4450_v32 = vrot.slane %v4265_v2, %v8902_v0  ;;  %v4454_v21 = vrot.slane %v4266_v1, %v8902_v0  ;;  %v3854_v4 = vcombine.high %v3852_v54, %v3852_v54  ;;  %v4890_v27 = vrot.slane %v3852_v54, 9 }
 0x47f   : > { %v4652_v42 = vsel %vm4631_vm1, %v4446_v6, %v4442_v16  ;;  %v4889_v8 = vrot.slane %v3853_v5, 9  ;;  %v9036_v19 = vmax.f32 %v3845_v31, %v4888_v7  ;;  %v3821_v46 = vcombine.high %v3693_v40, %v3693_v40  ;;  %v3383_v34 = vpop.f32.mrf.mxu1 }
 0x480   : > { %v4653_v17 = vsel %vm4633_vm2, %v4450_v32, %v4652_v42  ;;  %v4891_v9 = vrot.slane %v3854_v4, 9  ;;  %v9039_v57 = vmax.f32 %v3852_v54, %v4890_v27  ;;  %v3828_v58 = vrot.slane %v3693_v40, %v8900_v23 }
 0x481   : > { %v4654_v14 = vsel %vm4635_vm3, %v4454_v21, %v4653_v17  ;;  %v4276_v59 = vmax.f32 %v3853_v5, %v4889_v8  ;;  %v3835_v26 = vrot.slane %v3821_v46, %v8900_v23  ;;  %v4490_v38 = vrot.slane %v9036_v19, %v8902_v0 }
 0x482   : > { %v4655_v43 = vsel %vm4637_vm4, %v4458_v29, %v4654_v14  ;;  %v9046_v18 = vmax.f32 %v3854_v4, %v4891_v9  ;;  %v3836_v28 = vcombine.high %v3828_v58, %v3828_v58  ;;  %v3386_v47 = vpop.f32.mrf.mxu1  ;;  %v4498_v41 = vrot.slane %v9039_v57, %v8902_v0 }
 0x483   : > { %v4656_v24 = vsel %vm4639_vm5, %v4462_v33, %v4655_v43  ;;  %v3837_v50 = vcombine.high %v3835_v26, %v3835_v26  ;;  %v4884_v11 = vrot.slane %v3828_v58, 9  ;;  %v4494_v12 = vrot.slane %v4276_v59, %v8902_v0 }
 0x484   : > { %v4657_v52 = vsel %vm4641_vm6, %v4466_v22, %v4656_v24  ;;  %v4885_v36 = vrot.slane %v3836_v28, 9  ;;  %v4886_v29 = vrot.slane %v3835_v26, 9  ;;  %v3388_v61 = vpop.f32.mrf.mxu1  ;;  %v3582_v33 = vadd.f32 %v8997_v30, %v8953_v49  ;;  %v5101_v49 = vpop.f32.mrf.mxu0 }
 0x485   : > { %v4658_v51 = vsel %vm4643_vm7, %v4470_v39, %v4657_v52  ;;  %v4887_v3 = vrot.slane %v3837_v50, 9  ;;  %v4271_v55 = vmax.f32 %v3828_v58, %v4884_v11  ;;  %v4502_v44 = vrot.slane %v9046_v18, %v8902_v0 }
 0x486   : > { %4704 = vst.msk [vmem:[%s5934_s12 + $0x10] sm:$0xff] %vm1975_vm14, %v4658_v51  ;;  %v4272_v53 = vmax.f32 %v3836_v28, %v4885_v36  ;;  %v4273_v31 = vmax.f32 %v3835_v26, %v4886_v29  ;;  %v3372_v22 = vadd.f32 %v8894_v10, %v8991_v45  ;;  %v3577_v1 = vadd.f32 %v9011_v48, %v8939_v37  ;;  %v3606_v42 = vpop.f32.mrf.mxu0 }
 0x487   : > { %v4274_v56 = vmax.f32 %v3837_v50, %v4887_v3  ;;  %v4474_v2 = vrot.slane %v4271_v55, %v8902_v0  ;;  %v3592_v16 = vadd.f32 %v9019_v62, %v8994_v13  ;;  %v3672_v6 = vmax.f32 %v3582_v33, 0.0 }
 0x488   : > { %v4478_v30 = vrot.slane %v4272_v53, %v8902_v0  ;;  %v4482_v54 = vrot.slane %v4273_v31, %v8902_v0  ;;  %v3377_v5 = vadd.f32 %v8894_v10, %v9007_v60  ;;  %v3587_v40 = vadd.f32 %v9028_v35, %v8987_v20 }
 0x489   : > { %v4486_v45 = vrot.slane %v4274_v56, %v8902_v0  ;;  %v3674_v7 = vmax.f32 %v3592_v16, 0.0  ;;  %v3597_v32 = vadd.f32 %v3596_v15, %v3372_v22  ;;  %v3382_v13 = vadd.f32 %v8894_v10, %v3381_v63 }
 0x48a   : > { %v4659_v37 = vsel %vm4631_vm1, %v4478_v30, %v4474_v2  ;;  %v9077_v48 = vadd.f32 %v5098_v25, %v3377_v5  ;;  %v3387_v62 = vadd.f32 %v8894_v10, %v3386_v47  ;;  %v3671_v4 = vmax.f32 %v3577_v1, 0.0 }
 0x48b   : > { %v4660_v21 = vsel %vm4633_vm2, %v4482_v54, %v4659_v37  ;;  %v3696_v27 = vmax.f32 %v3672_v6, %v3674_v7  ;;  %v3673_v60 = vmax.f32 %v3587_v40, 0.0  ;;  %v3675_v19 = vmax.f32 %v3597_v32, 0.0 }
 0x48c   : > { %v4661_v8 = vsel %vm4635_vm3, %v4486_v45, %v4660_v21  ;;  %v3607_v46 = vadd.f32 %v3606_v42, %v3382_v13  ;;  %v3612_v20 = vadd.f32 %v5101_v49, %v3387_v62  ;;  %v3676_v9 = vmax.f32 %v9077_v48, 0.0 }
 0x48d   : > { %v4662_v35 = vsel %vm4637_vm4, %v4490_v38, %v4661_v8  ;;  %v3872_v34 = vcombine.high %v3696_v27, %v3696_v27  ;;  %v3879_v25 = vrot.slane %v3696_v27, %v8900_v23  ;;  %v3695_v63 = vmax.f32 %v3671_v4, %v3673_v60 }
 0x48e   : > { %v4663_v17 = vsel %vm4639_vm5, %v4494_v12, %v4662_v35  ;;  %v3677_v57 = vmax.f32 %v3607_v46, 0.0  ;;  %v3678_v58 = vmax.f32 %v3612_v20, 0.0 }
 0x48f   : > { %v4664_v39 = vsel %vm4641_vm6, %v4498_v41, %v4663_v17  ;;  %v3886_v14 = vrot.slane %v3872_v34, %v8900_v23  ;;  %v3887_v59 = vcombine.high %v3879_v25, %v3879_v25  ;;  %v4896_v26 = vrot.slane %v3879_v25, 9 }
 0x490   : > { %v4665_v43 = vsel %vm4643_vm7, %v4502_v44, %v4664_v39  ;;  %v3855_v18 = vcombine.high %v3695_v63, %v3695_v63  ;;  %v3862_v38 = vrot.slane %v3695_v63, %v8900_v23  ;;  %v3697_v28 = vmax.f32 %v3675_v19, %v3677_v57  ;;  %v9091_v47 = vpop.f32.mrf.mxu1  ;;  %v5104_v19 = vpop.f32.mrf.mxu0 }
 0x491   : > { %4705 = vst.msk [vmem:[%s5934_s12 + $0x18] sm:$0xff] %vm1975_vm14, %v4665_v43  ;;  %v3888_v24 = vcombine.high %v3886_v14, %v3886_v14  ;;  %v4897_v50 = vrot.slane %v3887_v59, 9  ;;  %v4898_v11 = vrot.slane %v3886_v14, 9  ;;  %v4283_v15 = vmax.f32 %v3879_v25, %v4896_v26 }
 0x492   : > { %v3869_v41 = vrot.slane %v3855_v18, %v8900_v23  ;;  %v3870_v52 = vcombine.high %v3862_v38, %v3862_v38  ;;  %v4892_v12 = vrot.slane %v3862_v38, 9  ;;  %v3889_v36 = vcombine.high %v3697_v28, %v3697_v28  ;;  %v3393_v29 = vpop.f32.mrf.mxu1  ;;  %v3616_v18 = vpop.f32.mrf.mxu0 }
 0x493   : > { %v4899_v61 = vrot.slane %v3888_v24, 9  ;;  %v4284_v51 = vmax.f32 %v3887_v59, %v4897_v50  ;;  %v4285_v3 = vmax.f32 %v3886_v14, %v4898_v11  ;;  %v4522_v55 = vrot.slane %v4283_v15, %v8902_v0 }
 0x494   : > { %v3871_v33 = vcombine.high %v3869_v41, %v3869_v41  ;;  %v4893_v44 = vrot.slane %v3870_v52, 9  ;;  %v4894_v53 = vrot.slane %v3869_v41, 9  ;;  %v4279_v31 = vmax.f32 %v3862_v38, %v4892_v12 }
 0x495   : > { %v4286_v22 = vmax.f32 %v3888_v24, %v4899_v61  ;;  %v4526_v56 = vrot.slane %v4284_v51, %v8902_v0  ;;  %v4530_v2 = vrot.slane %v4285_v3, %v8902_v0  ;;  %v3896_v1 = vrot.slane %v3697_v28, %v8900_v23  ;;  %v9100_v16 = vpop.f32.mrf.mxu1 }
 0x496   : > { %v4895_v49 = vrot.slane %v3871_v33, 9  ;;  %v4280_v30 = vmax.f32 %v3870_v52, %v4893_v44  ;;  %v4281_v54 = vmax.f32 %v3869_v41, %v4894_v53  ;;  %v4506_v6 = vrot.slane %v4279_v31, %v8902_v0 }
 0x497   : > { %v4534_v5 = vrot.slane %v4286_v22, %v8902_v0  ;;  %v3903_v45 = vrot.slane %v3889_v36, %v8900_v23  ;;  %v3904_v7 = vcombine.high %v3896_v1, %v3896_v1  ;;  %v4900_v40 = vrot.slane %v3896_v1, 9  ;;  %v3398_v32 = vpop.f32.mrf.mxu1 }
 0x498   : > { %v4282_v37 = vmax.f32 %v3871_v33, %v4895_v49  ;;  %v4510_v48 = vrot.slane %v4280_v30, %v8902_v0  ;;  %v4514_v13 = vrot.slane %v4281_v54, %v8902_v0  ;;  %v3698_v62 = vmax.f32 %v3676_v9, %v3678_v58  ;;  %v5107_v33 = vpop.f32.mrf.mxu0 }
 0x499   : > { %v3905_v21 = vcombine.high %v3903_v45, %v3903_v45  ;;  %v4901_v4 = vrot.slane %v3904_v7, 9  ;;  %v4902_v27 = vrot.slane %v3903_v45, 9  ;;  %v4287_v60 = vmax.f32 %v3896_v1, %v4900_v40 }
 0x49a   : > { %v4518_v42 = vrot.slane %v4282_v37, %v8902_v0  ;;  %v4666_v8 = vsel %vm4631_vm1, %v4510_v48, %v4506_v6  ;;  %v3906_v46 = vcombine.high %v3698_v62, %v3698_v62  ;;  %v3913_v20 = vrot.slane %v3698_v62, %v8900_v23  ;;  %v3626_v6 = vpop.f32.mrf.mxu0 }
 0x49b   : > { %v4667_v35 = vsel %vm4633_vm2, %v4514_v13, %v4666_v8  ;;  %v4903_v34 = vrot.slane %v3905_v21, 9  ;;  %v4288_v25 = vmax.f32 %v3904_v7, %v4901_v4  ;;  %v4289_v63 = vmax.f32 %v3903_v45, %v4902_v27 }
 0x49c   : > { %v4668_v17 = vsel %vm4635_vm3, %v4518_v42, %v4667_v35  ;;  %v4538_v9 = vrot.slane %v4287_v60, %v8902_v0  ;;  %v3920_v57 = vrot.slane %v3906_v46, %v8900_v23  ;;  %v3921_v58 = vcombine.high %v3913_v20, %v3913_v20 }
 0x49d   : > { %v4669_v39 = vsel %vm4637_vm4, %v4522_v55, %v4668_v17  ;;  %v4290_v14 = vmax.f32 %v3905_v21, %v4903_v34  ;;  %v4542_v59 = vrot.slane %v4288_v25, %v8902_v0  ;;  %v4546_v26 = vrot.slane %v4289_v63, %v8902_v0 }
 0x49e   : > { %v4670_v43 = vsel %vm4639_vm5, %v4526_v56, %v4669_v39  ;;  %v3922_v38 = vcombine.high %v3920_v57, %v3920_v57  ;;  %v4904_v28 = vrot.slane %v3913_v20, 9  ;;  %v4905_v24 = vrot.slane %v3921_v58, 9 }
 0x49f   : > { %v4671_v50 = vsel %vm4641_vm6, %v4530_v2, %v4670_v43  ;;  %v4550_v11 = vrot.slane %v4290_v14, %v8902_v0  ;;  %v4673_v15 = vsel %vm4631_vm1, %v4542_v59, %v4538_v9  ;;  %v4906_v41 = vrot.slane %v3920_v57, 9 }
 0x4a0   : > { %v4672_v52 = vsel %vm4643_vm7, %v4534_v5, %v4671_v50  ;;  %v4674_v12 = vsel %vm4633_vm2, %v4546_v26, %v4673_v15  ;;  %v4907_v36 = vrot.slane %v3922_v38, 9  ;;  %v4291_v29 = vmax.f32 %v3913_v20, %v4904_v28 }
 0x4a1   : > { %4706 = vst.msk [vmem:[%s5934_s12 + $0x20] sm:$0xff] %vm1975_vm14, %v4672_v52  ;;  %v4292_v61 = vmax.f32 %v3921_v58, %v4905_v24  ;;  %v4293_v51 = vmax.f32 %v3920_v57, %v4906_v41  ;;  %v4675_v3 = vsel %vm4635_vm3, %v4550_v11, %v4674_v12  ;;  %v3392_v55 = vadd.f32 %v8894_v10, %v9091_v47 }
 0x4a2   : > { %v4294_v44 = vmax.f32 %v3922_v38, %v4907_v36  ;;  %v4554_v53 = vrot.slane %v4291_v29, %v8902_v0  ;;  %v3397_v5 = vadd.f32 %v8894_v10, %v9100_v16 }
 0x4a3   : > { %v4558_v31 = vrot.slane %v4292_v61, %v8902_v0  ;;  %v4562_v22 = vrot.slane %v4293_v51, %v8902_v0  ;;  %v3617_v30 = vadd.f32 %v3616_v18, %v3392_v55 }
 0x4a4   : > { %v4566_v56 = vrot.slane %v4294_v44, %v8902_v0  ;;  %v4676_v2 = vsel %vm4637_vm4, %v4554_v53, %v4675_v3  ;;  %v3401_v1 = vpop.f32.mrf.mxu1  ;;  %v3622_v13 = vadd.f32 %v5104_v19, %v3397_v5  ;;  %v5110_v44 = vpop.f32.mrf.mxu0 }
 0x4a5   : > { %v4677_v49 = vsel %vm4639_vm5, %v4558_v31, %v4676_v2  ;;  %v3402_v54 = vadd.f32 %v8894_v10, %v3401_v1  ;;  %v3679_v32 = vmax.f32 %v3617_v30, 0.0 }
 0x4a6   : > { %v4678_v47 = vsel %vm4641_vm6, %v4562_v22, %v4677_v49  ;;  %v3403_v45 = vpop.f32.mrf.mxu1  ;;  %v3680_v8 = vmax.f32 %v3622_v13, 0.0 }
 0x4a7   : > { %v4679_v7 = vsel %vm4643_vm7, %v4566_v56, %v4678_v47  ;;  %v3627_v40 = vadd.f32 %v3626_v6, %v3402_v54  ;;  %v3636_v47 = vpop.f32.mrf.mxu0 }
 0x4a8   : > { %4707 = vst.msk [vmem:[%s5934_s12 + $0x28] sm:$0xff] %vm1975_vm14, %v4679_v7 }
 0x4a9   : > { %v3681_v37 = vmax.f32 %v3627_v40, 0.0  ;;  %v3406_v48 = vpop.f32.mrf.mxu1  ;;  %v5113_v45 = vpop.f32.mrf.mxu0 }
 0x4aa   : > { %v3407_v62 = vadd.f32 %v8894_v10, %v3406_v48 }
 0x4ab   : > { %v3699_v21 = vmax.f32 %v3679_v32, %v3681_v37  ;;  %v3408_v4 = vpop.f32.mrf.mxu1  ;;  %v3646_v32 = vpop.f32.mrf.mxu0 }
 0x4ac   : > { %v3632_v27 = vadd.f32 %v5107_v33, %v3407_v62 }
 0x4ad   : > { %v3923_v60 = vcombine.high %v3699_v21, %v3699_v21  ;;  %v3930_v42 = vrot.slane %v3699_v21, %v8900_v23 }
 0x4ae   : > { %v3682_v16 = vmax.f32 %v3632_v27, 0.0 }
 0x4af   : > { %v3937_v46 = vrot.slane %v3923_v60, %v8900_v23  ;;  %v3938_v20 = vcombine.high %v3930_v42, %v3930_v42  ;;  %v4908_v35 = vrot.slane %v3930_v42, 9 }
 0x4b0   : > { %v3700_v34 = vmax.f32 %v3680_v8, %v3682_v16 }
 0x4b1   : > { %v3939_v25 = vcombine.high %v3937_v46, %v3937_v46  ;;  %v4909_v63 = vrot.slane %v3938_v20, 9  ;;  %v4910_v17 = vrot.slane %v3937_v46, 9  ;;  %v4295_v9 = vmax.f32 %v3930_v42, %v4908_v35 }
 0x4b2   : > { %v3940_v19 = vcombine.high %v3700_v34, %v3700_v34  ;;  %v3947_v57 = vrot.slane %v3700_v34, %v8900_v23 }
 0x4b3   : > { %v4911_v58 = vrot.slane %v3939_v25, 9  ;;  %v4296_v39 = vmax.f32 %v3938_v20, %v4909_v63  ;;  %v4297_v14 = vmax.f32 %v3937_v46, %v4910_v17  ;;  %v4570_v38 = vrot.slane %v4295_v9, %v8902_v0 }
 0x4b4   : > { %v3954_v59 = vrot.slane %v3940_v19, %v8900_v23  ;;  %v3955_v26 = vcombine.high %v3947_v57, %v3947_v57  ;;  %v4912_v43 = vrot.slane %v3947_v57, 9 }
 0x4b5   : > { %v4298_v18 = vmax.f32 %v3939_v25, %v4911_v58  ;;  %v4574_v28 = vrot.slane %v4296_v39, %v8902_v0  ;;  %v4578_v24 = vrot.slane %v4297_v14, %v8902_v0 }
 0x4b6   : > { %v3956_v50 = vcombine.high %v3954_v59, %v3954_v59  ;;  %v4913_v11 = vrot.slane %v3955_v26, 9  ;;  %v4914_v15 = vrot.slane %v3954_v59, 9  ;;  %v4299_v41 = vmax.f32 %v3947_v57, %v4912_v43 }
 0x4b7   : > { %v4582_v52 = vrot.slane %v4298_v18, %v8902_v0  ;;  %v4680_v12 = vsel %vm4631_vm1, %v4574_v28, %v4570_v38 }
 0x4b8   : > { %v4681_v36 = vsel %vm4633_vm2, %v4578_v24, %v4680_v12  ;;  %v4915_v29 = vrot.slane %v3956_v50, 9  ;;  %v4300_v61 = vmax.f32 %v3955_v26, %v4913_v11  ;;  %v4301_v51 = vmax.f32 %v3954_v59, %v4914_v15  ;;  %v3411_v3 = vpop.f32.mrf.mxu1 }
 0x4b9   : > { %v4586_v55 = vrot.slane %v4299_v41, %v8902_v0  ;;  %v4682_v33 = vsel %vm4635_vm3, %v4582_v52, %v4681_v36  ;;  %v3412_v7 = vadd.f32 %v8894_v10, %v3411_v3 }
 0x4ba   : > { %v4302_v53 = vmax.f32 %v3956_v50, %v4915_v29  ;;  %v4590_v31 = vrot.slane %v4300_v61, %v8902_v0  ;;  %v4594_v22 = vrot.slane %v4301_v51, %v8902_v0  ;;  %v3413_v56 = vpop.f32.mrf.mxu1 }
 0x4bb   : > { %v4683_v2 = vsel %vm4637_vm4, %v4586_v55, %v4682_v33  ;;  %v3637_v37 = vadd.f32 %v3636_v47, %v3412_v7 }
 0x4bc   : > { %v4598_v1 = vrot.slane %v4302_v53, %v8902_v0  ;;  %v4684_v49 = vsel %vm4639_vm5, %v4590_v31, %v4683_v2 }
 0x4bd   : > { %v4685_v30 = vsel %vm4641_vm6, %v4594_v22, %v4684_v49  ;;  %v3416_v54 = vpop.f32.mrf.mxu1  ;;  %v3683_v4 = vmax.f32 %v3637_v37, 0.0 }
 0x4be   : > { %v4686_v6 = vsel %vm4643_vm7, %v4598_v1, %v4685_v30  ;;  %v3417_v13 = vadd.f32 %v8894_v10, %v3416_v54 }
 0x4bf   : > { %4708 = vst.msk [vmem:[%s5934_s12 + $0x30] sm:$0xff] %vm1975_vm14, %v4686_v6  ;;  %v3418_v5 = vpop.f32.mrf.mxu1 }
 0x4c0   : > { %v3642_v42 = vadd.f32 %v5110_v44, %v3417_v13 }
 0x4c2   : > { %v3684_v25 = vmax.f32 %v3642_v42, 0.0 }
 0x4c4   : > { %v3421_v40 = vpop.f32.mrf.mxu1 }
 0x4c5   : > { %v3422_v48 = vadd.f32 %v8894_v10, %v3421_v40 }
 0x4c6   : > { %v3423_v62 = vpop.f32.mrf.mxu1 }
 0x4c7   : > { %v3647_v21 = vadd.f32 %v3646_v32, %v3422_v48 }
 0x4c9   : > { %v3685_v27 = vmax.f32 %v3647_v21, 0.0  ;;  %v3426_v60 = vpop.f32.mrf.mxu1 }
 0x4ca   : > { %v3427_v8 = vadd.f32 %v8894_v10, %v3426_v60 }
 0x4cb   : > { %v3701_v16 = vmax.f32 %v3683_v4, %v3685_v27  ;;  %v3428_v46 = vpop.f32.mrf.mxu1 }
 0x4cc   : > { %v3652_v20 = vadd.f32 %v5113_v45, %v3427_v8 }
 0x4cd   : > { %v3957_v35 = vcombine.high %v3701_v16, %v3701_v16  ;;  %v3964_v34 = vrot.slane %v3701_v16, %v8900_v23 }
 0x4ce   : > { %v3686_v63 = vmax.f32 %v3652_v20, 0.0 }
 0x4cf   : > { %v3971_v17 = vrot.slane %v3957_v35, %v8900_v23  ;;  %v3972_v9 = vcombine.high %v3964_v34, %v3964_v34  ;;  %v4916_v19 = vrot.slane %v3964_v34, 9 }
 0x4d0   : > { %v3702_v57 = vmax.f32 %v3684_v25, %v3686_v63 }
 0x4d1   : > { %v3973_v58 = vcombine.high %v3971_v17, %v3971_v17  ;;  %v4917_v39 = vrot.slane %v3972_v9, 9  ;;  %v4918_v14 = vrot.slane %v3971_v17, 9  ;;  %v4303_v59 = vmax.f32 %v3964_v34, %v4916_v19 }
 0x4d2   : > { %v3974_v26 = vcombine.high %v3702_v57, %v3702_v57  ;;  %v3981_v10 = vrot.slane %v3702_v57, %v8900_v23 }
 0x4d3   : > { %v4919_v43 = vrot.slane %v3973_v58, 9  ;;  %v4304_v18 = vmax.f32 %v3972_v9, %v4917_v39  ;;  %v4305_v38 = vmax.f32 %v3971_v17, %v4918_v14  ;;  %v4602_v15 = vrot.slane %v4303_v59, %v8902_v0 }
 0x4d4   : > { %v3988_v28 = vrot.slane %v3974_v26, %v8900_v23  ;;  %v3989_v24 = vcombine.high %v3981_v10, %v3981_v10  ;;  %v4920_v50 = vrot.slane %v3981_v10, 9 }
 0x4d5   : > { %v4306_v11 = vmax.f32 %v3973_v58, %v4919_v43  ;;  %v4606_v41 = vrot.slane %v4304_v18, %v8902_v0  ;;  %v4610_v52 = vrot.slane %v4305_v38, %v8902_v0 }
 0x4d6   : > { %v3990_v12 = vcombine.high %v3988_v28, %v3988_v28  ;;  %v4921_v36 = vrot.slane %v3989_v24, 9  ;;  %v4922_v29 = vrot.slane %v3988_v28, 9  ;;  %v4307_v61 = vmax.f32 %v3981_v10, %v4920_v50 }
 0x4d7   : > { %v4614_v51 = vrot.slane %v4306_v11, %v8902_v0  ;;  %v4687_v3 = vsel %vm4631_vm1, %v4606_v41, %v4602_v15 }
 0x4d8   : > { %v4688_v23 = vsel %vm4633_vm2, %v4610_v52, %v4687_v3  ;;  %v4923_v55 = vrot.slane %v3990_v12, 9  ;;  %v4308_v33 = vmax.f32 %v3989_v24, %v4921_v36  ;;  %v4309_v44 = vmax.f32 %v3988_v28, %v4922_v29 }
 0x4d9   : > { %v4689_v53 = vsel %vm4635_vm3, %v4614_v51, %v4688_v23  ;;  %v4618_v31 = vrot.slane %v4307_v61, %v8902_v0 }
 0x4da   : > { %v4310_v22 = vmax.f32 %v3990_v12, %v4923_v55  ;;  %v4622_v56 = vrot.slane %v4308_v33, %v8902_v0  ;;  %v4626_v2 = vrot.slane %v4309_v44, %v8902_v0 }
 0x4db   : > { %v4690_v1 = vsel %vm4637_vm4, %v4618_v31, %v4689_v53 }
 0x4dc   : > { %v4630_v49 = vrot.slane %v4310_v22, %v8902_v0  ;;  %v4691_v30 = vsel %vm4639_vm5, %v4622_v56, %v4690_v1 }
 0x4dd   : > { %v4692_v54 = vsel %vm4641_vm6, %v4626_v2, %v4691_v30 }
 0x4de   : > { %v4693_v47 = vsel %vm4643_vm7, %v4630_v49, %v4692_v54 }
 0x4df   : > { %4709 = vst.msk [vmem:[%s5934_s12 + $0x38] sm:$0xff] %vm1975_vm14, %v4693_v47 }
 0x4e0   : > { %5780 = shalt.err (!%p5777_p4)
}
 0x4e1   : > { %s5781_s30 = scalar_lea.hbm %s9189_s6, 1024  ;;  %s5785_s14 = scalar_lea.hbm %s9244_s5, 2048 }
 0x4e2   : > { %p5782_p7 = scmp.ne.s32.totalorder %s9189_s6, %s5781_s30  ;;  %p5786_p10 = scmp.lt.s32.totalorder %s9189_s6, %s9244_s5 }
 0x4e3   : > { %p5787_p11 = scmp.lt.s32.totalorder %s5785_s14, %s5781_s30 }
 0x4e4   : > { %p5783_p8 = pnand %p5782_p7, %p5914_p5 }
 0x4e5   : > { %p5788_p12 = por %p5787_p11, %p5786_p10 }
 0x4e6   : > { %p5784_p9 = pneg %p5783_p8 }
 0x4e8   : > { %p5789_p13 = pnand %p5788_p12, %p5784_p9 }
 0x4ea   : > { %5792 = shalt.err (!%p5789_p13)
}
 0x4eb   : > { %s5844_s16 = smov 128   ;;  %s5845_s17 = smov 8  }
 0x4ec   : > { %5179 = dma.vmem_to_hbm [thread:$0]  (%p5914_p5), %s9191_s23, 1024, %s9189_s6, %s9199_s22, %s5844_s16, %s5844_s16, %s5845_s17  }
 0x4ed PF: > { %p5185_p0 = scmp.ge.s32.totalorder %s5827_s21, 2  ;;  %s4739_s25 = sand.u32 1, %s5815_s18  }
 0x4ee   : > { %s4740_s26 = scalar_lea.sflag [#allocation4], %s4739_s25 }
 0x4ef   : > { %p5182_p1 = pnand %p5185_p0, %p5918_p6 }
 0x4f1   : > { %p5183_p2 = pneg %p5182_p1 }
 0x4f3   : > { %5810 = dma.done.wait (%p5183_p2), %s4740_s26, 1024  }
 0x4f4   : > { %5812 = vsyncadd (%p5183_p2), %s4740_s26, 4294966272  ;;  %p15_p3 = scmp.ge.s32.totalorder %s5901_s24, 4   ;;  %s9584_s18 = smov %s5819_s19 }
 0x4f5   : > { %s9585_s19 = smov %s5823_s20  ;;  %s9586_s20 = smov %s5912_s27 }
 0x4f6   : > { %s9587_s21 = smov %s5901_s24  ;;  %17 = sbr.rel (!%p15_p3) target bundleno = 3 (0x3), region = 80 }
 0x4fb   :  { %4745 = vsyncpa [#allocation4], 1 }
 0x4fc   :  { %4747 = vsyncpa [#allocation4 + $0x1], 1 }

</bundles_post_ra>
